<compile_context>
chip_gen: v6e
topology: v6e:2x2x1
jax: 0.10.0
libtpu: 0.0.40
codegen_flags: <defaults>
</compile_context>

<pallas_src>
from functools import partial

import numpy as np
import jax
import jax.numpy as jnp
from jax.experimental import pallas as pl
from jax.experimental.pallas import tpu as pltpu

BN_EPS = 1e-5
NC_PAD = 128     # fc output padded to a full 128-lane vreg (lane-dense store)

# conv1 output rows are emitted in this order (all even oh first, then all odd
# oh) so the 2x2 H-pool in the kernel is an aligned 16-row slab max.
_ROW_ORDER = np.array(list(range(0, 32, 2)) + list(range(1, 32, 2)), np.int32)


# ------------------------------ Pallas kernel ------------------------------ #

def fused_convnet_kernel(lhs1_ref, a1_ref, a2_hbm_ref, wfc_hbm_ref,
                         g1_ref, be1_ref, g2_ref, be2_ref, bfc_ref,
                         o_ref,
                         a2_vmem, wfc_vmem, z2_ref, lhs2_ref, feat_ref,
                         dma_sem):
    """Whole SimpleConvNet forward, single invocation, VMEM resident.

    lhs1_ref: (B*32, 640) bf16  conv1 LHS, row=(b, oh in _ROW_ORDER), col=kh*128+iw*4+ci
    a1_ref  : (640, 512)  bf16  conv1 banded weights, col=(ow%2)*256+(ow//2)*16+co
    a2_hbm  : (1280, 512) bf16  conv2 banded weights (HBM; DMA'd during layer 1)
    wfc_hbm : (2048, 128) bf16  fc weights, row=h*256+w*32+co (HBM; DMA'd)
    g*/be*  : (1, 512)    f32   BN gamma/beta pre-tiled to the lane layout
    bfc_ref : (1, 128)    f32   fc bias (zero padded)
    o_ref   : (B, 128)    f32   logits (first num_classes lanes valid)
    scratch : a2/wfc VMEM staging, z2 (padded layer-2 input rows), lhs2
              (kh-unrolled conv2 LHS), feat (fc LHS), 2 DMA semaphores
    """
    f32 = jnp.float32
    bf16 = jnp.bfloat16
    B = o_ref.shape[0]

    # Kick off the layer-2 / fc weight fetches so their ~1.8 MB of DMA overlaps
    # layer-1 compute instead of serialising before the kernel body (biggest
    # relative win on v5e/v6e HBM bandwidth).
    a2_cp = pltpu.make_async_copy(a2_hbm_ref, a2_vmem, dma_sem.at[0])
    wfc_cp = pltpu.make_async_copy(wfc_hbm_ref, wfc_vmem, dma_sem.at[1])
    a2_cp.start()
    wfc_cp.start()

    z2_ref[...] = jnp.zeros_like(z2_ref)    # rows outside [8, 24) stay 0 = H pad

    def bn_scale_shift(y, lane_shifts, count, g, be):
        # One-pass batch stats over all rows, then an exact per-channel lane
        # reduction: after adding rolls by every shift each lane holds the sum
        # over its channel's congruence class.
        # NOTE: var = E[x^2] - E[x]^2 in f32; fine while |mean| is not >> std
        # (true for these activations) -- switch to two-pass/Welford otherwise.
        s1 = jnp.sum(y, axis=0, keepdims=True)            # (1, 512)
        s2 = jnp.sum(y * y, axis=0, keepdims=True)
        for sh in lane_shifts:                            # XLU butterfly
            s1 = s1 + pltpu.roll(s1, sh, axis=1)
            s2 = s2 + pltpu.roll(s2, sh, axis=1)
        inv_n = 1.0 / count
        mean = s1 * inv_n
        var = s2 * inv_n - mean * mean
        scale = g * jax.lax.rsqrt(var + BN_EPS)
        shift = be - mean * scale
        return scale, shift

    # ---- layer 1: 5x5 conv as ONE (B*32, 640) @ (640, 512) bf16 matmul ------
    y1 = jnp.dot(lhs1_ref[...], a1_ref[...], preferred_element_type=f32)
    scale1, shift1 = bn_scale_shift(y1, (16, 32, 64, 128, 256),
                                    B * 32 * 32, g1_ref[...], be1_ref[...])
    act1 = jnp.maximum(y1 * scale1 + shift1, 0.0)                  # BN + ReLU
    wp1 = jnp.maximum(act1[:, 0:256], act1[:, 256:512])            # W-pool (lane halves)
    for b in range(B):                                             # H-pool (row halves)
        r0 = b * 32
        z2_ref[b, 8:24, :] = jnp.maximum(wp1[r0:r0 + 16, :],
                                         wp1[r0 + 16:r0 + 32, :])

    # ---- layer 2: kh-unrolled LHS, ONE (B*16, 1280) @ (1280, 512) matmul ----
    for b in range(B):
        r0 = b * 16
        for kh in range(5):
            lhs2_ref[r0:r0 + 16, kh * 256:(kh + 1) * 256] = (
                z2_ref[b, kh + 6:kh + 22, :].astype(bf16))
    a2_cp.wait()
    y2 = jnp.dot(lhs2_ref[...], a2_vmem[...], preferred_element_type=f32)
    scale2, shift2 = bn_scale_shift(y2, (32, 64, 128, 256),
                                    B * 16 * 16, g2_ref[...], be2_ref[...])
    act2 = jnp.maximum(y2 * scale2 + shift2, 0.0)
    wp2 = jnp.maximum(act2[:, 0:256], act2[:, 256:512])            # (B*16, 256)

    # 2x2 H-pool fused with moving h into lanes: fc LHS becomes (B, 2048).
    for b in range(B):
        r0 = b * 16
        for h in range(8):
            feat_ref[b:b + 1, h * 256:(h + 1) * 256] = jnp.maximum(
                wp2[r0 + 2 * h:r0 + 2 * h + 1, :],
                wp2[r0 + 2 * h + 1:r0 + 2 * h + 2, :])

    # ---- fc: ONE (B, 2048) @ (2048, 128) bf16 matmul, single lane-dense store
    wfc_cp.wait()
    o_ref[...] = (jnp.dot(feat_ref[...].astype(bf16), wfc_vmem[...],
                          preferred_element_type=f32) + bfc_ref[...])


# --------------------------- parameter preparation ------------------------- #

def _conv_band(w_oihw, width):
    """Banded conv-as-GEMM weights.

    Returns A of shape (5, width*Cin, width*Cout) with
      A[kh, iw*Cin + ci, (ow%2)*half + (ow//2)*Cout + co] = w[co, ci, kh, iw-ow+2]
    for 0 <= iw-ow+2 < 5 (zero elsewhere; W zero-padding handled by omission).
    The even/odd-ow column split makes the in-kernel 2x2 W-pool a pair of
    aligned 256-lane slices.
    """
    w = np.asarray(w_oihw, np.float32)           # (Cout, Cin, 5, 5)
    cout, cin, kdim, _ = w.shape
    half = (width // 2) * cout
    A = np.zeros((kdim, width * cin, 2 * half), np.float32)
    for kh in range(kdim):
        for ow in range(width):
            col0 = (ow % 2) * half + (ow // 2) * cout
            for kw in range(kdim):
                iw = ow + kw - 2
                if 0 <= iw < width:
                    A[kh, iw * cin:(iw + 1) * cin, col0:col0 + cout] = w[:, :, kh, kw].T
    return A


def prepare_params(params):
    """One-time relayout of the PyTorch-style parameters (hoisted out of the
    per-forward path).  MXU operands are pre-cast to bf16; the 5 kh taps are
    concatenated into the contraction dim."""
    w1 = np.asarray(params["w1"], np.float32)     # (16, 4, 5, 5)  OIHW
    w2 = np.asarray(params["w2"], np.float32)     # (32, 16, 5, 5)
    wfc = np.asarray(params["wfc"], np.float32)   # (nc, 2048) over (C=32,H=8,W=8)
    nc = wfc.shape[0]

    a1 = _conv_band(w1, width=32).reshape(5 * 32 * 4, 512)     # (640, 512)
    a2 = _conv_band(w2, width=16).reshape(5 * 16 * 16, 512)    # (1280, 512)

    # fc weights flattened to the kernel feature layout: row = h*256 + w*32 + c.
    wfc_r = wfc.reshape(nc, 32, 8, 8)                          # (cls, c, h, w)
    wk = np.zeros((8 * 8 * 32, NC_PAD), np.float32)            # (2048, 128)
    wk[:, :nc] = np.transpose(wfc_r, (2, 3, 1, 0)).reshape(8 * 8 * 32, nc)
    bfc = np.zeros((1, NC_PAD), np.float32)
    bfc[0, :nc] = np.asarray(params["bfc"], np.float32)

    # BN gamma/beta tiled to the 512-lane layout (channel = lane % C).
    g1t = np.tile(np.asarray(params["g1"], np.float32), 32).reshape(1, 512)
    be1t = np.tile(np.asarray(params["be1"], np.float32), 32).reshape(1, 512)
    g2t = np.tile(np.asarray(params["g2"], np.float32), 16).reshape(1, 512)
    be2t = np.tile(np.asarray(params["be2"], np.float32), 16).reshape(1, 512)

    # Conv biases b1/b2 intentionally NOT used by the kernel: a per-channel
    # constant added before training-mode BatchNorm is cancelled by the mean.
    return {
        "a1": jnp.asarray(a1, jnp.bfloat16),
        "a2": jnp.asarray(a2, jnp.bfloat16),
        "wfc": jnp.asarray(wk, jnp.bfloat16),
        "bfc": jnp.asarray(bfc),
        "g1": jnp.asarray(g1t), "be1": jnp.asarray(be1t),
        "g2": jnp.asarray(g2t), "be2": jnp.asarray(be2t),
    }


# ------------------------------ JAX wrapper -------------------------------- #

_VMEM_SPEC = pl.BlockSpec(memory_space=pltpu.MemorySpace.VMEM)
_ANY_SPEC = pl.BlockSpec(memory_space=pl.ANY)


@partial(jax.jit, static_argnames=("num_classes",))
def simple_convnet_forward(x_nchw, prep, *, num_classes):
    B, C, H, W = x_nchw.shape
    assert (C, H, W) == (4, 32, 32), "fc layer fixes the input to (4, 32, 32)"

    # NCHW -> rows = h, lanes = w*Cin + ci; zero-pad H by 2; unroll the 5 kh
    # taps into the contraction dim and emit output rows in interleaved order
    # (_ROW_ORDER) so the in-kernel H-pool is an aligned slab max.  ~80 KB bf16.
    x_rows = jnp.transpose(x_nchw, (0, 2, 3, 1)).reshape(B, H, W * C)
    x_pad = jnp.pad(x_rows, ((0, 0), (2, 2), (0, 0)))
    gather_idx = _ROW_ORDER[:, None] + np.arange(5)[None, :]          # (32, 5)
    lhs1 = x_pad[:, gather_idx, :].reshape(B * 32, 5 * W * C).astype(jnp.bfloat16)

    out = pl.pallas_call(
        fused_convnet_kernel,
        out_shape=jax.ShapeDtypeStruct((B, NC_PAD), jnp.float32),
        in_specs=[_VMEM_SPEC, _VMEM_SPEC, _ANY_SPEC, _ANY_SPEC,
                  _VMEM_SPEC, _VMEM_SPEC, _VMEM_SPEC, _VMEM_SPEC, _VMEM_SPEC],
        out_specs=_VMEM_SPEC,
        scratch_shapes=[
            pltpu.VMEM((1280, 512), jnp.bfloat16),      # a2 staging (DMA dst)
            pltpu.VMEM((2048, NC_PAD), jnp.bfloat16),   # wfc staging (DMA dst)
            pltpu.VMEM((B, 32, 256), jnp.float32),      # z2: padded layer-2 input
            pltpu.VMEM((B * 16, 1280), jnp.bfloat16),   # lhs2: kh-unrolled conv2 LHS
            pltpu.VMEM((B, 2048), jnp.float32),         # feat: fc LHS
            pltpu.SemaphoreType.DMA((2,)),              # a2 / wfc copy semaphores
        ],
        # ~2.7 MiB of VMEM in use; 32 MiB leaves headroom for larger batches
        # and stays under v7x's 64 MiB physical VMEM.
        compiler_params=pltpu.CompilerParams(vmem_limit_bytes=32 * 1024 * 1024),
    )(lhs1, prep["a1"], prep["a2"], prep["wfc"],
      prep["g1"], prep["be1"], prep["g2"], prep["be2"], prep["bfc"])
    return out[:, :num_classes]


# --------------------------- pure-JAX reference ---------------------------- #

def reference_forward(x_nchw, params):
    """Reference with the same operand quantization as the kernel (bf16 inputs
    to every conv/matmul, f32 accumulation, f32 BN/ReLU/pool epilogues)."""
    bf16 = jnp.bfloat16

    def block(x, w, cb, g, be):
        y = jax.lax.conv_general_dilated(
            x.astype(bf16), w.astype(bf16), window_strides=(1, 1),
            padding=((2, 2), (2, 2)),
            dimension_numbers=("NCHW", "OIHW", "NCHW"),
            preferred_element_type=jnp.float32)
        y = y + cb[None, :, None, None]     # kernel drops this; BN cancels it
        mean = jnp.mean(y, axis=(0, 2, 3), keepdims=True)
        var = jnp.mean(jnp.square(y - mean), axis=(0, 2, 3), keepdims=True)
        y = (y - mean) * jax.lax.rsqrt(var + BN_EPS)
        y = y * g[None, :, None, None] + be[None, :, None, None]
        y = jnp.maximum(y, 0.0)
        B, C, H, W = y.shape
        return y.reshape(B, C, H // 2, 2, W // 2, 2).max(axis=(3, 5))

    h = block(x_nchw, params["w1"], params["b1"], params["g1"], params["be1"])
    h = block(h, params["w2"], params["b2"], params["g2"], params["be2"])
    feat = h.reshape(h.shape[0], -1)        # PyTorch (C, H, W) flatten order
    return (jnp.dot(feat.astype(bf16), params["wfc"].T.astype(bf16),
                    preferred_element_type=jnp.float32) + params["bfc"])


# ---------------------------------- main ----------------------------------- #

if __name__ == "__main__":
    input_dim, num_classes = 4, 10
    B, H, W = 2, 32, 32          # fc expects 8*8*32 -> 32x32 spatial input

    key = jax.random.PRNGKey(0)
    ks = jax.random.split(key, 11)
    params = {
        "w1": 0.10 * jax.random.normal(ks[0], (16, input_dim, 5, 5), jnp.float32),
        "b1": 0.10 * jax.random.normal(ks[1], (16,), jnp.float32),
        "g1": 1.0 + 0.10 * jax.random.normal(ks[2], (16,), jnp.float32),
        "be1": 0.10 * jax.random.normal(ks[3], (16,), jnp.float32),
        "w2": 0.05 * jax.random.normal(ks[4], (32, 16, 5, 5), jnp.float32),
        "b2": 0.10 * jax.random.normal(ks[5], (32,), jnp.float32),
        "g2": 1.0 + 0.10 * jax.random.normal(ks[6], (32,), jnp.float32),
        "be2": 0.10 * jax.random.normal(ks[7], (32,), jnp.float32),
        "wfc": 0.02 * jax.random.normal(ks[8], (num_classes, 8 * 8 * 32), jnp.float32),
        "bfc": 0.10 * jax.random.normal(ks[9], (num_classes,), jnp.float32),
    }
    x = jax.random.normal(ks[10], (B, input_dim, H, W), jnp.float32)

    prep = prepare_params(params)                    # one-time weight relayout
    out = simple_convnet_forward(x, prep, num_classes=num_classes)
    out = jax.block_until_ready(out)
    assert out.shape == (B, num_classes), out.shape

    ref = reference_forward(x, params)
    err = float(jnp.max(jnp.abs(out - ref)))
    assert jnp.allclose(out, ref, atol=2e-3, rtol=2e-3), f"max abs err {err}"

    print("KERNEL_OK")
</pallas_src>

<mosaic_0001>
module attributes {stable_mosaic.version = 11 : i64} {
  func.func @fused_convnet_kernel(%arg0: memref<64x640xbf16, #tpu.memory_space<vmem>>, %arg1: memref<640x512xbf16, #tpu.memory_space<vmem>>, %arg2: memref<1280x512xbf16, #tpu.memory_space<any>>, %arg3: memref<2048x128xbf16, #tpu.memory_space<any>>, %arg4: memref<1x512xf32, #tpu.memory_space<vmem>>, %arg5: memref<1x512xf32, #tpu.memory_space<vmem>>, %arg6: memref<1x512xf32, #tpu.memory_space<vmem>>, %arg7: memref<1x512xf32, #tpu.memory_space<vmem>>, %arg8: memref<1x128xf32, #tpu.memory_space<vmem>>, %arg9: memref<2x128xf32, #tpu.memory_space<vmem>>, %arg10: memref<1280x512xbf16, #tpu.memory_space<vmem>>, %arg11: memref<2048x128xbf16, #tpu.memory_space<vmem>>, %arg12: memref<2x32x256xf32, #tpu.memory_space<vmem>>, %arg13: memref<32x1280xbf16, #tpu.memory_space<vmem>>, %arg14: memref<2x2048xf32, #tpu.memory_space<vmem>>, %arg15: memref<2x!tpu.dma_semaphore, #tpu.memory_space<semaphore_mem>>) attributes {dimension_semantics = [], scalar_prefetch = 0 : i64, scratch_operands = 6 : i64, tpu.core_type = #tpu.core_type<tc>} {
    %c0_i32 = arith.constant 0 : i32
    %0 = tpu.memref_slice %arg15[%c0_i32] : memref<2x!tpu.dma_semaphore, #tpu.memory_space<semaphore_mem>> -> memref<1x!tpu.dma_semaphore, #tpu.memory_space<semaphore_mem>>
    %1 = tpu.memref_squeeze %0 : memref<1x!tpu.dma_semaphore, #tpu.memory_space<semaphore_mem>> -> memref<!tpu.dma_semaphore, #tpu.memory_space<semaphore_mem>>
    tpu.enqueue_dma source(%arg2 : memref<1280x512xbf16, #tpu.memory_space<any>>) target(%arg10 : memref<1280x512xbf16, #tpu.memory_space<vmem>>) target_semaphore(%1 : memref<!tpu.dma_semaphore, #tpu.memory_space<semaphore_mem>>)
    %c1_i32 = arith.constant 1 : i32
    %2 = tpu.memref_slice %arg15[%c1_i32] : memref<2x!tpu.dma_semaphore, #tpu.memory_space<semaphore_mem>> -> memref<1x!tpu.dma_semaphore, #tpu.memory_space<semaphore_mem>>
    %3 = tpu.memref_squeeze %2 : memref<1x!tpu.dma_semaphore, #tpu.memory_space<semaphore_mem>> -> memref<!tpu.dma_semaphore, #tpu.memory_space<semaphore_mem>>
    tpu.enqueue_dma source(%arg3 : memref<2048x128xbf16, #tpu.memory_space<any>>) target(%arg11 : memref<2048x128xbf16, #tpu.memory_space<vmem>>) target_semaphore(%3 : memref<!tpu.dma_semaphore, #tpu.memory_space<semaphore_mem>>)
    %cst = arith.constant 0.000000e+00 : f32
    %4 = vector.broadcast %cst : f32 to vector<2x32x256xf32>
    %c0 = arith.constant 0 : index
    %c0_0 = arith.constant 0 : index
    %c0_1 = arith.constant 0 : index
    %5 = vector.load %arg12[%c0, %c0_0, %c0_1] : memref<2x32x256xf32, #tpu.memory_space<vmem>>, vector<2x32x256xf32>
    tpu.vector_store %arg12[%c0, %c0_0, %c0_1], %4 {strides = array<i32>} : memref<2x32x256xf32, #tpu.memory_space<vmem>>, vector<2x32x256xf32>,
    %c0_2 = arith.constant 0 : index
    %c0_3 = arith.constant 0 : index
    %6 = vector.load %arg0[%c0_2, %c0_3] : memref<64x640xbf16, #tpu.memory_space<vmem>>, vector<64x640xbf16>
    %c0_4 = arith.constant 0 : index
    %c0_5 = arith.constant 0 : index
    %7 = vector.load %arg1[%c0_4, %c0_5] : memref<640x512xbf16, #tpu.memory_space<vmem>>, vector<640x512xbf16>
    %cst_6 = arith.constant dense<0.000000e+00> : vector<64x512xf32>
    %8 = tpu.matmul %6, %7, %cst_6 {dimension_numbers = #tpu.dot_dimension_numbers<[1], [0], [0], [1], [0, 0, 1, 1], [], []>} : vector<64x640xbf16>, vector<640x512xbf16>, vector<64x512xf32> -> vector<64x512xf32>
    %c0_7 = arith.constant 0 : index
    %c0_8 = arith.constant 0 : index
    %9 = vector.load %arg4[%c0_7, %c0_8] : memref<1x512xf32, #tpu.memory_space<vmem>>, vector<1x512xf32>
    %c0_9 = arith.constant 0 : index
    %c0_10 = arith.constant 0 : index
    %10 = vector.load %arg5[%c0_9, %c0_10] : memref<1x512xf32, #tpu.memory_space<vmem>>, vector<1x512xf32>
    %cst_11 = arith.constant dense<0.000000e+00> : vector<512xf32>
    %11 = vector.multi_reduction <add>, %8, %cst_11 [0] : vector<64x512xf32> to vector<512xf32>
    %12 = vector.shape_cast %11 : vector<512xf32> to vector<1x512xf32>
    %13 = arith.mulf %8, %8 : vector<64x512xf32>
    %cst_12 = arith.constant dense<0.000000e+00> : vector<512xf32>
    %14 = vector.multi_reduction <add>, %13, %cst_12 [0] : vector<64x512xf32> to vector<512xf32>
    %15 = vector.shape_cast %14 : vector<512xf32> to vector<1x512xf32>
    %c16_i32 = arith.constant 16 : i32
    %16 = tpu.dynamic_rotate %12 by %c16_i32 dim 1 : vector<1x512xf32>, i32 -> vector<1x512xf32>
    %17 = arith.addf %12, %16 : vector<1x512xf32>
    %c16_i32_13 = arith.constant 16 : i32
    %18 = tpu.dynamic_rotate %15 by %c16_i32_13 dim 1 : vector<1x512xf32>, i32 -> vector<1x512xf32>
    %19 = arith.addf %15, %18 : vector<1x512xf32>
    %c32_i32 = arith.constant 32 : i32
    %20 = tpu.dynamic_rotate %17 by %c32_i32 dim 1 : vector<1x512xf32>, i32 -> vector<1x512xf32>
    %21 = arith.addf %17, %20 : vector<1x512xf32>
    %c32_i32_14 = arith.constant 32 : i32
    %22 = tpu.dynamic_rotate %19 by %c32_i32_14 dim 1 : vector<1x512xf32>, i32 -> vector<1x512xf32>
    %23 = arith.addf %19, %22 : vector<1x512xf32>
    %c64_i32 = arith.constant 64 : i32
    %24 = tpu.dynamic_rotate %21 by %c64_i32 dim 1 : vector<1x512xf32>, i32 -> vector<1x512xf32>
    %25 = arith.addf %21, %24 : vector<1x512xf32>
    %c64_i32_15 = arith.constant 64 : i32
    %26 = tpu.dynamic_rotate %23 by %c64_i32_15 dim 1 : vector<1x512xf32>, i32 -> vector<1x512xf32>
    %27 = arith.addf %23, %26 : vector<1x512xf32>
    %c128_i32 = arith.constant 128 : i32
    %28 = tpu.dynamic_rotate %25 by %c128_i32 dim 1 : vector<1x512xf32>, i32 -> vector<1x512xf32>
    %29 = arith.addf %25, %28 : vector<1x512xf32>
    %c128_i32_16 = arith.constant 128 : i32
    %30 = tpu.dynamic_rotate %27 by %c128_i32_16 dim 1 : vector<1x512xf32>, i32 -> vector<1x512xf32>
    %31 = arith.addf %27, %30 : vector<1x512xf32>
    %c256_i32 = arith.constant 256 : i32
    %32 = tpu.dynamic_rotate %29 by %c256_i32 dim 1 : vector<1x512xf32>, i32 -> vector<1x512xf32>
    %33 = arith.addf %29, %32 : vector<1x512xf32>
    %c256_i32_17 = arith.constant 256 : i32
    %34 = tpu.dynamic_rotate %31 by %c256_i32_17 dim 1 : vector<1x512xf32>, i32 -> vector<1x512xf32>
    %35 = arith.addf %31, %34 : vector<1x512xf32>
    %cst_18 = arith.constant 4.8828125E-4 : f32
    %36 = vector.broadcast %cst_18 : f32 to vector<1x512xf32>
    %37 = arith.mulf %33, %36 : vector<1x512xf32>
    %cst_19 = arith.constant 4.8828125E-4 : f32
    %38 = vector.broadcast %cst_19 : f32 to vector<1x512xf32>
    %39 = arith.mulf %35, %38 : vector<1x512xf32>
    %40 = arith.mulf %37, %37 : vector<1x512xf32>
    %41 = arith.subf %39, %40 : vector<1x512xf32>
    %cst_20 = arith.constant 9.99999974E-6 : f32
    %42 = vector.broadcast %cst_20 : f32 to vector<1x512xf32>
    %43 = arith.addf %41, %42 : vector<1x512xf32>
    %44 = math.rsqrt %43 : vector<1x512xf32>
    %45 = arith.mulf %9, %44 : vector<1x512xf32>
    %46 = arith.mulf %37, %45 : vector<1x512xf32>
    %47 = arith.subf %10, %46 : vector<1x512xf32>
    %48 = vector.broadcast %45 : vector<1x512xf32> to vector<64x512xf32>
    %49 = arith.mulf %8, %48 : vector<64x512xf32>
    %50 = vector.broadcast %47 : vector<1x512xf32> to vector<64x512xf32>
    %51 = arith.addf %49, %50 : vector<64x512xf32>
    %cst_21 = arith.constant 0.000000e+00 : f32
    %52 = vector.broadcast %cst_21 : f32 to vector<64x512xf32>
    %53 = arith.maximumf %51, %52 : vector<64x512xf32>
    %54 = vector.extract_strided_slice %53 {offsets = [0, 0], sizes = [64, 256], strides = [1, 1]} : vector<64x512xf32> to vector<64x256xf32>
    %55 = vector.extract_strided_slice %53 {offsets = [0, 256], sizes = [64, 256], strides = [1, 1]} : vector<64x512xf32> to vector<64x256xf32>
    %56 = arith.maximumf %54, %55 : vector<64x256xf32>
    %57 = vector.extract_strided_slice %56 {offsets = [0, 0], sizes = [16, 256], strides = [1, 1]} : vector<64x256xf32> to vector<16x256xf32>
    %58 = vector.extract_strided_slice %56 {offsets = [16, 0], sizes = [16, 256], strides = [1, 1]} : vector<64x256xf32> to vector<16x256xf32>
    %59 = arith.maximumf %57, %58 : vector<16x256xf32>
    %c0_22 = arith.constant 0 : index
    %c8 = arith.constant 8 : index
    %c0_23 = arith.constant 0 : index
    %60 = vector.load %arg12[%c0_22, %c8, %c0_23] : memref<2x32x256xf32, #tpu.memory_space<vmem>>, vector<1x16x256xf32>
    %61 = vector.shape_cast %60 : vector<1x16x256xf32> to vector<16x256xf32>
    %62 = vector.shape_cast %59 : vector<16x256xf32> to vector<1x16x256xf32>
    tpu.vector_store %arg12[%c0_22, %c8, %c0_23], %62 {strides = array<i32>} : memref<2x32x256xf32, #tpu.memory_space<vmem>>, vector<1x16x256xf32>,
    %63 = vector.extract_strided_slice %56 {offsets = [32, 0], sizes = [16, 256], strides = [1, 1]} : vector<64x256xf32> to vector<16x256xf32>
    %64 = vector.extract_strided_slice %56 {offsets = [48, 0], sizes = [16, 256], strides = [1, 1]} : vector<64x256xf32> to vector<16x256xf32>
    %65 = arith.maximumf %63, %64 : vector<16x256xf32>
    %c1 = arith.constant 1 : index
    %c8_24 = arith.constant 8 : index
    %c0_25 = arith.constant 0 : index
    %66 = vector.load %arg12[%c1, %c8_24, %c0_25] : memref<2x32x256xf32, #tpu.memory_space<vmem>>, vector<1x16x256xf32>
    %67 = vector.shape_cast %66 : vector<1x16x256xf32> to vector<16x256xf32>
    %68 = vector.shape_cast %65 : vector<16x256xf32> to vector<1x16x256xf32>
    tpu.vector_store %arg12[%c1, %c8_24, %c0_25], %68 {strides = array<i32>} : memref<2x32x256xf32, #tpu.memory_space<vmem>>, vector<1x16x256xf32>,
    %c0_26 = arith.constant 0 : index
    %c6 = arith.constant 6 : index
    %c0_27 = arith.constant 0 : index
    %69 = vector.load %arg12[%c0_26, %c6, %c0_27] : memref<2x32x256xf32, #tpu.memory_space<vmem>>, vector<1x16x256xf32>
    %70 = vector.shape_cast %69 : vector<1x16x256xf32> to vector<16x256xf32>
    %71 = arith.truncf %70 : vector<16x256xf32> to vector<16x256xbf16>
    %c0_28 = arith.constant 0 : index
    %c0_29 = arith.constant 0 : index
    %72 = vector.load %arg13[%c0_28, %c0_29] : memref<32x1280xbf16, #tpu.memory_space<vmem>>, vector<16x256xbf16>
    tpu.vector_store %arg13[%c0_28, %c0_29], %71 {strides = array<i32>} : memref<32x1280xbf16, #tpu.memory_space<vmem>>, vector<16x256xbf16>,
    %c0_30 = arith.constant 0 : index
    %c7 = arith.constant 7 : index
    %c0_31 = arith.constant 0 : index
    %73 = vector.load %arg12[%c0_30, %c7, %c0_31] : memref<2x32x256xf32, #tpu.memory_space<vmem>>, vector<1x16x256xf32>
    %74 = vector.shape_cast %73 : vector<1x16x256xf32> to vector<16x256xf32>
    %75 = arith.truncf %74 : vector<16x256xf32> to vector<16x256xbf16>
    %c0_32 = arith.constant 0 : index
    %c256 = arith.constant 256 : index
    %76 = vector.load %arg13[%c0_32, %c256] : memref<32x1280xbf16, #tpu.memory_space<vmem>>, vector<16x256xbf16>
    tpu.vector_store %arg13[%c0_32, %c256], %75 {strides = array<i32>} : memref<32x1280xbf16, #tpu.memory_space<vmem>>, vector<16x256xbf16>,
    %c0_33 = arith.constant 0 : index
    %c8_34 = arith.constant 8 : index
    %c0_35 = arith.constant 0 : index
    %77 = vector.load %arg12[%c0_33, %c8_34, %c0_35] : memref<2x32x256xf32, #tpu.memory_space<vmem>>, vector<1x16x256xf32>
    %78 = vector.shape_cast %77 : vector<1x16x256xf32> to vector<16x256xf32>
    %79 = arith.truncf %78 : vector<16x256xf32> to vector<16x256xbf16>
    %c0_36 = arith.constant 0 : index
    %c512 = arith.constant 512 : index
    %80 = vector.load %arg13[%c0_36, %c512] : memref<32x1280xbf16, #tpu.memory_space<vmem>>, vector<16x256xbf16>
    tpu.vector_store %arg13[%c0_36, %c512], %79 {strides = array<i32>} : memref<32x1280xbf16, #tpu.memory_space<vmem>>, vector<16x256xbf16>,
    %c0_37 = arith.constant 0 : index
    %c9 = arith.constant 9 : index
    %c0_38 = arith.constant 0 : index
    %81 = vector.load %arg12[%c0_37, %c9, %c0_38] : memref<2x32x256xf32, #tpu.memory_space<vmem>>, vector<1x16x256xf32>
    %82 = vector.shape_cast %81 : vector<1x16x256xf32> to vector<16x256xf32>
    %83 = arith.truncf %82 : vector<16x256xf32> to vector<16x256xbf16>
    %c0_39 = arith.constant 0 : index
    %c768 = arith.constant 768 : index
    %84 = vector.load %arg13[%c0_39, %c768] : memref<32x1280xbf16, #tpu.memory_space<vmem>>, vector<16x256xbf16>
    tpu.vector_store %arg13[%c0_39, %c768], %83 {strides = array<i32>} : memref<32x1280xbf16, #tpu.memory_space<vmem>>, vector<16x256xbf16>,
    %c0_40 = arith.constant 0 : index
    %c10 = arith.constant 10 : index
    %c0_41 = arith.constant 0 : index
    %85 = vector.load %arg12[%c0_40, %c10, %c0_41] : memref<2x32x256xf32, #tpu.memory_space<vmem>>, vector<1x16x256xf32>
    %86 = vector.shape_cast %85 : vector<1x16x256xf32> to vector<16x256xf32>
    %87 = arith.truncf %86 : vector<16x256xf32> to vector<16x256xbf16>
    %c0_42 = arith.constant 0 : index
    %c1024 = arith.constant 1024 : index
    %88 = vector.load %arg13[%c0_42, %c1024] : memref<32x1280xbf16, #tpu.memory_space<vmem>>, vector<16x256xbf16>
    tpu.vector_store %arg13[%c0_42, %c1024], %87 {strides = array<i32>} : memref<32x1280xbf16, #tpu.memory_space<vmem>>, vector<16x256xbf16>,
    %c1_43 = arith.constant 1 : index
    %c6_44 = arith.constant 6 : index
    %c0_45 = arith.constant 0 : index
    %89 = vector.load %arg12[%c1_43, %c6_44, %c0_45] : memref<2x32x256xf32, #tpu.memory_space<vmem>>, vector<1x16x256xf32>
    %90 = vector.shape_cast %89 : vector<1x16x256xf32> to vector<16x256xf32>
    %91 = arith.truncf %90 : vector<16x256xf32> to vector<16x256xbf16>
    %c16 = arith.constant 16 : index
    %c0_46 = arith.constant 0 : index
    %92 = vector.load %arg13[%c16, %c0_46] : memref<32x1280xbf16, #tpu.memory_space<vmem>>, vector<16x256xbf16>
    tpu.vector_store %arg13[%c16, %c0_46], %91 {strides = array<i32>} : memref<32x1280xbf16, #tpu.memory_space<vmem>>, vector<16x256xbf16>,
    %c1_47 = arith.constant 1 : index
    %c7_48 = arith.constant 7 : index
    %c0_49 = arith.constant 0 : index
    %93 = vector.load %arg12[%c1_47, %c7_48, %c0_49] : memref<2x32x256xf32, #tpu.memory_space<vmem>>, vector<1x16x256xf32>
    %94 = vector.shape_cast %93 : vector<1x16x256xf32> to vector<16x256xf32>
    %95 = arith.truncf %94 : vector<16x256xf32> to vector<16x256xbf16>
    %c16_50 = arith.constant 16 : index
    %c256_51 = arith.constant 256 : index
    %96 = vector.load %arg13[%c16_50, %c256_51] : memref<32x1280xbf16, #tpu.memory_space<vmem>>, vector<16x256xbf16>
    tpu.vector_store %arg13[%c16_50, %c256_51], %95 {strides = array<i32>} : memref<32x1280xbf16, #tpu.memory_space<vmem>>, vector<16x256xbf16>,
    %c1_52 = arith.constant 1 : index
    %c8_53 = arith.constant 8 : index
    %c0_54 = arith.constant 0 : index
    %97 = vector.load %arg12[%c1_52, %c8_53, %c0_54] : memref<2x32x256xf32, #tpu.memory_space<vmem>>, vector<1x16x256xf32>
    %98 = vector.shape_cast %97 : vector<1x16x256xf32> to vector<16x256xf32>
    %99 = arith.truncf %98 : vector<16x256xf32> to vector<16x256xbf16>
    %c16_55 = arith.constant 16 : index
    %c512_56 = arith.constant 512 : index
    %100 = vector.load %arg13[%c16_55, %c512_56] : memref<32x1280xbf16, #tpu.memory_space<vmem>>, vector<16x256xbf16>
    tpu.vector_store %arg13[%c16_55, %c512_56], %99 {strides = array<i32>} : memref<32x1280xbf16, #tpu.memory_space<vmem>>, vector<16x256xbf16>,
    %c1_57 = arith.constant 1 : index
    %c9_58 = arith.constant 9 : index
    %c0_59 = arith.constant 0 : index
    %101 = vector.load %arg12[%c1_57, %c9_58, %c0_59] : memref<2x32x256xf32, #tpu.memory_space<vmem>>, vector<1x16x256xf32>
    %102 = vector.shape_cast %101 : vector<1x16x256xf32> to vector<16x256xf32>
    %103 = arith.truncf %102 : vector<16x256xf32> to vector<16x256xbf16>
    %c16_60 = arith.constant 16 : index
    %c768_61 = arith.constant 768 : index
    %104 = vector.load %arg13[%c16_60, %c768_61] : memref<32x1280xbf16, #tpu.memory_space<vmem>>, vector<16x256xbf16>
    tpu.vector_store %arg13[%c16_60, %c768_61], %103 {strides = array<i32>} : memref<32x1280xbf16, #tpu.memory_space<vmem>>, vector<16x256xbf16>,
    %c1_62 = arith.constant 1 : index
    %c10_63 = arith.constant 10 : index
    %c0_64 = arith.constant 0 : index
    %105 = vector.load %arg12[%c1_62, %c10_63, %c0_64] : memref<2x32x256xf32, #tpu.memory_space<vmem>>, vector<1x16x256xf32>
    %106 = vector.shape_cast %105 : vector<1x16x256xf32> to vector<16x256xf32>
    %107 = arith.truncf %106 : vector<16x256xf32> to vector<16x256xbf16>
    %c16_65 = arith.constant 16 : index
    %c1024_66 = arith.constant 1024 : index
    %108 = vector.load %arg13[%c16_65, %c1024_66] : memref<32x1280xbf16, #tpu.memory_space<vmem>>, vector<16x256xbf16>
    tpu.vector_store %arg13[%c16_65, %c1024_66], %107 {strides = array<i32>} : memref<32x1280xbf16, #tpu.memory_space<vmem>>, vector<16x256xbf16>,
    %c0_i32_67 = arith.constant 0 : i32
    %109 = tpu.memref_slice %arg15[%c0_i32_67] : memref<2x!tpu.dma_semaphore, #tpu.memory_space<semaphore_mem>> -> memref<1x!tpu.dma_semaphore, #tpu.memory_space<semaphore_mem>>
    %110 = tpu.memref_squeeze %109 : memref<1x!tpu.dma_semaphore, #tpu.memory_space<semaphore_mem>> -> memref<!tpu.dma_semaphore, #tpu.memory_space<semaphore_mem>>
    tpu.wait_dma2 semaphore(%110 : memref<!tpu.dma_semaphore, #tpu.memory_space<semaphore_mem>>) src(%arg2 : memref<1280x512xbf16, #tpu.memory_space<any>>) dst(%arg10 : memref<1280x512xbf16, #tpu.memory_space<vmem>>)
    %c0_68 = arith.constant 0 : index
    %c0_69 = arith.constant 0 : index
    %111 = vector.load %arg13[%c0_68, %c0_69] : memref<32x1280xbf16, #tpu.memory_space<vmem>>, vector<32x1280xbf16>
    %c0_70 = arith.constant 0 : index
    %c0_71 = arith.constant 0 : index
    %112 = vector.load %arg10[%c0_70, %c0_71] : memref<1280x512xbf16, #tpu.memory_space<vmem>>, vector<1280x512xbf16>
    %cst_72 = arith.constant dense<0.000000e+00> : vector<32x512xf32>
    %113 = tpu.matmul %111, %112, %cst_72 {dimension_numbers = #tpu.dot_dimension_numbers<[1], [0], [0], [1], [0, 0, 1, 1], [], []>} : vector<32x1280xbf16>, vector<1280x512xbf16>, vector<32x512xf32> -> vector<32x512xf32>
    %c0_73 = arith.constant 0 : index
    %c0_74 = arith.constant 0 : index
    %114 = vector.load %arg6[%c0_73, %c0_74] : memref<1x512xf32, #tpu.memory_space<vmem>>, vector<1x512xf32>
    %c0_75 = arith.constant 0 : index
    %c0_76 = arith.constant 0 : index
    %115 = vector.load %arg7[%c0_75, %c0_76] : memref<1x512xf32, #tpu.memory_space<vmem>>, vector<1x512xf32>
    %cst_77 = arith.constant dense<0.000000e+00> : vector<512xf32>
    %116 = vector.multi_reduction <add>, %113, %cst_77 [0] : vector<32x512xf32> to vector<512xf32>
    %117 = vector.shape_cast %116 : vector<512xf32> to vector<1x512xf32>
    %118 = arith.mulf %113, %113 : vector<32x512xf32>
    %cst_78 = arith.constant dense<0.000000e+00> : vector<512xf32>
    %119 = vector.multi_reduction <add>, %118, %cst_78 [0] : vector<32x512xf32> to vector<512xf32>
    %120 = vector.shape_cast %119 : vector<512xf32> to vector<1x512xf32>
    %c32_i32_79 = arith.constant 32 : i32
    %121 = tpu.dynamic_rotate %117 by %c32_i32_79 dim 1 : vector<1x512xf32>, i32 -> vector<1x512xf32>
    %122 = arith.addf %117, %121 : vector<1x512xf32>
    %c32_i32_80 = arith.constant 32 : i32
    %123 = tpu.dynamic_rotate %120 by %c32_i32_80 dim 1 : vector<1x512xf32>, i32 -> vector<1x512xf32>
    %124 = arith.addf %120, %123 : vector<1x512xf32>
    %c64_i32_81 = arith.constant 64 : i32
    %125 = tpu.dynamic_rotate %122 by %c64_i32_81 dim 1 : vector<1x512xf32>, i32 -> vector<1x512xf32>
    %126 = arith.addf %122, %125 : vector<1x512xf32>
    %c64_i32_82 = arith.constant 64 : i32
    %127 = tpu.dynamic_rotate %124 by %c64_i32_82 dim 1 : vector<1x512xf32>, i32 -> vector<1x512xf32>
    %128 = arith.addf %124, %127 : vector<1x512xf32>
    %c128_i32_83 = arith.constant 128 : i32
    %129 = tpu.dynamic_rotate %126 by %c128_i32_83 dim 1 : vector<1x512xf32>, i32 -> vector<1x512xf32>
    %130 = arith.addf %126, %129 : vector<1x512xf32>
    %c128_i32_84 = arith.constant 128 : i32
    %131 = tpu.dynamic_rotate %128 by %c128_i32_84 dim 1 : vector<1x512xf32>, i32 -> vector<1x512xf32>
    %132 = arith.addf %128, %131 : vector<1x512xf32>
    %c256_i32_85 = arith.constant 256 : i32
    %133 = tpu.dynamic_rotate %130 by %c256_i32_85 dim 1 : vector<1x512xf32>, i32 -> vector<1x512xf32>
    %134 = arith.addf %130, %133 : vector<1x512xf32>
    %c256_i32_86 = arith.constant 256 : i32
    %135 = tpu.dynamic_rotate %132 by %c256_i32_86 dim 1 : vector<1x512xf32>, i32 -> vector<1x512xf32>
    %136 = arith.addf %132, %135 : vector<1x512xf32>
    %cst_87 = arith.constant 0.001953125 : f32
    %137 = vector.broadcast %cst_87 : f32 to vector<1x512xf32>
    %138 = arith.mulf %134, %137 : vector<1x512xf32>
    %cst_88 = arith.constant 0.001953125 : f32
    %139 = vector.broadcast %cst_88 : f32 to vector<1x512xf32>
    %140 = arith.mulf %136, %139 : vector<1x512xf32>
    %141 = arith.mulf %138, %138 : vector<1x512xf32>
    %142 = arith.subf %140, %141 : vector<1x512xf32>
    %cst_89 = arith.constant 9.99999974E-6 : f32
    %143 = vector.broadcast %cst_89 : f32 to vector<1x512xf32>
    %144 = arith.addf %142, %143 : vector<1x512xf32>
    %145 = math.rsqrt %144 : vector<1x512xf32>
    %146 = arith.mulf %114, %145 : vector<1x512xf32>
    %147 = arith.mulf %138, %146 : vector<1x512xf32>
    %148 = arith.subf %115, %147 : vector<1x512xf32>
    %149 = vector.broadcast %146 : vector<1x512xf32> to vector<32x512xf32>
    %150 = arith.mulf %113, %149 : vector<32x512xf32>
    %151 = vector.broadcast %148 : vector<1x512xf32> to vector<32x512xf32>
    %152 = arith.addf %150, %151 : vector<32x512xf32>
    %cst_90 = arith.constant 0.000000e+00 : f32
    %153 = vector.broadcast %cst_90 : f32 to vector<32x512xf32>
    %154 = arith.maximumf %152, %153 : vector<32x512xf32>
    %155 = vector.extract_strided_slice %154 {offsets = [0, 0], sizes = [32, 256], strides = [1, 1]} : vector<32x512xf32> to vector<32x256xf32>
    %156 = vector.extract_strided_slice %154 {offsets = [0, 256], sizes = [32, 256], strides = [1, 1]} : vector<32x512xf32> to vector<32x256xf32>
    %157 = arith.maximumf %155, %156 : vector<32x256xf32>
    %158 = vector.extract_strided_slice %157 {offsets = [0, 0], sizes = [1, 256], strides = [1, 1]} : vector<32x256xf32> to vector<1x256xf32>
    %159 = vector.extract_strided_slice %157 {offsets = [1, 0], sizes = [1, 256], strides = [1, 1]} : vector<32x256xf32> to vector<1x256xf32>
    %160 = arith.maximumf %158, %159 : vector<1x256xf32>
    %c0_91 = arith.constant 0 : index
    %c0_92 = arith.constant 0 : index
    %161 = vector.load %arg14[%c0_91, %c0_92] : memref<2x2048xf32, #tpu.memory_space<vmem>>, vector<1x256xf32>
    tpu.vector_store %arg14[%c0_91, %c0_92], %160 {strides = array<i32>} : memref<2x2048xf32, #tpu.memory_space<vmem>>, vector<1x256xf32>,
    %162 = vector.extract_strided_slice %157 {offsets = [2, 0], sizes = [1, 256], strides = [1, 1]} : vector<32x256xf32> to vector<1x256xf32>
    %163 = vector.extract_strided_slice %157 {offsets = [3, 0], sizes = [1, 256], strides = [1, 1]} : vector<32x256xf32> to vector<1x256xf32>
    %164 = arith.maximumf %162, %163 : vector<1x256xf32>
    %c0_93 = arith.constant 0 : index
    %c256_94 = arith.constant 256 : index
    %165 = vector.load %arg14[%c0_93, %c256_94] : memref<2x2048xf32, #tpu.memory_space<vmem>>, vector<1x256xf32>
    tpu.vector_store %arg14[%c0_93, %c256_94], %164 {strides = array<i32>} : memref<2x2048xf32, #tpu.memory_space<vmem>>, vector<1x256xf32>,
    %166 = vector.extract_strided_slice %157 {offsets = [4, 0], sizes = [1, 256], strides = [1, 1]} : vector<32x256xf32> to vector<1x256xf32>
    %167 = vector.extract_strided_slice %157 {offsets = [5, 0], sizes = [1, 256], strides = [1, 1]} : vector<32x256xf32> to vector<1x256xf32>
    %168 = arith.maximumf %166, %167 : vector<1x256xf32>
    %c0_95 = arith.constant 0 : index
    %c512_96 = arith.constant 512 : index
    %169 = vector.load %arg14[%c0_95, %c512_96] : memref<2x2048xf32, #tpu.memory_space<vmem>>, vector<1x256xf32>
    tpu.vector_store %arg14[%c0_95, %c512_96], %168 {strides = array<i32>} : memref<2x2048xf32, #tpu.memory_space<vmem>>, vector<1x256xf32>,
    %170 = vector.extract_strided_slice %157 {offsets = [6, 0], sizes = [1, 256], strides = [1, 1]} : vector<32x256xf32> to vector<1x256xf32>
    %171 = vector.extract_strided_slice %157 {offsets = [7, 0], sizes = [1, 256], strides = [1, 1]} : vector<32x256xf32> to vector<1x256xf32>
    %172 = arith.maximumf %170, %171 : vector<1x256xf32>
    %c0_97 = arith.constant 0 : index
    %c768_98 = arith.constant 768 : index
    %173 = vector.load %arg14[%c0_97, %c768_98] : memref<2x2048xf32, #tpu.memory_space<vmem>>, vector<1x256xf32>
    tpu.vector_store %arg14[%c0_97, %c768_98], %172 {strides = array<i32>} : memref<2x2048xf32, #tpu.memory_space<vmem>>, vector<1x256xf32>,
    %174 = vector.extract_strided_slice %157 {offsets = [8, 0], sizes = [1, 256], strides = [1, 1]} : vector<32x256xf32> to vector<1x256xf32>
    %175 = vector.extract_strided_slice %157 {offsets = [9, 0], sizes = [1, 256], strides = [1, 1]} : vector<32x256xf32> to vector<1x256xf32>
    %176 = arith.maximumf %174, %175 : vector<1x256xf32>
    %c0_99 = arith.constant 0 : index
    %c1024_100 = arith.constant 1024 : index
    %177 = vector.load %arg14[%c0_99, %c1024_100] : memref<2x2048xf32, #tpu.memory_space<vmem>>, vector<1x256xf32>
    tpu.vector_store %arg14[%c0_99, %c1024_100], %176 {strides = array<i32>} : memref<2x2048xf32, #tpu.memory_space<vmem>>, vector<1x256xf32>,
    %178 = vector.extract_strided_slice %157 {offsets = [10, 0], sizes = [1, 256], strides = [1, 1]} : vector<32x256xf32> to vector<1x256xf32>
    %179 = vector.extract_strided_slice %157 {offsets = [11, 0], sizes = [1, 256], strides = [1, 1]} : vector<32x256xf32> to vector<1x256xf32>
    %180 = arith.maximumf %178, %179 : vector<1x256xf32>
    %c0_101 = arith.constant 0 : index
    %c1280 = arith.constant 1280 : index
    %181 = vector.load %arg14[%c0_101, %c1280] : memref<2x2048xf32, #tpu.memory_space<vmem>>, vector<1x256xf32>
    tpu.vector_store %arg14[%c0_101, %c1280], %180 {strides = array<i32>} : memref<2x2048xf32, #tpu.memory_space<vmem>>, vector<1x256xf32>,
    %182 = vector.extract_strided_slice %157 {offsets = [12, 0], sizes = [1, 256], strides = [1, 1]} : vector<32x256xf32> to vector<1x256xf32>
    %183 = vector.extract_strided_slice %157 {offsets = [13, 0], sizes = [1, 256], strides = [1, 1]} : vector<32x256xf32> to vector<1x256xf32>
    %184 = arith.maximumf %182, %183 : vector<1x256xf32>
    %c0_102 = arith.constant 0 : index
    %c1536 = arith.constant 1536 : index
    %185 = vector.load %arg14[%c0_102, %c1536] : memref<2x2048xf32, #tpu.memory_space<vmem>>, vector<1x256xf32>
    tpu.vector_store %arg14[%c0_102, %c1536], %184 {strides = array<i32>} : memref<2x2048xf32, #tpu.memory_space<vmem>>, vector<1x256xf32>,
    %186 = vector.extract_strided_slice %157 {offsets = [14, 0], sizes = [1, 256], strides = [1, 1]} : vector<32x256xf32> to vector<1x256xf32>
    %187 = vector.extract_strided_slice %157 {offsets = [15, 0], sizes = [1, 256], strides = [1, 1]} : vector<32x256xf32> to vector<1x256xf32>
    %188 = arith.maximumf %186, %187 : vector<1x256xf32>
    %c0_103 = arith.constant 0 : index
    %c1792 = arith.constant 1792 : index
    %189 = vector.load %arg14[%c0_103, %c1792] : memref<2x2048xf32, #tpu.memory_space<vmem>>, vector<1x256xf32>
    tpu.vector_store %arg14[%c0_103, %c1792], %188 {strides = array<i32>} : memref<2x2048xf32, #tpu.memory_space<vmem>>, vector<1x256xf32>,
    %190 = vector.extract_strided_slice %157 {offsets = [16, 0], sizes = [1, 256], strides = [1, 1]} : vector<32x256xf32> to vector<1x256xf32>
    %191 = vector.extract_strided_slice %157 {offsets = [17, 0], sizes = [1, 256], strides = [1, 1]} : vector<32x256xf32> to vector<1x256xf32>
    %192 = arith.maximumf %190, %191 : vector<1x256xf32>
    %c1_104 = arith.constant 1 : index
    %c0_105 = arith.constant 0 : index
    %193 = vector.load %arg14[%c1_104, %c0_105] : memref<2x2048xf32, #tpu.memory_space<vmem>>, vector<1x256xf32>
    tpu.vector_store %arg14[%c1_104, %c0_105], %192 {strides = array<i32>} : memref<2x2048xf32, #tpu.memory_space<vmem>>, vector<1x256xf32>,
    %194 = vector.extract_strided_slice %157 {offsets = [18, 0], sizes = [1, 256], strides = [1, 1]} : vector<32x256xf32> to vector<1x256xf32>
    %195 = vector.extract_strided_slice %157 {offsets = [19, 0], sizes = [1, 256], strides = [1, 1]} : vector<32x256xf32> to vector<1x256xf32>
    %196 = arith.maximumf %194, %195 : vector<1x256xf32>
    %c1_106 = arith.constant 1 : index
    %c256_107 = arith.constant 256 : index
    %197 = vector.load %arg14[%c1_106, %c256_107] : memref<2x2048xf32, #tpu.memory_space<vmem>>, vector<1x256xf32>
    tpu.vector_store %arg14[%c1_106, %c256_107], %196 {strides = array<i32>} : memref<2x2048xf32, #tpu.memory_space<vmem>>, vector<1x256xf32>,
    %198 = vector.extract_strided_slice %157 {offsets = [20, 0], sizes = [1, 256], strides = [1, 1]} : vector<32x256xf32> to vector<1x256xf32>
    %199 = vector.extract_strided_slice %157 {offsets = [21, 0], sizes = [1, 256], strides = [1, 1]} : vector<32x256xf32> to vector<1x256xf32>
    %200 = arith.maximumf %198, %199 : vector<1x256xf32>
    %c1_108 = arith.constant 1 : index
    %c512_109 = arith.constant 512 : index
    %201 = vector.load %arg14[%c1_108, %c512_109] : memref<2x2048xf32, #tpu.memory_space<vmem>>, vector<1x256xf32>
    tpu.vector_store %arg14[%c1_108, %c512_109], %200 {strides = array<i32>} : memref<2x2048xf32, #tpu.memory_space<vmem>>, vector<1x256xf32>,
    %202 = vector.extract_strided_slice %157 {offsets = [22, 0], sizes = [1, 256], strides = [1, 1]} : vector<32x256xf32> to vector<1x256xf32>
    %203 = vector.extract_strided_slice %157 {offsets = [23, 0], sizes = [1, 256], strides = [1, 1]} : vector<32x256xf32> to vector<1x256xf32>
    %204 = arith.maximumf %202, %203 : vector<1x256xf32>
    %c1_110 = arith.constant 1 : index
    %c768_111 = arith.constant 768 : index
    %205 = vector.load %arg14[%c1_110, %c768_111] : memref<2x2048xf32, #tpu.memory_space<vmem>>, vector<1x256xf32>
    tpu.vector_store %arg14[%c1_110, %c768_111], %204 {strides = array<i32>} : memref<2x2048xf32, #tpu.memory_space<vmem>>, vector<1x256xf32>,
    %206 = vector.extract_strided_slice %157 {offsets = [24, 0], sizes = [1, 256], strides = [1, 1]} : vector<32x256xf32> to vector<1x256xf32>
    %207 = vector.extract_strided_slice %157 {offsets = [25, 0], sizes = [1, 256], strides = [1, 1]} : vector<32x256xf32> to vector<1x256xf32>
    %208 = arith.maximumf %206, %207 : vector<1x256xf32>
    %c1_112 = arith.constant 1 : index
    %c1024_113 = arith.constant 1024 : index
    %209 = vector.load %arg14[%c1_112, %c1024_113] : memref<2x2048xf32, #tpu.memory_space<vmem>>, vector<1x256xf32>
    tpu.vector_store %arg14[%c1_112, %c1024_113], %208 {strides = array<i32>} : memref<2x2048xf32, #tpu.memory_space<vmem>>, vector<1x256xf32>,
    %210 = vector.extract_strided_slice %157 {offsets = [26, 0], sizes = [1, 256], strides = [1, 1]} : vector<32x256xf32> to vector<1x256xf32>
    %211 = vector.extract_strided_slice %157 {offsets = [27, 0], sizes = [1, 256], strides = [1, 1]} : vector<32x256xf32> to vector<1x256xf32>
    %212 = arith.maximumf %210, %211 : vector<1x256xf32>
    %c1_114 = arith.constant 1 : index
    %c1280_115 = arith.constant 1280 : index
    %213 = vector.load %arg14[%c1_114, %c1280_115] : memref<2x2048xf32, #tpu.memory_space<vmem>>, vector<1x256xf32>
    tpu.vector_store %arg14[%c1_114, %c1280_115], %212 {strides = array<i32>} : memref<2x2048xf32, #tpu.memory_space<vmem>>, vector<1x256xf32>,
    %214 = vector.extract_strided_slice %157 {offsets = [28, 0], sizes = [1, 256], strides = [1, 1]} : vector<32x256xf32> to vector<1x256xf32>
    %215 = vector.extract_strided_slice %157 {offsets = [29, 0], sizes = [1, 256], strides = [1, 1]} : vector<32x256xf32> to vector<1x256xf32>
    %216 = arith.maximumf %214, %215 : vector<1x256xf32>
    %c1_116 = arith.constant 1 : index
    %c1536_117 = arith.constant 1536 : index
    %217 = vector.load %arg14[%c1_116, %c1536_117] : memref<2x2048xf32, #tpu.memory_space<vmem>>, vector<1x256xf32>
    tpu.vector_store %arg14[%c1_116, %c1536_117], %216 {strides = array<i32>} : memref<2x2048xf32, #tpu.memory_space<vmem>>, vector<1x256xf32>,
    %218 = vector.extract_strided_slice %157 {offsets = [30, 0], sizes = [1, 256], strides = [1, 1]} : vector<32x256xf32> to vector<1x256xf32>
    %219 = vector.extract_strided_slice %157 {offsets = [31, 0], sizes = [1, 256], strides = [1, 1]} : vector<32x256xf32> to vector<1x256xf32>
    %220 = arith.maximumf %218, %219 : vector<1x256xf32>
    %c1_118 = arith.constant 1 : index
    %c1792_119 = arith.constant 1792 : index
    %221 = vector.load %arg14[%c1_118, %c1792_119] : memref<2x2048xf32, #tpu.memory_space<vmem>>, vector<1x256xf32>
    tpu.vector_store %arg14[%c1_118, %c1792_119], %220 {strides = array<i32>} : memref<2x2048xf32, #tpu.memory_space<vmem>>, vector<1x256xf32>,
    %c1_i32_120 = arith.constant 1 : i32
    %222 = tpu.memref_slice %arg15[%c1_i32_120] : memref<2x!tpu.dma_semaphore, #tpu.memory_space<semaphore_mem>> -> memref<1x!tpu.dma_semaphore, #tpu.memory_space<semaphore_mem>>
    %223 = tpu.memref_squeeze %222 : memref<1x!tpu.dma_semaphore, #tpu.memory_space<semaphore_mem>> -> memref<!tpu.dma_semaphore, #tpu.memory_space<semaphore_mem>>
    tpu.wait_dma2 semaphore(%223 : memref<!tpu.dma_semaphore, #tpu.memory_space<semaphore_mem>>) src(%arg3 : memref<2048x128xbf16, #tpu.memory_space<any>>) dst(%arg11 : memref<2048x128xbf16, #tpu.memory_space<vmem>>)
    %c0_121 = arith.constant 0 : index
    %c0_122 = arith.constant 0 : index
    %224 = vector.load %arg14[%c0_121, %c0_122] : memref<2x2048xf32, #tpu.memory_space<vmem>>, vector<2x2048xf32>
    %225 = arith.truncf %224 : vector<2x2048xf32> to vector<2x2048xbf16>
    %c0_123 = arith.constant 0 : index
    %c0_124 = arith.constant 0 : index
    %226 = vector.load %arg11[%c0_123, %c0_124] : memref<2048x128xbf16, #tpu.memory_space<vmem>>, vector<2048x128xbf16>
    %cst_125 = arith.constant dense<0.000000e+00> : vector<2x128xf32>
    %227 = tpu.matmul %225, %226, %cst_125 {dimension_numbers = #tpu.dot_dimension_numbers<[1], [0], [0], [1], [0, 0, 1, 1], [], []>} : vector<2x2048xbf16>, vector<2048x128xbf16>, vector<2x128xf32> -> vector<2x128xf32>
    %c0_126 = arith.constant 0 : index
    %c0_127 = arith.constant 0 : index
    %228 = vector.load %arg8[%c0_126, %c0_127] : memref<1x128xf32, #tpu.memory_space<vmem>>, vector<1x128xf32>
    %229 = vector.broadcast %228 : vector<1x128xf32> to vector<2x128xf32>
    %230 = arith.addf %227, %229 : vector<2x128xf32>
    %c0_128 = arith.constant 0 : index
    %c0_129 = arith.constant 0 : index
    %231 = vector.load %arg9[%c0_128, %c0_129] : memref<2x128xf32, #tpu.memory_space<vmem>>, vector<2x128xf32>
    tpu.vector_store %arg9[%c0_128, %c0_129], %230 {strides = array<i32>} : memref<2x128xf32, #tpu.memory_space<vmem>>, vector<2x128xf32>,
    return
  }
}

</mosaic_0001>

<bundles_post_ra>
// kernel: simple_convnet_forward.1
= control target key start
LH: loop header
LB: loop body
LE: loop exit
PB: predicated region body
PF: predicated region fallthrough
CT: control target
= control target key end

     0   :  { %14 = vsyncpa [#allocation9], 0  ;;  %s10774_s0 = inlined_call_operand.vmem [shape: bf16[64,640], index: 0, kind: input, shape index: {}]   ;;  %s10775_s1 = inlined_call_operand.vmem [shape: bf16[640,512], index: 1, kind: input, shape index: {}]   ;;  %s10776_s2 = inlined_call_operand.hbm [shape: bf16[1280,512], index: 2, kind: input, shape index: {}]   ;;  %s10777_s3 = inlined_call_operand.hbm [shape: bf16[2048,128], index: 3, kind: input, shape index: {}]   ;;  %s10778_s4 = inlined_call_operand.hbm [shape: f32[1,512], index: 4, kind: input, shape index: {}]   ;;  %s10779_s5 = inlined_call_operand.hbm [shape: f32[1,512], index: 5, kind: input, shape index: {}]   ;;  %s10780_s6 = inlined_call_operand.hbm [shape: f32[1,512], index: 6, kind: input, shape index: {}]   ;;  %s10781_s7 = inlined_call_operand.hbm [shape: f32[1,512], index: 7, kind: input, shape index: {}]   ;;  %s10782_s8 = inlined_call_operand.hbm [shape: f32[1,128], index: 8, kind: input, shape index: {}]   ;;  %s10783_s9 = inlined_call_operand.hbm [shape: f32[2,128], index: 9, kind: output, shape index: {}]  }
   0x1   :  { %15 = vsyncpa [#allocation12], 0 }
   0x2   :  { %16 = vsyncpa [#allocation15], 0 }
   0x3   :  { %17 = vsyncpa [#allocation10], 0  ;;  %s9110_s30 = smov [#allocation11]   ;;  %s9111_s11 = smov [#allocation14]  }
   0x4   :  { %s38_s10 = sshll.u32 %s9110_s30, 4  ;;  %s58_s12 = sshll.u32 %s9111_s11, 4  ;;  %s39_s10 = int_to_ptr.vmem [resolvable:$true] %s38_s10  ;;  %s59_s12 = int_to_ptr.vmem [resolvable:$true] %s58_s12 }
   0x5   :  { %s8946_s13 = scalar_lea.vmem %s39_s10, 64  ;;  %p8951_p1 = scmp.lt.s32.totalorder %s39_s10, %s39_s10 }
   0x6   :  { %p8947_p0 = scmp.ne.s32.totalorder %s39_s10, %s8946_s13  ;;  %p8952_p2 = scmp.lt.s32.totalorder %s8946_s13, %s8946_s13 }
   0x8   :  { %p8953_p3 = por %p8952_p2, %p8951_p1 }
   0xa   :  { %p8954_p4 = pnand %p8953_p3, %p8947_p0 }
   0xc   :  { %8957 = shalt.err (!%p8954_p4)
}
   0xd   :  { %41 = dma.hbm_to_vmem [thread:$0]  %s10779_s5, 64, %s39_s10, [#allocation12]  }
   0xe   :  { %s8966_s16 = scalar_lea.vmem %s59_s12, 64  ;;  %p8971_p6 = scmp.lt.s32.totalorder %s59_s12, %s59_s12 }
   0xf   :  { %p8967_p5 = scmp.ne.s32.totalorder %s59_s12, %s8966_s16  ;;  %p8972_p7 = scmp.lt.s32.totalorder %s8966_s16, %s8966_s16 }
  0x11   :  { %p8973_p8 = por %p8972_p7, %p8971_p6 }
  0x13   :  { %p8974_p9 = pnand %p8973_p8, %p8967_p5 }
  0x15   :  { %8977 = shalt.err (!%p8974_p9)
}
  0x16   :  { %61 = dma.hbm_to_vmem [thread:$0]  %s10781_s7, 64, %s59_s12, [#allocation15]  }
  0x17   :  { %s9112_s19 = smov [#allocation8]   ;;  %s9113_s21 = smov [#allocation13]  }
  0x18   :  { %s28_s20 = sshll.u32 %s9112_s19, 4  ;;  %s48_s22 = sshll.u32 %s9113_s21, 4  ;;  %s29_s20 = int_to_ptr.vmem [resolvable:$true] %s28_s20  ;;  %s49_s22 = int_to_ptr.vmem [resolvable:$true] %s48_s22 }
  0x19   :  { %s8986_s23 = scalar_lea.vmem %s29_s20, 64  ;;  %p8991_p11 = scmp.lt.s32.totalorder %s29_s20, %s29_s20 }
  0x1a   :  { %p8987_p10 = scmp.ne.s32.totalorder %s29_s20, %s8986_s23  ;;  %p8992_p12 = scmp.lt.s32.totalorder %s8986_s23, %s8986_s23 }
  0x1c   :  { %p8993_p13 = por %p8992_p12, %p8991_p11 }
  0x1e   :  { %p8994_p0 = pnand %p8993_p13, %p8987_p10 }
  0x20   :  { %8997 = shalt.err (!%p8994_p0)
}
  0x21   :  { %31 = dma.hbm_to_vmem [thread:$0]  %s10778_s4, 64, %s29_s20, [#allocation9]  }
  0x22   :  { %s9006_s25 = scalar_lea.vmem %s49_s22, 64  ;;  %p9011_p2 = scmp.lt.s32.totalorder %s49_s22, %s49_s22 }
  0x23   :  { %p9007_p1 = scmp.ne.s32.totalorder %s49_s22, %s9006_s25  ;;  %p9012_p3 = scmp.lt.s32.totalorder %s9006_s25, %s9006_s25 }
  0x25   :  { %p9013_p4 = por %p9012_p3, %p9011_p2 }
  0x27   :  { %p9014_p5 = pnand %p9013_p4, %p9007_p1 }
  0x29   :  { %9017 = shalt.err (!%p9014_p5)
}
  0x2a   :  { %51 = dma.hbm_to_vmem [thread:$0]  %s10780_s6, 64, %s49_s22, [#allocation12]  }
  0x2b   :  { %s9114_s27 = smov [#allocation16]  }
  0x2c   :  { %s68_s28 = sshll.u32 %s9114_s27, 4  ;;  %s69_s28 = int_to_ptr.vmem [resolvable:$true] %s68_s28 }
  0x2d   :  { %s9026_s29 = scalar_lea.vmem %s69_s28, 16  ;;  %s9030_s30 = scalar_lea.vmem %s69_s28, 32 }
  0x2e   :  { %p9027_p6 = scmp.ne.s32.totalorder %s69_s28, %s9026_s29  ;;  %p9031_p7 = scmp.lt.s32.totalorder %s69_s28, %s69_s28 }
  0x2f   :  { %p9032_p8 = scmp.lt.s32.totalorder %s9030_s30, %s9026_s29 }
  0x31   :  { %p9033_p9 = por %p9032_p8, %p9031_p7 }
  0x33   :  { %p9034_p10 = pnand %p9033_p9, %p9027_p6 }
  0x35   :  { %9037 = shalt.err (!%p9034_p10)
}
  0x36   :  { %71 = dma.hbm_to_vmem [thread:$0]  %s10782_s8, 16, %s69_s28, [#allocation15]  }
  0x37   :  { %9098 = dma.done.wait [#allocation9], 64  }
  0x38   :  { %9099 = vsyncadd [#allocation9], 4294967232 }
  0x39   :  { %9100 = dma.done.wait [#allocation12], 128  }
  0x3a   :  { %9101 = vsyncadd [#allocation12], 4294967168 }
  0x3b   :  { %9102 = dma.done.wait [#allocation15], 80  }
  0x3c   :  { %9103 = vsyncadd [#allocation15], 4294967216  ;;  %v8050_v0 = vld [vmem:[%s10775_s1 + $0xe4] ss:$16 sps:$4 sm:$0xff]   ;;  %v8054_v2 = vld [vmem:[%s10775_s1 + $0xe0] ss:$16 sps:$4 sm:$0xff]  }
  0x3d   :  { %v8052_v1 = vld [vmem:[%s10775_s1 + $0x2e4] ss:$16 sps:$4 sm:$0xff]   ;;  %1215 = vmatprep.subr.bf16.mxu0 %v8050_v0  ;;  %v8055_v3 = vld [vmem:[%s10775_s1 + $0x2e0] ss:$16 sps:$4 sm:$0xff]   ;;  %s9117_s26 = smov 32   ;;  %s9118_s27 = smov 64  }
  0x3e   :  { %1288 = vmatprep.subr.bf16.mxu1 %v8052_v1  ;;  %v8056_v4 = vld [vmem:[%s10775_s1 + $0xc4] ss:$16 sps:$4 sm:$0xff]   ;;  %1216 = vmatpush1.bf16.msra.mxu0 %v8054_v2  ;;  %v8060_v6 = vld [vmem:[%s10775_s1 + $0xc0] ss:$16 sps:$4 sm:$0xff]   ;;  %s9120_s28 = smov [#allocation2]   ;;  %s9121_s30 = smov [#allocation3]  }
  0x3f   :  { %1289 = vmatpush1.bf16.msra.mxu1 %v8055_v3  ;;  %v8058_v5 = vld [vmem:[%s10775_s1 + $0x2c4] ss:$16 sps:$4 sm:$0xff]   ;;  %1217 = vmatprep.subr.bf16.mxu0 %v8056_v4  ;;  %v8061_v7 = vld [vmem:[%s10775_s1 + $0x2c0] ss:$16 sps:$4 sm:$0xff]   ;;  %v8157_v3 = vld [vmem:[%s10775_s1 + $0xec] ss:$16 sps:$4 sm:$0xff]  }
  0x40   :  { %1290 = vmatprep.subr.bf16.mxu1 %v8058_v5  ;;  %v8062_v8 = vld [vmem:[%s10775_s1 + $0xa4] ss:$16 sps:$4 sm:$0xff]   ;;  %v8066_v10 = vld [vmem:[%s10775_s1 + $0xa0] ss:$16 sps:$4 sm:$0xff]   ;;  %v9408_v5 = vld [vmem:[%s10774_s0 + $0x8] ss:$20 sps:$4 sm:$0xff]  }
  0x41   :  { %v8064_v9 = vld [vmem:[%s10775_s1 + $0x2a4] ss:$16 sps:$4 sm:$0xff]   ;;  %v8067_v11 = vld [vmem:[%s10775_s1 + $0x2a0] ss:$16 sps:$4 sm:$0xff]   ;;  %s95_s29 = sshll.u32 %s9120_s28, 4  ;;  %s107_s4 = sshll.u32 %s9121_s30, 4  ;;  %s96_s29 = int_to_ptr.vmem [resolvable:$true] %s95_s29  ;;  %s108_s4 = int_to_ptr.vmem [resolvable:$true] %s107_s4 }
  0x42   :  { %1218 = vmatpush1.bf16.msra.mxu0 %v8060_v6  ;;  %v8068_v12 = vld [vmem:[%s10775_s1 + $0x84] ss:$16 sps:$4 sm:$0xff]   ;;  %v8072_v14 = vld [vmem:[%s10775_s1 + $0x80] ss:$16 sps:$4 sm:$0xff]   ;;  %s9046_s10 = scalar_lea.vmem %s96_s29, 40960  ;;  %p9051_p12 = scmp.lt.s32.totalorder %s96_s29, %s96_s29 }
  0x43   :  { %1291 = vmatpush1.bf16.msra.mxu1 %v8061_v7  ;;  %1219 = vmatprep.subr.bf16.mxu0 %v8062_v8  ;;  %v8070_v13 = vld [vmem:[%s10775_s1 + $0x284] ss:$16 sps:$4 sm:$0xff]   ;;  %v8073_v15 = vld [vmem:[%s10775_s1 + $0x280] ss:$16 sps:$4 sm:$0xff]   ;;  %v8155_v7 = vld [vmem:[%s10775_s1 + $0xe8] ss:$16 sps:$4 sm:$0xff]   ;;  %p9047_p11 = scmp.ne.s32.totalorder %s96_s29, %s9046_s10  ;;  %p9052_p13 = scmp.lt.s32.totalorder %s9046_s10, %s9046_s10 }
  0x44   :  { %1292 = vmatprep.subr.bf16.mxu1 %v8064_v9  ;;  %v8074_v16 = vld [vmem:[%s10775_s1 + $0x64] ss:$16 sps:$4 sm:$0xff]   ;;  %v8078_v18 = vld [vmem:[%s10775_s1 + $0x60] ss:$16 sps:$4 sm:$0xff]   ;;  %v8163_v9 = vld [vmem:[%s10775_s1 + $0xcc] ss:$16 sps:$4 sm:$0xff]  }
  0x45   :  { %v8076_v17 = vld [vmem:[%s10775_s1 + $0x264] ss:$16 sps:$4 sm:$0xff]   ;;  %v8079_v19 = vld [vmem:[%s10775_s1 + $0x260] ss:$16 sps:$4 sm:$0xff]   ;;  %p9053_p0 = por %p9052_p13, %p9051_p12 }
  0x46   :  { %1220 = vmatpush1.bf16.msra.mxu0 %v8066_v10  ;;  %v8080_v20 = vld [vmem:[%s10775_s1 + $0x44] ss:$16 sps:$4 sm:$0xff]   ;;  %v8084_v22 = vld [vmem:[%s10775_s1 + $0x40] ss:$16 sps:$4 sm:$0xff]  }
  0x47   :  { %1293 = vmatpush1.bf16.msra.mxu1 %v8067_v11  ;;  %1221 = vmatprep.subr.bf16.mxu0 %v8068_v12  ;;  %v8082_v21 = vld [vmem:[%s10775_s1 + $0x244] ss:$16 sps:$4 sm:$0xff]   ;;  %v8085_v23 = vld [vmem:[%s10775_s1 + $0x240] ss:$16 sps:$4 sm:$0xff]   ;;  %p9054_p1 = pnand %p9053_p0, %p9047_p11 }
  0x48   :  { %1294 = vmatprep.subr.bf16.mxu1 %v8070_v13  ;;  %v8086_v24 = vld [vmem:[%s10775_s1 + $0x24] ss:$16 sps:$4 sm:$0xff]   ;;  %v8090_v26 = vld [vmem:[%s10775_s1 + $0x20] ss:$16 sps:$4 sm:$0xff]   ;;  %v8161_v13 = vld [vmem:[%s10775_s1 + $0xc8] ss:$16 sps:$4 sm:$0xff]  }
  0x49   :  { %v8088_v25 = vld [vmem:[%s10775_s1 + $0x224] ss:$16 sps:$4 sm:$0xff]   ;;  %v8091_v27 = vld [vmem:[%s10775_s1 + $0x220] ss:$16 sps:$4 sm:$0xff]  }
  0x4a   :  { %1222 = vmatpush1.bf16.msra.mxu0 %v8072_v14  ;;  %v8092_v28 = vld [vmem:[%s10775_s1 + $0x4] ss:$16 sps:$4 sm:$0xff]   ;;  %v8096_v30 = vld [vmem:[%s10775_s1] ss:$16 sps:$4 sm:$0xff]  }
  0x4b   :  { %1295 = vmatpush1.bf16.msra.mxu1 %v8073_v15  ;;  %1223 = vmatprep.subr.bf16.mxu0 %v8074_v16  ;;  %v8094_v29 = vld [vmem:[%s10775_s1 + $0x204] ss:$16 sps:$4 sm:$0xff]   ;;  %v8097_v31 = vld [vmem:[%s10775_s1 + $0x200] ss:$16 sps:$4 sm:$0xff]   ;;  %v8175_v15 = vld [vmem:[%s10775_s1 + $0xac] ss:$16 sps:$4 sm:$0xff]  }
  0x4c   :  { %1296 = vmatprep.subr.bf16.mxu1 %v8076_v17  ;;  %v8098_v32 = vld [vmem:[%s10775_s1 + $0x1e4] ss:$16 sps:$4 sm:$0xff]   ;;  %v8102_v34 = vld [vmem:[%s10775_s1 + $0x1e0] ss:$16 sps:$4 sm:$0xff]   ;;  %v9451_v16 = vld [vmem:[%s10774_s0 + $0x28] ss:$20 sps:$4 sm:$0xff]  }
  0x4d   :  { %v8100_v33 = vld [vmem:[%s10775_s1 + $0x3e4] ss:$16 sps:$4 sm:$0xff]   ;;  %v8103_v35 = vld [vmem:[%s10775_s1 + $0x3e0] ss:$16 sps:$4 sm:$0xff]  }
  0x4e   :  { %1224 = vmatpush1.bf16.msra.mxu0 %v8078_v18  ;;  %v8104_v36 = vld [vmem:[%s10775_s1 + $0x1c4] ss:$16 sps:$4 sm:$0xff]   ;;  %v8108_v38 = vld [vmem:[%s10775_s1 + $0x1c0] ss:$16 sps:$4 sm:$0xff]  }
  0x4f   :  { %1297 = vmatpush1.bf16.msra.mxu1 %v8079_v19  ;;  %1225 = vmatprep.subr.bf16.mxu0 %v8080_v20  ;;  %v8106_v37 = vld [vmem:[%s10775_s1 + $0x3c4] ss:$16 sps:$4 sm:$0xff]   ;;  %v8109_v39 = vld [vmem:[%s10775_s1 + $0x3c0] ss:$16 sps:$4 sm:$0xff]   ;;  %v8173_v19 = vld [vmem:[%s10775_s1 + $0xa8] ss:$16 sps:$4 sm:$0xff]  }
  0x50   :  { %1298 = vmatprep.subr.bf16.mxu1 %v8082_v21  ;;  %v8110_v40 = vld [vmem:[%s10775_s1 + $0x1a4] ss:$16 sps:$4 sm:$0xff]   ;;  %v8114_v42 = vld [vmem:[%s10775_s1 + $0x1a0] ss:$16 sps:$4 sm:$0xff]   ;;  %v8181_v21 = vld [vmem:[%s10775_s1 + $0x8c] ss:$16 sps:$4 sm:$0xff]  }
  0x51   :  { %v8112_v41 = vld [vmem:[%s10775_s1 + $0x3a4] ss:$16 sps:$4 sm:$0xff]   ;;  %v8115_v43 = vld [vmem:[%s10775_s1 + $0x3a0] ss:$16 sps:$4 sm:$0xff]  }
  0x52   :  { %1226 = vmatpush1.bf16.msra.mxu0 %v8084_v22  ;;  %v8116_v44 = vld [vmem:[%s10775_s1 + $0x184] ss:$16 sps:$4 sm:$0xff]   ;;  %v8120_v46 = vld [vmem:[%s10775_s1 + $0x180] ss:$16 sps:$4 sm:$0xff]  }
  0x53   :  { %1299 = vmatpush1.bf16.msra.mxu1 %v8085_v23  ;;  %1227 = vmatprep.subr.bf16.mxu0 %v8086_v24  ;;  %v8118_v45 = vld [vmem:[%s10775_s1 + $0x384] ss:$16 sps:$4 sm:$0xff]   ;;  %v8121_v47 = vld [vmem:[%s10775_s1 + $0x380] ss:$16 sps:$4 sm:$0xff]  }
  0x54   :  { %1300 = vmatprep.subr.bf16.mxu1 %v8088_v25  ;;  %v8122_v48 = vld [vmem:[%s10775_s1 + $0x164] ss:$16 sps:$4 sm:$0xff]   ;;  %v9348_v51 = vld [vmem:[%s10774_s0 + $0xc] ss:$20 sps:$4 sm:$0xff]   ;;  %v9478_v23 = vld [vmem:[%s10774_s0 + $0x5c] ss:$20 sps:$4 sm:$0xff]  }
  0x55   :  { %v9340_v49 = vld [vmem:[%s10774_s0 + $0x4] ss:$20 sps:$4 sm:$0xff]   ;;  %v8126_v52 = vld [vmem:[%s10775_s1 + $0x160] ss:$16 sps:$4 sm:$0xff]   ;;  %1320 = vmatprep.mubr.bf16.mxu1 %v9348_v51  ;;  %v9430_v11 = vld [vmem:[%s10774_s0 + $0x34] ss:$20 sps:$4 sm:$0xff]  }
  0x56   :  { %1228 = vmatpush1.bf16.msra.mxu0 %v8090_v26  ;;  %v8124_v50 = vld [vmem:[%s10775_s1 + $0x364] ss:$16 sps:$4 sm:$0xff]   ;;  %1247 = vmatprep.mubr.bf16.mxu0 %v9340_v49  ;;  %v8127_v53 = vld [vmem:[%s10775_s1 + $0x360] ss:$16 sps:$4 sm:$0xff]   ;;  %v8179_v25 = vld [vmem:[%s10775_s1 + $0x88] ss:$16 sps:$4 sm:$0xff]  }
  0x57   :  { %1301 = vmatpush1.bf16.msra.mxu1 %v8091_v27  ;;  %1229 = vmatprep.subr.bf16.mxu0 %v8092_v28  ;;  %v8128_v54 = vld [vmem:[%s10775_s1 + $0x144] ss:$16 sps:$4 sm:$0xff]   ;;  %v8132_v56 = vld [vmem:[%s10775_s1 + $0x140] ss:$16 sps:$4 sm:$0xff]   ;;  %v8193_v28 = vld [vmem:[%s10775_s1 + $0x6c] ss:$16 sps:$4 sm:$0xff]  }
  0x58   :  { %1302 = vmatprep.subr.bf16.mxu1 %v8094_v29  ;;  %v8130_v55 = vld [vmem:[%s10775_s1 + $0x344] ss:$16 sps:$4 sm:$0xff]   ;;  %v8133_v57 = vld [vmem:[%s10775_s1 + $0x340] ss:$16 sps:$4 sm:$0xff]   ;;  %v9504_v29 = vld [vmem:[%s10774_s0 + $0x58] ss:$20 sps:$4 sm:$0xff]  }
  0x59   :  { %v8134_v58 = vld [vmem:[%s10775_s1 + $0x124] ss:$16 sps:$4 sm:$0xff]   ;;  %v8138_v60 = vld [vmem:[%s10775_s1 + $0x120] ss:$16 sps:$4 sm:$0xff]  }
  0x5a   :  { %1230 = vmatpush1.bf16.msra.mxu0 %v8096_v30  ;;  %v8136_v59 = vld [vmem:[%s10775_s1 + $0x324] ss:$16 sps:$4 sm:$0xff]   ;;  %v8139_v61 = vld [vmem:[%s10775_s1 + $0x320] ss:$16 sps:$4 sm:$0xff]  }
  0x5b   :  { %1303 = vmatpush1.bf16.msra.mxu1 %v8097_v31  ;;  %1231 = vmatprep.subr.bf16.mxu0 %v8098_v32  ;;  %v8140_v62 = vld [vmem:[%s10775_s1 + $0x104] ss:$16 sps:$4 sm:$0xff]   ;;  %v8144_v0 = vld [vmem:[%s10775_s1 + $0x100] ss:$16 sps:$4 sm:$0xff]   ;;  %v8191_v31 = vld [vmem:[%s10775_s1 + $0x68] ss:$16 sps:$4 sm:$0xff]  }
  0x5c   :  { %1304 = vmatprep.subr.bf16.mxu1 %v8100_v33  ;;  %v8142_v63 = vld [vmem:[%s10775_s1 + $0x304] ss:$16 sps:$4 sm:$0xff]   ;;  %v8145_v1 = vld [vmem:[%s10775_s1 + $0x300] ss:$16 sps:$4 sm:$0xff]   ;;  %v8199_v33 = vld [vmem:[%s10775_s1 + $0x4c] ss:$16 sps:$4 sm:$0xff]  }
  0x5d   :  { %v8154_v2 = vld [vmem:[%s10775_s1 + $0x4e4] ss:$16 sps:$4 sm:$0xff]   ;;  %v8152_v6 = vld [vmem:[%s10775_s1 + $0x4e0] ss:$16 sps:$4 sm:$0xff]  }
  0x5e   :  { %1232 = vmatpush2.bf16.msra.mxu0 %v8102_v34  ;;  %v9403_v4 = vld [vmem:[%s10774_s0] ss:$20 sps:$4 sm:$0xff]   ;;  %v9456_v17 = vld [vmem:[%s10774_s0 + $0x30] ss:$20 sps:$4 sm:$0xff]  }
  0x5f   :  { %1305 = vmatpush2.bf16.msra.mxu1 %v8103_v35  ;;  %1233 = vmatprep.subr.bf16.mxu0 %v8104_v36  ;;  %v8160_v8 = vld [vmem:[%s10775_s1 + $0x4c4] ss:$16 sps:$4 sm:$0xff]   ;;  %v9425_v10 = vld [vmem:[%s10774_s0 + $0x2c] ss:$20 sps:$4 sm:$0xff]   ;;  %v9521_v34 = vld [vmem:[%s10774_s0 + $0x7c] ss:$20 sps:$4 sm:$0xff]  }
  0x60   :  { %1306 = vmatprep.subr.bf16.mxu1 %v8106_v37  ;;  %v8158_v12 = vld [vmem:[%s10775_s1 + $0x4c0] ss:$16 sps:$4 sm:$0xff]   ;;  %v8172_v14 = vld [vmem:[%s10775_s1 + $0x4a4] ss:$16 sps:$4 sm:$0xff]   ;;  %v8197_v37 = vld [vmem:[%s10775_s1 + $0x48] ss:$16 sps:$4 sm:$0xff]  }
  0x61   :  { %v8170_v18 = vld [vmem:[%s10775_s1 + $0x4a0] ss:$16 sps:$4 sm:$0xff]   ;;  %v8178_v20 = vld [vmem:[%s10775_s1 + $0x484] ss:$16 sps:$4 sm:$0xff]  }
  0x62   :  { %1234 = vmatpush2.bf16.msra.mxu0 %v8108_v38  ;;  %v9473_v22 = vld [vmem:[%s10774_s0 + $0x54] ss:$20 sps:$4 sm:$0xff]   ;;  %v8176_v24 = vld [vmem:[%s10775_s1 + $0x480] ss:$16 sps:$4 sm:$0xff]   ;;  %v9526_v35 = vld [vmem:[%s10774_s0 + $0x84] ss:$20 sps:$4 sm:$0xff]  }
  0x63   :  { %1307 = vmatpush2.bf16.msra.mxu1 %v8109_v39  ;;  %1235 = vmatprep.subr.bf16.mxu0 %v8110_v40  ;;  %v8190_v26 = vld [vmem:[%s10775_s1 + $0x464] ss:$16 sps:$4 sm:$0xff]   ;;  %v8188_v30 = vld [vmem:[%s10775_s1 + $0x460] ss:$16 sps:$4 sm:$0xff]   ;;  %v9539_v38 = vld [vmem:[%s10774_s0 + $0x78] ss:$20 sps:$4 sm:$0xff]  }
  0x64   :  { %1308 = vmatprep.subr.bf16.mxu1 %v8112_v41  ;;  %v9494_v27 = vld [vmem:[%s10774_s0 + $0x50] ss:$20 sps:$4 sm:$0xff]   ;;  %v8211_v40 = vld [vmem:[%s10775_s1 + $0x2c] ss:$16 sps:$4 sm:$0xff]   ;;  %v9552_v41 = vld [vmem:[%s10774_s0 + $0x80] ss:$20 sps:$4 sm:$0xff]  }
  0x65   :  { %v8196_v32 = vld [vmem:[%s10775_s1 + $0x444] ss:$16 sps:$4 sm:$0xff]   ;;  %v8194_v36 = vld [vmem:[%s10775_s1 + $0x440] ss:$16 sps:$4 sm:$0xff]  }
  0x66   :  { %1236 = vmatpush2.bf16.msra.mxu0 %v8114_v42  ;;  %v8208_v39 = vld [vmem:[%s10775_s1 + $0x424] ss:$16 sps:$4 sm:$0xff]   ;;  %v8206_v42 = vld [vmem:[%s10775_s1 + $0x420] ss:$16 sps:$4 sm:$0xff]  }
  0x67   :  { %1309 = vmatpush2.bf16.msra.mxu1 %v8115_v43  ;;  %1237 = vmatprep.subr.bf16.mxu0 %v8116_v44  ;;  %v8209_v43 = vld [vmem:[%s10775_s1 + $0x28] ss:$16 sps:$4 sm:$0xff]   ;;  %v8214_v44 = vld [vmem:[%s10775_s1 + $0x404] ss:$16 sps:$4 sm:$0xff]  }
  0x68   :  { %1310 = vmatprep.subr.bf16.mxu1 %v8118_v45  ;;  %v8217_v45 = vld [vmem:[%s10775_s1 + $0xc] ss:$16 sps:$4 sm:$0xff]  }
  0x6a   :  { %1238 = vmatpush2.bf16.msra.mxu0 %v8120_v46  ;;  %v8212_v46 = vld [vmem:[%s10775_s1 + $0x400] ss:$16 sps:$4 sm:$0xff]  }
  0x6b   :  { %1311 = vmatpush2.bf16.msra.mxu1 %v8121_v47  ;;  %1239 = vmatprep.subr.bf16.mxu0 %v8122_v48  ;;  %v8215_v47 = vld [vmem:[%s10775_s1 + $0x8] ss:$16 sps:$4 sm:$0xff]   ;;  %v8221_v48 = vld [vmem:[%s10775_s1 + $0x1ec] ss:$16 sps:$4 sm:$0xff]  }
  0x6c   :  { %1312 = vmatprep.subr.bf16.mxu1 %v8124_v50  ;;  %v8224_v50 = vld [vmem:[%s10775_s1 + $0x2ec] ss:$16 sps:$4 sm:$0xff]  }
  0x6e   :  { %1240 = vmatpush2.bf16.msra.mxu0 %v8126_v52  ;;  %v9115_v52 = vmov 0  }
  0x6f   :  { %1313 = vmatpush2.bf16.msra.mxu1 %v8127_v53  ;;  %1241 = vmatprep.subr.bf16.mxu0 %v8128_v54  ;;  %v9584_v53 = vld [vmem:[%s10774_s0 + $0x10] ss:$20 sps:$4 sm:$0xff]   ;;  %v8219_v54 = vld [vmem:[%s10775_s1 + $0x1e8] ss:$16 sps:$4 sm:$0xff]  }
  0x70   :  { %1314 = vmatprep.subr.bf16.mxu1 %v8130_v55  ;;  %v8222_v55 = vld [vmem:[%s10775_s1 + $0x2e8] ss:$16 sps:$4 sm:$0xff]  }
  0x72   :  { %1242 = vmatpush2.bf16.msra.mxu0 %v8132_v56  ;;  %v8227_v56 = vld [vmem:[%s10775_s1 + $0x1cc] ss:$16 sps:$4 sm:$0xff]  }
  0x73   :  { %1315 = vmatpush2.bf16.msra.mxu1 %v8133_v57  ;;  %1243 = vmatprep.subr.bf16.mxu0 %v8134_v58  ;;  %v8225_v57 = vld [vmem:[%s10775_s1 + $0x1c8] ss:$16 sps:$4 sm:$0xff]  }
  0x74   :  { %1316 = vmatprep.subr.bf16.mxu1 %v8136_v59  ;;  %v8228_v58 = vld [vmem:[%s10775_s1 + $0x2c8] ss:$16 sps:$4 sm:$0xff]   ;;  %v8234_v59 = vld [vmem:[%s10775_s1 + $0x1ac] ss:$16 sps:$4 sm:$0xff]  }
  0x76   :  { %1244 = vmatpush2.bf16.msra.mxu0 %v8138_v60  ;;  %v8237_v60 = vld [vmem:[%s10775_s1 + $0x2ac] ss:$16 sps:$4 sm:$0xff]  }
  0x77   :  { %1317 = vmatpush2.bf16.msra.mxu1 %v8139_v61  ;;  %1245 = vmatprep.subr.bf16.mxu0 %v8140_v62  ;;  %v9616_v61 = vld [vmem:[%s10774_s0 + $0x38] ss:$20 sps:$4 sm:$0xff]  }
  0x78   :  { %1318 = vmatprep.subr.bf16.mxu1 %v8142_v63  ;;  %v8232_v62 = vld [vmem:[%s10775_s1 + $0x1a8] ss:$16 sps:$4 sm:$0xff]  }
  0x79   :  { %v8235_v63 = vld [vmem:[%s10775_s1 + $0x2a8] ss:$16 sps:$4 sm:$0xff]  }
  0x7a   :  { %1246 = vmatpush2.bf16.msra.mxu0 %v8144_v0  ;;  %v8240_v0 = vld [vmem:[%s10775_s1 + $0x18c] ss:$16 sps:$4 sm:$0xff]  }
  0x7b   :  { %1319 = vmatpush2.bf16.msra.mxu1 %v8145_v1  ;;  %1361 = vmatprep.subr.bf16.mxu0 %v8154_v2  ;;  %v8243_v1 = vld [vmem:[%s10775_s1 + $0x28c] ss:$16 sps:$4 sm:$0xff]   ;;  %v8238_v2 = vld [vmem:[%s10775_s1 + $0x188] ss:$16 sps:$4 sm:$0xff]  }
  0x7c   :  { %1434 = vmatprep.subr.bf16.mxu1 %v8157_v3  ;;  %v8241_v3 = vld [vmem:[%s10775_s1 + $0x288] ss:$16 sps:$4 sm:$0xff]  }
  0x7d   :  { %1248 = vmatmul.mubr.bf16.vlgmr.msra.gmra.mxu0 %v9403_v4 }
  0x7e   :  { %1321 = vmatmul.mubr.bf16.vlgmr.msra.gmra.mxu1 %v9408_v5  ;;  %1362 = vmatpush1.bf16.msra.mxu0 %v8152_v6  ;;  %v8247_v6 = vld [vmem:[%s10775_s1 + $0x16c] ss:$16 sps:$4 sm:$0xff]  }
  0x7f   :  { %1435 = vmatpush1.bf16.msra.mxu1 %v8155_v7  ;;  %1363 = vmatprep.subr.bf16.mxu0 %v8160_v8  ;;  %v8250_v7 = vld [vmem:[%s10775_s1 + $0x26c] ss:$16 sps:$4 sm:$0xff]   ;;  %v9647_v8 = vld [vmem:[%s10774_s0 + $0x60] ss:$20 sps:$4 sm:$0xff]  }
  0x80   :  { %1436 = vmatprep.subr.bf16.mxu1 %v8163_v9  ;;  %1257 = vmatprep.mubr.bf16.mxu0 %v9425_v10  ;;  %v8245_v9 = vld [vmem:[%s10775_s1 + $0x168] ss:$16 sps:$4 sm:$0xff]  }
  0x81   :  { %1330 = vmatprep.mubr.bf16.mxu1 %v9430_v11 }
  0x82   :  { %1364 = vmatpush1.bf16.msra.mxu0 %v8158_v12  ;;  %v8248_v12 = vld [vmem:[%s10775_s1 + $0x268] ss:$16 sps:$4 sm:$0xff]  }
  0x83   :  { %1437 = vmatpush1.bf16.msra.mxu1 %v8161_v13  ;;  %1365 = vmatprep.subr.bf16.mxu0 %v8172_v14  ;;  %v8253_v13 = vld [vmem:[%s10775_s1 + $0x14c] ss:$16 sps:$4 sm:$0xff]  }
  0x84   :  { %1438 = vmatprep.subr.bf16.mxu1 %v8175_v15  ;;  %v8256_v14 = vld [vmem:[%s10775_s1 + $0x24c] ss:$16 sps:$4 sm:$0xff]   ;;  %v8251_v15 = vld [vmem:[%s10775_s1 + $0x148] ss:$16 sps:$4 sm:$0xff]  }
  0x85   :  { %1258 = vmatmul.mubr.bf16.gmra.mxu0 %v9451_v16 }
  0x86   :  { %1331 = vmatmul.mubr.bf16.gmra.mxu1 %v9456_v17  ;;  %1366 = vmatpush1.bf16.msra.mxu0 %v8170_v18  ;;  %v8254_v18 = vld [vmem:[%s10775_s1 + $0x248] ss:$16 sps:$4 sm:$0xff]  }
  0x87   :  { %1439 = vmatpush1.bf16.msra.mxu1 %v8173_v19  ;;  %1367 = vmatprep.subr.bf16.mxu0 %v8178_v20  ;;  %v8260_v19 = vld [vmem:[%s10775_s1 + $0x12c] ss:$16 sps:$4 sm:$0xff]  }
  0x88   :  { %1440 = vmatprep.subr.bf16.mxu1 %v8181_v21  ;;  %1267 = vmatprep.mubr.bf16.mxu0 %v9473_v22  ;;  %v8263_v20 = vld [vmem:[%s10775_s1 + $0x22c] ss:$16 sps:$4 sm:$0xff]  }
  0x89   :  { %1340 = vmatprep.mubr.bf16.mxu1 %v9478_v23  ;;  %v9678_v21 = vld [vmem:[%s10774_s0 + $0x88] ss:$20 sps:$4 sm:$0xff]  }
  0x8a   :  { %1368 = vmatpush1.bf16.msra.mxu0 %v8176_v24  ;;  %v8258_v24 = vld [vmem:[%s10775_s1 + $0x128] ss:$16 sps:$4 sm:$0xff]  }
  0x8b   :  { %1441 = vmatpush1.bf16.msra.mxu1 %v8179_v25  ;;  %1369 = vmatprep.subr.bf16.mxu0 %v8190_v26  ;;  %v8261_v25 = vld [vmem:[%s10775_s1 + $0x228] ss:$16 sps:$4 sm:$0xff]   ;;  %v8266_v26 = vld [vmem:[%s10775_s1 + $0x10c] ss:$16 sps:$4 sm:$0xff]  }
  0x8c   :  { %1442 = vmatprep.subr.bf16.mxu1 %v8193_v28  ;;  %v8269_v28 = vld [vmem:[%s10775_s1 + $0x20c] ss:$16 sps:$4 sm:$0xff]  }
  0x8d   :  { %1268 = vmatmul.mubr.bf16.gmra.mxu0 %v9494_v27 }
  0x8e   :  { %1341 = vmatmul.mubr.bf16.gmra.mxu1 %v9504_v29  ;;  %1370 = vmatpush1.bf16.msra.mxu0 %v8188_v30  ;;  %v8264_v30 = vld [vmem:[%s10775_s1 + $0x108] ss:$16 sps:$4 sm:$0xff]  }
  0x8f   :  { %1443 = vmatpush1.bf16.msra.mxu1 %v8191_v31  ;;  %1371 = vmatprep.subr.bf16.mxu0 %v8196_v32  ;;  %v8267_v31 = vld [vmem:[%s10775_s1 + $0x208] ss:$16 sps:$4 sm:$0xff]   ;;  %v8272_v32 = vld [vmem:[%s10775_s1 + $0x3ec] ss:$16 sps:$4 sm:$0xff]  }
  0x90   :  { %1444 = vmatprep.subr.bf16.mxu1 %v8199_v33  ;;  %1277 = vmatprep.mubr.bf16.mxu0 %v9521_v34  ;;  %v8275_v33 = vld [vmem:[%s10775_s1 + $0x4ec] ss:$16 sps:$4 sm:$0xff]  }
  0x91   :  { %1350 = vmatprep.mubr.bf16.mxu1 %v9526_v35 }
  0x92   :  { %1372 = vmatpush1.bf16.msra.mxu0 %v8194_v36  ;;  %v8270_v36 = vld [vmem:[%s10775_s1 + $0x3e8] ss:$16 sps:$4 sm:$0xff]  }
  0x93   :  { %1445 = vmatpush1.bf16.msra.mxu1 %v8197_v37  ;;  %1373 = vmatprep.subr.bf16.mxu0 %v8208_v39  ;;  %v8273_v37 = vld [vmem:[%s10775_s1 + $0x4e8] ss:$16 sps:$4 sm:$0xff]   ;;  %v8278_v39 = vld [vmem:[%s10775_s1 + $0x3cc] ss:$16 sps:$4 sm:$0xff]  }
  0x94   :  { %1446 = vmatprep.subr.bf16.mxu1 %v8211_v40  ;;  %v8276_v40 = vld [vmem:[%s10775_s1 + $0x3c8] ss:$16 sps:$4 sm:$0xff]  }
  0x95   :  { %1278 = vmatmul.mubr.bf16.gmra.mxu0 %v9539_v38 }
  0x96   :  { %1351 = vmatmul.mubr.bf16.gmra.mxu1 %v9552_v41  ;;  %1374 = vmatpush1.bf16.msra.mxu0 %v8206_v42  ;;  %v8279_v42 = vld [vmem:[%s10775_s1 + $0x4c8] ss:$16 sps:$4 sm:$0xff]  }
  0x97   :  { %1447 = vmatpush1.bf16.msra.mxu1 %v8209_v43  ;;  %1375 = vmatprep.subr.bf16.mxu0 %v8214_v44  ;;  %v8284_v43 = vld [vmem:[%s10775_s1 + $0x3ac] ss:$16 sps:$4 sm:$0xff]   ;;  %v8282_v44 = vld [vmem:[%s10775_s1 + $0x3a8] ss:$16 sps:$4 sm:$0xff]  }
  0x98   :  { %1448 = vmatprep.subr.bf16.mxu1 %v8217_v45  ;;  %1393 = vmatprep.mubr.bf16.mxu0 %v9115_v52  ;;  %v8285_v45 = vld [vmem:[%s10775_s1 + $0x4a8] ss:$16 sps:$4 sm:$0xff]  }
  0x99   :  { %1466 = vmatprep.mubr.bf16.mxu1 %v9340_v49  ;;  %v8230_v49 = vld [vmem:[%s10775_s1 + $0x2cc] ss:$16 sps:$4 sm:$0xff]  }
  0x9a   :  { %1376 = vmatpush1.bf16.msra.mxu0 %v8212_v46  ;;  %v8290_v46 = vld [vmem:[%s10775_s1 + $0x38c] ss:$16 sps:$4 sm:$0xff]  }
  0x9b   :  { %1449 = vmatpush1.bf16.msra.mxu1 %v8215_v47  ;;  %1507 = vmatprep.subr.bf16.mxu0 %v8224_v50  ;;  %v8288_v47 = vld [vmem:[%s10775_s1 + $0x388] ss:$16 sps:$4 sm:$0xff]   ;;  %v8296_v50 = vld [vmem:[%s10775_s1 + $0x36c] ss:$16 sps:$4 sm:$0xff]  }
  0x9c   :  { %1450 = vmatprep.subr.bf16.mxu1 %v8221_v48  ;;  %v8291_v48 = vld [vmem:[%s10775_s1 + $0x488] ss:$16 sps:$4 sm:$0xff]  }
  0x9d   :  { %1394 = vmatmul.mubr.bf16.vlgmr.msra.gmra.mxu0 %v9584_v53 }
  0x9e   :  { %1508 = vmatpush1.bf16.msra.mxu0 %v8222_v55  ;;  %1403 = vmatprep.mubr.bf16.mxu0 %v9115_v52  ;;  %v8297_v55 = vld [vmem:[%s10775_s1 + $0x468] ss:$16 sps:$4 sm:$0xff]  }
  0x9f   :  { %1451 = vmatpush2.bf16.msra.mxu1 %v8219_v54  ;;  %1509 = vmatprep.subr.bf16.mxu0 %v8230_v49  ;;  %v8294_v54 = vld [vmem:[%s10775_s1 + $0x368] ss:$16 sps:$4 sm:$0xff]  }
  0xa0   :  { %1452 = vmatprep.subr.bf16.mxu1 %v8227_v56  ;;  %v8302_v56 = vld [vmem:[%s10775_s1 + $0x34c] ss:$16 sps:$4 sm:$0xff]   ;;  %v8300_v49 = vld [vmem:[%s10775_s1 + $0x348] ss:$16 sps:$4 sm:$0xff]  }
  0xa2   :  { %1510 = vmatpush1.bf16.msra.mxu0 %v8228_v58  ;;  %v8308_v58 = vld [vmem:[%s10775_s1 + $0x32c] ss:$16 sps:$4 sm:$0xff]  }
  0xa3   :  { %1453 = vmatpush2.bf16.msra.mxu1 %v8225_v57  ;;  %1511 = vmatprep.subr.bf16.mxu0 %v8237_v60  ;;  %v8303_v57 = vld [vmem:[%s10775_s1 + $0x448] ss:$16 sps:$4 sm:$0xff]  }
  0xa4   :  { %1454 = vmatprep.subr.bf16.mxu1 %v8234_v59  ;;  %v8306_v59 = vld [vmem:[%s10775_s1 + $0x328] ss:$16 sps:$4 sm:$0xff]  }
  0xa5   :  { %1404 = vmatmul.mubr.bf16.gmra.mxu0 %v9616_v61  ;;  %v8309_v60 = vld [vmem:[%s10775_s1 + $0x428] ss:$16 sps:$4 sm:$0xff]  }
  0xa6   :  { %1512 = vmatpush1.bf16.msra.mxu0 %v8235_v63  ;;  %1413 = vmatprep.mubr.bf16.mxu0 %v9115_v52  ;;  %v8312_v63 = vld [vmem:[%s10775_s1 + $0x308] ss:$16 sps:$4 sm:$0xff]  }
  0xa7   :  { %1455 = vmatpush2.bf16.msra.mxu1 %v8232_v62  ;;  %1513 = vmatprep.subr.bf16.mxu0 %v8243_v1  ;;  %v8314_v62 = vld [vmem:[%s10775_s1 + $0x30c] ss:$16 sps:$4 sm:$0xff]  }
  0xa8   :  { %1456 = vmatprep.subr.bf16.mxu1 %v8240_v0  ;;  %v8315_v0 = vld [vmem:[%s10775_s1 + $0x408] ss:$16 sps:$4 sm:$0xff]  }
  0xaa   :  { %1514 = vmatpush1.bf16.msra.mxu0 %v8241_v3 }
  0xab   :  { %1457 = vmatpush2.bf16.msra.mxu1 %v8238_v2  ;;  %1515 = vmatprep.subr.bf16.mxu0 %v8250_v7 }
  0xac   :  { %1458 = vmatprep.subr.bf16.mxu1 %v8247_v6 }
  0xad   :  { %1414 = vmatmul.mubr.bf16.gmra.mxu0 %v9647_v8 }
  0xae   :  { %1516 = vmatpush1.bf16.msra.mxu0 %v8248_v12  ;;  %1423 = vmatprep.mubr.bf16.mxu0 %v9115_v52 }
  0xaf   :  { %1459 = vmatpush2.bf16.msra.mxu1 %v8245_v9  ;;  %1517 = vmatprep.subr.bf16.mxu0 %v8256_v14 }
  0xb0   :  { %1460 = vmatprep.subr.bf16.mxu1 %v8253_v13 }
  0xb2   :  { %1518 = vmatpush1.bf16.msra.mxu0 %v8254_v18 }
  0xb3   :  { %1461 = vmatpush2.bf16.msra.mxu1 %v8251_v15  ;;  %1519 = vmatprep.subr.bf16.mxu0 %v8263_v20 }
  0xb4   :  { %1462 = vmatprep.subr.bf16.mxu1 %v8260_v19 }
  0xb5   :  { %1424 = vmatmul.mubr.bf16.gmra.mxu0 %v9678_v21 }
  0xb6   :  { %1520 = vmatpush1.bf16.msra.mxu0 %v8261_v25  ;;  %1539 = vmatprep.mubr.bf16.mxu0 %v9348_v51  ;;  %v8281_v51 = vld [vmem:[%s10775_s1 + $0x4cc] ss:$16 sps:$4 sm:$0xff]  }
  0xb7   :  { %1463 = vmatpush2.bf16.msra.mxu1 %v8258_v24  ;;  %1521 = vmatprep.subr.bf16.mxu0 %v8269_v28 }
  0xb8   :  { %1464 = vmatprep.subr.bf16.mxu1 %v8266_v26 }
  0xba   :  { %1522 = vmatpush1.bf16.msra.mxu0 %v8267_v31 }
  0xbb   :  { %1465 = vmatpush2.bf16.msra.mxu1 %v8264_v30  ;;  %1523 = vmatprep.subr.bf16.mxu0 %v8272_v32 }
  0xbc   :  { %1580 = vmatprep.subr.bf16.mxu1 %v8275_v33 }
  0xbe   :  { %1467 = vmatmul.mubr.bf16.vlgmr.msra.gmra.mxu1 %v9403_v4  ;;  %1524 = vmatpush2.bf16.msra.mxu0 %v8270_v36  ;;  %v8287_v4 = vld [vmem:[%s10775_s1 + $0x4ac] ss:$16 sps:$4 sm:$0xff]  }
  0xbf   :  { %1581 = vmatpush1.bf16.msra.mxu1 %v8273_v37  ;;  %1525 = vmatprep.subr.bf16.mxu0 %v8278_v39 }
  0xc0   :  { %1582 = vmatprep.subr.bf16.mxu1 %v8281_v51  ;;  %1476 = vmatprep.mubr.bf16.mxu1 %v9425_v10  ;;  %v8293_v10 = vld [vmem:[%s10775_s1 + $0x48c] ss:$16 sps:$4 sm:$0xff]  }
  0xc2   :  { %1526 = vmatpush2.bf16.msra.mxu0 %v8276_v40 }
  0xc3   :  { %1583 = vmatpush1.bf16.msra.mxu1 %v8279_v42  ;;  %1527 = vmatprep.subr.bf16.mxu0 %v8284_v43 }
  0xc4   :  { %1584 = vmatprep.subr.bf16.mxu1 %v8287_v4 }
  0xc6   :  { %1477 = vmatmul.mubr.bf16.gmra.mxu1 %v9451_v16  ;;  %1528 = vmatpush2.bf16.msra.mxu0 %v8282_v44  ;;  %v8299_v16 = vld [vmem:[%s10775_s1 + $0x46c] ss:$16 sps:$4 sm:$0xff]  }
  0xc7   :  { %1585 = vmatpush1.bf16.msra.mxu1 %v8285_v45  ;;  %1529 = vmatprep.subr.bf16.mxu0 %v8290_v46 }
  0xc8   :  { %1586 = vmatprep.subr.bf16.mxu1 %v8293_v10  ;;  %1486 = vmatprep.mubr.bf16.mxu1 %v9473_v22  ;;  %v8305_v22 = vld [vmem:[%s10775_s1 + $0x44c] ss:$16 sps:$4 sm:$0xff]  }
  0xca   :  { %1530 = vmatpush2.bf16.msra.mxu0 %v8288_v47 }
  0xcb   :  { %1587 = vmatpush1.bf16.msra.mxu1 %v8291_v48  ;;  %1531 = vmatprep.subr.bf16.mxu0 %v8296_v50 }
  0xcc   :  { %1588 = vmatprep.subr.bf16.mxu1 %v8299_v16 }
  0xce   :  { %1487 = vmatmul.mubr.bf16.gmra.mxu1 %v9494_v27  ;;  %1532 = vmatpush2.bf16.msra.mxu0 %v8294_v54  ;;  %v8311_v27 = vld [vmem:[%s10775_s1 + $0x42c] ss:$16 sps:$4 sm:$0xff]  }
  0xcf   :  { %1589 = vmatpush1.bf16.msra.mxu1 %v8297_v55  ;;  %1533 = vmatprep.subr.bf16.mxu0 %v8302_v56 }
  0xd0   :  { %1590 = vmatprep.subr.bf16.mxu1 %v8305_v22  ;;  %1496 = vmatprep.mubr.bf16.mxu1 %v9521_v34  ;;  %v8317_v34 = vld [vmem:[%s10775_s1 + $0x40c] ss:$16 sps:$4 sm:$0xff]   ;;  %s9116_s1 = smov 16  }
  0xd2   :  { %1534 = vmatpush2.bf16.msra.mxu0 %v8300_v49 }
  0xd3   :  { %1591 = vmatpush1.bf16.msra.mxu1 %v8303_v57  ;;  %1535 = vmatprep.subr.bf16.mxu0 %v8308_v58 }
  0xd4   :  { %1592 = vmatprep.subr.bf16.mxu1 %v8311_v27 }
  0xd6   :  { %1497 = vmatmul.mubr.bf16.gmra.mxu1 %v9539_v38  ;;  %1536 = vmatpush2.bf16.msra.mxu0 %v8306_v59 }
  0xd7   :  { %1593 = vmatpush1.bf16.msra.mxu1 %v8309_v60  ;;  %1537 = vmatprep.subr.bf16.mxu0 %v8314_v62 }
  0xd8   :  { %1594 = vmatprep.subr.bf16.mxu1 %v8317_v34  ;;  %1612 = vmatprep.mubr.bf16.mxu1 %v9115_v52 }
  0xda   :  { %1538 = vmatpush2.bf16.msra.mxu0 %v8312_v63 }
  0xdb   :  { %1595 = vmatpush1.bf16.msra.mxu1 %v8315_v0 }
  0xdd   :  { %1540 = vmatmul.mubr.bf16.vlgmr.msra.gmra.mxu0 %v9408_v5 }
  0xde   :  { %1613 = vmatmul.mubr.bf16.vlgmr.msra.gmra.mxu1 %v9584_v53  ;;  %1549 = vmatprep.mubr.bf16.mxu0 %v9430_v11 }
  0xdf   :  { %1622 = vmatprep.mubr.bf16.mxu1 %v9115_v52 }
  0xe5   :  { %1550 = vmatmul.mubr.bf16.gmra.mxu0 %v9456_v17 }
  0xe6   :  { %1623 = vmatmul.mubr.bf16.gmra.mxu1 %v9616_v61  ;;  %1559 = vmatprep.mubr.bf16.mxu0 %v9478_v23 }
  0xe7   :  { %1632 = vmatprep.mubr.bf16.mxu1 %v9115_v52 }
  0xed   :  { %1560 = vmatmul.mubr.bf16.gmra.mxu0 %v9504_v29 }
  0xee   :  { %1633 = vmatmul.mubr.bf16.gmra.mxu1 %v9647_v8  ;;  %1569 = vmatprep.mubr.bf16.mxu0 %v9526_v35 }
  0xef   :  { %1642 = vmatprep.mubr.bf16.mxu1 %v9115_v52 }
  0xf5   :  { %1570 = vmatmul.mubr.bf16.gmra.mxu0 %v9552_v41 }
  0xf6   :  { %1643 = vmatmul.mubr.bf16.gmra.mxu1 %v9678_v21 }
 0x13d   :  { %v1249_v5 = vpop.f32.mrf.mxu0 }
 0x13e   :  { %v1322_v11 = vpop.f32.mrf.mxu1 }
 0x13f   :  { %v1251_v17 = vpop.f32.mrf.mxu0  ;;  %v1323_v37 = vadd.f32 %v1322_v11, %v1249_v5 }
 0x140   :  { %v1324_v38 = vpop.f32.mrf.mxu1 }
 0x141   :  { %v1253_v53 = vpop.f32.mrf.mxu0  ;;  %v1325_v43 = vadd.f32 %v1324_v38, %v1251_v17 }
 0x142   :  { %v1326_v23 = vpop.f32.mrf.mxu1 }
 0x143   :  { %v1255_v61 = vpop.f32.mrf.mxu0  ;;  %v1327_v33 = vadd.f32 %v1326_v23, %v1253_v53 }
 0x144   :  { %v1328_v2 = vpop.f32.mrf.mxu1 }
 0x145   :  { %v1259_v1 = vpop.f32.mrf.mxu0  ;;  %v1329_v39 = vadd.f32 %v1328_v2, %v1255_v61 }
 0x146   :  { %v1332_v6 = vpop.f32.mrf.mxu1 }
 0x147   :  { %v1261_v29 = vpop.f32.mrf.mxu0  ;;  %v1333_v51 = vadd.f32 %v1332_v6, %v1259_v1 }
 0x148   :  { %v1334_v8 = vpop.f32.mrf.mxu1 }
 0x149   :  { %v1263_v3 = vpop.f32.mrf.mxu0  ;;  %v1335_v45 = vadd.f32 %v1334_v8, %v1261_v29 }
 0x14a   :  { %v1336_v41 = vpop.f32.mrf.mxu1 }
 0x14b   :  { %v1265_v7 = vpop.f32.mrf.mxu0  ;;  %v1337_v46 = vadd.f32 %v1336_v41, %v1263_v3 }
 0x14c   :  { %v1338_v14 = vpop.f32.mrf.mxu1 }
 0x14d   :  { %v1269_v35 = vpop.f32.mrf.mxu0  ;;  %v1339_v50 = vadd.f32 %v1338_v14, %v1265_v7 }
 0x14e   :  { %v1342_v19 = vpop.f32.mrf.mxu1 }
 0x14f   :  { %v1271_v52 = vpop.f32.mrf.mxu0  ;;  %v1343_v54 = vadd.f32 %v1342_v19, %v1269_v35 }
 0x150   :  { %v1344_v24 = vpop.f32.mrf.mxu1 }
 0x151   :  { %v1273_v9 = vpop.f32.mrf.mxu0  ;;  %v1345_v57 = vadd.f32 %v1344_v24, %v1271_v52 }
 0x152   :  { %v1346_v28 = vpop.f32.mrf.mxu1 }
 0x153   :  { %v1275_v12 = vpop.f32.mrf.mxu0  ;;  %v1347_v0 = vadd.f32 %v1346_v28, %v1273_v9 }
 0x154   :  { %v1348_v32 = vpop.f32.mrf.mxu1 }
 0x155   :  { %v1279_v13 = vpop.f32.mrf.mxu0  ;;  %v1349_v1 = vadd.f32 %v1348_v32, %v1275_v12 }
 0x156   :  { %v1352_v4 = vpop.f32.mrf.mxu1 }
 0x157   :  { %v9818_v15 = vpop.f32.mrf.mxu0  ;;  %v1353_v41 = vadd.f32 %v1352_v4, %v1279_v13 }
 0x158   :  { %v1354_v58 = vpop.f32.mrf.mxu1 }
 0x159   :  { %v9820_v18 = vpop.f32.mrf.mxu0 }
 0x15a   :  { %v1356_v2 = vpop.f32.mrf.mxu1 }
 0x15b   :  { %v9822_v20 = vpop.f32.mrf.mxu0 }
 0x15d   :  { %v1395_v21 = vpop.f32.mrf.mxu0 }
 0x15e   :  { %v9826_v44 = vadd.f32 %v1395_v21, %v1323_v37 }
 0x15f   :  { %v1397_v25 = vpop.f32.mrf.mxu0 }
 0x160   :  { %v9832_v16 = vadd.f32 %v1397_v25, %v1325_v43  ;;  %v1707_v27 = vmul.f32 %v9826_v44, %v9826_v44 }
 0x161   :  { %v1399_v26 = vpop.f32.mrf.mxu0 }
 0x162   :  { %v9824_v40 = vadd.f32 %v1399_v26, %v1327_v33  ;;  %v1708_v5 = vmul.f32 %v9832_v16, %v9832_v16 }
 0x163   :  { %v1401_v30 = vpop.f32.mrf.mxu0 }
 0x164   :  { %v9828_v10 = vadd.f32 %v1401_v30, %v1329_v39  ;;  %v1711_v55 = vmul.f32 %v9824_v40, %v9824_v40  ;;  %v1655_v11 = vadd.f32 %v9824_v40, %v9826_v44  ;;  %v1355_v30 = vadd.f32 %v1354_v58, %v9818_v15 }
 0x165   :  { %v1405_v31 = vpop.f32.mrf.mxu0 }
 0x166   :  { %v9830_v47 = vadd.f32 %v1405_v31, %v1333_v51  ;;  %v1712_v59 = vmul.f32 %v9828_v10, %v9828_v10  ;;  %v1739_v17 = vadd.f32 %v1711_v55, %v1707_v27  ;;  %v1668_v29 = vadd.f32 %v9828_v10, %v9832_v16  ;;  %v1358_v31 = vpop.f32.mrf.mxu1 }
 0x167   :  { %v1407_v36 = vpop.f32.mrf.mxu0 }
 0x168   :  { %v9836_v56 = vadd.f32 %v1407_v36, %v1335_v45  ;;  %v1715_v60 = vmul.f32 %v9830_v47, %v9830_v47  ;;  %v1656_v3 = vadd.f32 %v1655_v11, %v9830_v47  ;;  %v1752_v7 = vadd.f32 %v1712_v59, %v1708_v5 }
 0x169   :  { %v1409_v42 = vpop.f32.mrf.mxu0  ;;  %v1357_v36 = vadd.f32 %v1356_v2, %v9820_v18 }
 0x16a   :  { %v9838_v22 = vadd.f32 %v1409_v42, %v1337_v46  ;;  %v1716_v38 = vmul.f32 %v9836_v56, %v9836_v56  ;;  %v1740_v35 = vadd.f32 %v1739_v17, %v1715_v60  ;;  %v1669_v12 = vadd.f32 %v1668_v29, %v9836_v56 }
 0x16b   :  { %v1411_v48 = vpop.f32.mrf.mxu0  ;;  %v1359_v46 = vadd.f32 %v1358_v31, %v9822_v20 }
 0x16c   :  { %v9846_v62 = vadd.f32 %v1411_v48, %v1339_v50  ;;  %v1719_v53 = vmul.f32 %v9838_v22, %v9838_v22  ;;  %v1657_v14 = vadd.f32 %v1656_v3, %v9838_v22  ;;  %v1753_v21 = vadd.f32 %v1752_v7, %v1716_v38 }
 0x16d   :  { %v1415_v49 = vpop.f32.mrf.mxu0 }
 0x16e   :  { %v9848_v34 = vadd.f32 %v1415_v49, %v1343_v54  ;;  %v1720_v8 = vmul.f32 %v9846_v62, %v9846_v62  ;;  %v1741_v24 = vadd.f32 %v1740_v35, %v1719_v53  ;;  %v1670_v13 = vadd.f32 %v1669_v12, %v9846_v62 }
 0x16f   :  { %v1417_v63 = vpop.f32.mrf.mxu0 }
 0x170   :  { %v9858_v23 = vadd.f32 %v1417_v63, %v1345_v57  ;;  %v1723_v52 = vmul.f32 %v9848_v34, %v9848_v34  ;;  %v1658_v32 = vadd.f32 %v1657_v14, %v9848_v34  ;;  %v1754_v37 = vadd.f32 %v1753_v21, %v1720_v8 }
 0x171   :  { %v1419_v61 = vpop.f32.mrf.mxu0 }
 0x172   :  { %v9863_v6 = vadd.f32 %v1419_v61, %v1347_v0  ;;  %v1724_v25 = vmul.f32 %v9858_v23, %v9858_v23  ;;  %v1742_v39 = vadd.f32 %v1741_v24, %v1723_v52  ;;  %v1671_v43 = vadd.f32 %v1670_v13, %v9858_v23 }
 0x173   :  { %v1421_v9 = vpop.f32.mrf.mxu0 }
 0x174   :  { %v9871_v19 = vadd.f32 %v1421_v9, %v1349_v1  ;;  %v1727_v26 = vmul.f32 %v9863_v6, %v9863_v6  ;;  %v1659_v4 = vadd.f32 %v1658_v32, %v9863_v6  ;;  %v1755_v48 = vadd.f32 %v1754_v37, %v1724_v25 }
 0x175   :  { %v1425_v28 = vpop.f32.mrf.mxu0 }
 0x176   :  { %v9880_v33 = vadd.f32 %v1425_v28, %v1353_v41  ;;  %v1728_v51 = vmul.f32 %v9871_v19, %v9871_v19  ;;  %v1743_v50 = vadd.f32 %v1742_v39, %v1727_v26  ;;  %v1672_v54 = vadd.f32 %v1671_v43, %v9871_v19 }
 0x177   :  { %v1427_v42 = vpop.f32.mrf.mxu0 }
 0x178   :  { %v1731_v15 = vmul.f32 %v9880_v33, %v9880_v33  ;;  %v9889_v45 = vadd.f32 %v1427_v42, %v1355_v30  ;;  %v1660_v55 = vadd.f32 %v1659_v4, %v9880_v33  ;;  %v1756_v58 = vadd.f32 %v1755_v48, %v1728_v51 }
 0x179   :  { %v1429_v18 = vpop.f32.mrf.mxu0 }
 0x17a   :  { %v1732_v49 = vmul.f32 %v9889_v45, %v9889_v45  ;;  %v9896_v57 = vadd.f32 %v1429_v18, %v1357_v36  ;;  %v1744_v27 = vadd.f32 %v1743_v50, %v1731_v15  ;;  %v1673_v60 = vadd.f32 %v1672_v54, %v9889_v45 }
 0x17b   :  { %v1431_v59 = vpop.f32.mrf.mxu0 }
 0x17c   :  { %v1661_v63 = vadd.f32 %v1660_v55, %v9896_v57  ;;  %v1735_v20 = vmul.f32 %v9896_v57, %v9896_v57  ;;  %v9902_v0 = vadd.f32 %v1431_v59, %v1359_v46  ;;  %v1757_v5 = vadd.f32 %v1756_v58, %v1732_v49 }
 0x17e   :  { %v1468_v11 = vpop.f32.mrf.mxu1  ;;  %v1662_v17 = vrot.slane %v1661_v63, 4  ;;  %v1745_v38 = vadd.f32 %v1744_v27, %v1735_v20  ;;  %v1674_v53 = vadd.f32 %v1673_v60, %v9902_v0  ;;  %v1736_v61 = vmul.f32 %v9902_v0, %v9902_v0 }
 0x180   :  { %v1470_v1 = vpop.f32.mrf.mxu1  ;;  %v1746_v2 = vrot.slane %v1745_v38, 4  ;;  %v1675_v29 = vrot.slane %v1674_v53, 4  ;;  %v1758_v3 = vadd.f32 %v1757_v5, %v1736_v61  ;;  %v1663_v7 = vadd.f32 %v1662_v17, %v1661_v63 }
 0x182   :  { %v1472_v35 = vpop.f32.mrf.mxu1  ;;  %v1676_v8 = vadd.f32 %v1675_v29, %v1674_v53  ;;  %v1664_v52 = vrot.slane %v1663_v7, 2  ;;  %v1759_v9 = vrot.slane %v1758_v3, 4  ;;  %v1747_v41 = vadd.f32 %v1746_v2, %v1745_v38 }
 0x184   :  { %v1474_v12 = vpop.f32.mrf.mxu1  ;;  %v1665_v14 = vadd.f32 %v1664_v52, %v1663_v7  ;;  %v1760_v21 = vadd.f32 %v1759_v9, %v1758_v3  ;;  %v1677_v24 = vrot.slane %v1676_v8, 2  ;;  %v1748_v25 = vrot.slane %v1747_v41, 2 }
 0x186   :  { %v1478_v26 = vpop.f32.mrf.mxu1  ;;  %v1666_v28 = vrot.slane %v1665_v14, 1  ;;  %v1761_v30 = vrot.slane %v1760_v21, 2  ;;  %v1678_v31 = vadd.f32 %v1677_v24, %v1676_v8  ;;  %v1749_v39 = vadd.f32 %v1748_v25, %v1747_v41 }
 0x188   :  { %v1480_v13 = vpop.f32.mrf.mxu1  ;;  %v9907_v32 = vadd.f32 %v1666_v28, %v1665_v14  ;;  %v1762_v36 = vadd.f32 %v1761_v30, %v1760_v21  ;;  %v1679_v37 = vrot.slane %v1678_v31, 1  ;;  %v1750_v46 = vrot.slane %v1749_v39, 1 }
 0x18a   :  { %v1482_v51 = vpop.f32.mrf.mxu1  ;;  %1791 = vrot.lane.b32.xlu0 %v9907_v32, %s9116_s1  ;;  %v1763_v42 = vrot.slane %v1762_v36, 1  ;;  %v9913_v15 = vadd.f32 %v1679_v37, %v1678_v31  ;;  %v9919_v18 = vadd.f32 %v1750_v46, %v1749_v39 }
 0x18c   :  { %v1484_v43 = vpop.f32.mrf.mxu1  ;;  %v9911_v4 = vadd.f32 %v1763_v42, %v1762_v36 }
 0x18e   :  { %v1488_v48 = vpop.f32.mrf.mxu1  ;;  %1812 = vrot.lane.b32.xlu1 %v9911_v4, %s9116_s1  ;;  %1793 = vrot.lane.b32.xlu0 %v9913_v15, %s9116_s1 }
 0x190   :  { %v1490_v50 = vpop.f32.mrf.mxu1 }
 0x192   :  { %v1492_v54 = vpop.f32.mrf.mxu1  ;;  %1810 = vrot.lane.b32.xlu0 %v9919_v18, %s9116_s1 }
 0x194   :  { %v1494_v55 = vpop.f32.mrf.mxu1 }
 0x196   :  { %v9923_v49 = vpop.f32.mrf.mxu1 }
 0x198   :  { %v9925_v58 = vpop.f32.mrf.mxu1 }
 0x19a   :  { %v9927_v27 = vpop.f32.mrf.mxu1 }
 0x19c   :  { %v9929_v59 = vpop.f32.mrf.mxu1 }
 0x19d   :  { %v1541_v60 = vpop.f32.mrf.mxu0 }
 0x19e   :  { %v1614_v63 = vpop.f32.mrf.mxu1  ;;  %v1542_v52 = vadd.f32 %v1541_v60, %v1468_v11 }
 0x19f   :  { %v1543_v20 = vpop.f32.mrf.mxu0 }
 0x1a0   :  { %v1616_v5 = vpop.f32.mrf.mxu1  ;;  %v1544_v24 = vadd.f32 %v1543_v20, %v1470_v1  ;;  %v9933_v37 = vadd.f32 %v1614_v63, %v1542_v52 }
 0x1a1   :  { %v1545_v17 = vpop.f32.mrf.mxu0 }
 0x1a2   :  { %v1618_v38 = vpop.f32.mrf.mxu1  ;;  %v1546_v3 = vadd.f32 %v1545_v17, %v1472_v35  ;;  %v1709_v20 = vmul.f32 %v9933_v37, %v9933_v37 }
 0x1a3   :  { %v1547_v53 = vpop.f32.mrf.mxu0 }
 0x1a4   :  { %v1620_v61 = vpop.f32.mrf.mxu1  ;;  %v1548_v9 = vadd.f32 %v1547_v53, %v1474_v12  ;;  %v9931_v25 = vadd.f32 %v1618_v38, %v1546_v3  ;;  %v9939_v12 = vadd.f32 %v1616_v5, %v1544_v24 }
 0x1a5   :  { %v1551_v2 = vpop.f32.mrf.mxu0 }
 0x1a6   :  { %v1624_v29 = vpop.f32.mrf.mxu1  ;;  %v1552_v41 = vadd.f32 %v1551_v2, %v1478_v26  ;;  %v9935_v39 = vadd.f32 %v1620_v61, %v1548_v9  ;;  %v1713_v1 = vmul.f32 %v9931_v25, %v9931_v25  ;;  %v1710_v2 = vmul.f32 %v9939_v12, %v9939_v12 }
 0x1a7   :  { %v1553_v7 = vpop.f32.mrf.mxu0 }
 0x1a8   :  { %v1626_v8 = vpop.f32.mrf.mxu1  ;;  %v1554_v28 = vadd.f32 %v1553_v7, %v1480_v13  ;;  %v9937_v42 = vadd.f32 %v1624_v29, %v1552_v41  ;;  %v1681_v29 = vadd.f32 %v9931_v25, %v9933_v37  ;;  %v1765_v7 = vadd.f32 %v1713_v1, %v1709_v20 }
 0x1a9   :  { %v1555_v14 = vpop.f32.mrf.mxu0 }
 0x1aa   :  { %v1628_v21 = vpop.f32.mrf.mxu1  ;;  %v1556_v30 = vadd.f32 %v1555_v14, %v1482_v51  ;;  %v9943_v60 = vadd.f32 %v1626_v8, %v1554_v28  ;;  %v1717_v5 = vmul.f32 %v9937_v42, %v9937_v42  ;;  %v1694_v14 = vadd.f32 %v9935_v39, %v9939_v12 }
 0x1ab   :  { %v1557_v31 = vpop.f32.mrf.mxu0 }
 0x1ac   :  { %v1630_v36 = vpop.f32.mrf.mxu1  ;;  %v1558_v35 = vadd.f32 %v1557_v31, %v1484_v43  ;;  %v9945_v13 = vadd.f32 %v1628_v21, %v1556_v30  ;;  %v1714_v43 = vmul.f32 %v9935_v39, %v9935_v39  ;;  %v1718_v8 = vmul.f32 %v9943_v60, %v9943_v60 }
 0x1ad   :  { %v1561_v46 = vpop.f32.mrf.mxu0  ;;  %v1682_v21 = vadd.f32 %v1681_v29, %v9937_v42  ;;  %v1766_v30 = vadd.f32 %v1765_v7, %v1717_v5 }
 0x1ae   :  { %v1634_v11 = vpop.f32.mrf.mxu1  ;;  %v1562_v26 = vadd.f32 %v1561_v46, %v1488_v48  ;;  %v9953_v17 = vadd.f32 %v1630_v36, %v1558_v35  ;;  %v1721_v52 = vmul.f32 %v9945_v13, %v9945_v13 }
 0x1af   :  { %v1563_v51 = vpop.f32.mrf.mxu0 }
 0x1b0   :  { %v1636_v63 = vpop.f32.mrf.mxu1  ;;  %v9955_v48 = vadd.f32 %v1634_v11, %v1562_v26  ;;  %v1564_v38 = vadd.f32 %v1563_v51, %v1490_v50  ;;  %v1722_v31 = vmul.f32 %v9953_v17, %v9953_v17  ;;  %v1695_v11 = vadd.f32 %v1694_v14, %v9943_v60 }
 0x1b1   :  { %v1565_v53 = vpop.f32.mrf.mxu0  ;;  %v1683_v26 = vadd.f32 %v1682_v21, %v9945_v13 }
 0x1b2   :  { %v1638_v61 = vpop.f32.mrf.mxu1  ;;  %v1566_v3 = vadd.f32 %v1565_v53, %v1492_v54  ;;  %v9965_v9 = vadd.f32 %v1636_v63, %v1564_v38  ;;  %v1778_v54 = vadd.f32 %v1714_v43, %v1710_v2  ;;  %v1725_v36 = vmul.f32 %v9955_v48, %v9955_v48 }
 0x1b3   :  { %v1567_v41 = vpop.f32.mrf.mxu0  ;;  %v1696_v53 = vadd.f32 %v1695_v11, %v9953_v17 }
 0x1b4   :  { %v1640_v50 = vpop.f32.mrf.mxu1  ;;  %v9970_v24 = vadd.f32 %v1638_v61, %v1566_v3  ;;  %v1568_v28 = vadd.f32 %v1567_v41, %v1494_v55  ;;  %v1779_v63 = vadd.f32 %v1778_v54, %v1718_v8  ;;  %v1767_v55 = vadd.f32 %v1766_v30, %v1721_v52 }
 0x1b5   :  { %v1571_v35 = vpop.f32.mrf.mxu0  ;;  %v1726_v20 = vmul.f32 %v9965_v9, %v9965_v9  ;;  %v1684_v61 = vadd.f32 %v1683_v26, %v9955_v48  ;;  %v1697_v41 = vadd.f32 %v1696_v53, %v9965_v9 }
 0x1b6   :  { %v1644_v46 = vpop.f32.mrf.mxu1  ;;  %v9978_v1 = vadd.f32 %v1640_v50, %v1568_v28  ;;  %v1572_v51 = vadd.f32 %v1571_v35, %v9923_v49  ;;  %v1729_v43 = vmul.f32 %v9970_v24, %v9970_v24  ;;  %v1780_v29 = vadd.f32 %v1779_v63, %v1722_v31 }
 0x1b7   :  { %v1573_v5 = vpop.f32.mrf.mxu0  ;;  %v1768_v3 = vadd.f32 %v1767_v55, %v1725_v36  ;;  %v1685_v50 = vadd.f32 %v1684_v61, %v9970_v24 }
 0x1b8   :  { %v1646_v38 = vpop.f32.mrf.mxu1  ;;  %v9987_v2 = vadd.f32 %v1644_v46, %v1572_v51  ;;  %v1730_v49 = vmul.f32 %v9978_v1, %v9978_v1  ;;  %v1574_v7 = vadd.f32 %v1573_v5, %v9925_v58  ;;  %v1781_v28 = vadd.f32 %v1780_v29, %v1726_v20 }
 0x1b9   :  { %v1575_v8 = vpop.f32.mrf.mxu0  ;;  %v1769_v54 = vadd.f32 %v1768_v3, %v1729_v43  ;;  %v1698_v36 = vadd.f32 %v1697_v41, %v9978_v1 }
 0x1ba   :  { %v1648_v52 = vpop.f32.mrf.mxu1  ;;  %v1733_v14 = vmul.f32 %v9987_v2, %v9987_v2  ;;  %v1576_v21 = vadd.f32 %v1575_v8, %v9927_v27  ;;  %v9997_v30 = vadd.f32 %v1646_v38, %v1574_v7  ;;  %v1686_v58 = vadd.f32 %v1685_v50, %v9987_v2 }
 0x1bb   :  { %v1577_v31 = vpop.f32.mrf.mxu0  ;;  %v1782_v11 = vadd.f32 %v1781_v28, %v1730_v49 }
 0x1bc   :  { %v10001_v35 = vadd.f32 %v1648_v52, %v1576_v21  ;;  %v1578_v46 = vadd.f32 %v1577_v31, %v9929_v59  ;;  %v1770_v26 = vadd.f32 %v1769_v54, %v1733_v14  ;;  %v1734_v51 = vmul.f32 %v9997_v30, %v9997_v30  ;;  %v1650_v63 = vpop.f32.mrf.mxu1 }
 0x1bd   :  { %v1699_v27 = vadd.f32 %v1698_v36, %v9997_v30 }
 0x1be   :  { %10798 = vst [vmem:[#allocation30_spill] sm:$0xff] %v10001_v35  ;;  %v1687_v55 = vadd.f32 %v1686_v58, %v10001_v35  ;;  %v1737_v20 = vmul.f32 %v10001_v35, %v10001_v35  ;;  %v10010_v43 = vadd.f32 %v1650_v63, %v1578_v46  ;;  %v1783_v5 = vadd.f32 %v1782_v11, %v1734_v51 }
 0x1c0   :  { %10799 = vst [vmem:[#allocation31_spill] sm:$0xff] %v10010_v43  ;;  %v1688_v38 = vrot.slane %v1687_v55, 4  ;;  %v1771_v53 = vadd.f32 %v1770_v26, %v1737_v20  ;;  %v1700_v59 = vadd.f32 %v1699_v27, %v10010_v43  ;;  %v1738_v61 = vmul.f32 %v10010_v43, %v10010_v43 }
 0x1c2   :  { %v1689_v29 = vadd.f32 %v1688_v38, %v1687_v55  ;;  %v1772_v3 = vrot.slane %v1771_v53, 4  ;;  %v1701_v49 = vrot.slane %v1700_v59, 4  ;;  %v1784_v7 = vadd.f32 %v1783_v5, %v1738_v61 }
 0x1c3   :  { %v10784_v38 = vlaneseq }
 0x1c4   :  { %v1702_v8 = vadd.f32 %v1701_v49, %v1700_v59  ;;  %v1785_v52 = vrot.slane %v1784_v7, 4  ;;  %v1690_v41 = vrot.slane %v1689_v29, 2  ;;  %v1773_v50 = vadd.f32 %v1772_v3, %v1771_v53 }
 0x1c5   :  { %v10020_v53 = vand.u32 127, %v10784_v38 }
 0x1c6   :  { %v1691_v14 = vadd.f32 %v1690_v41, %v1689_v29  ;;  %v1774_v21 = vrot.slane %v1773_v50, 2  ;;  %v1703_v28 = vrot.slane %v1702_v8, 2  ;;  %v1786_v54 = vadd.f32 %v1785_v52, %v1784_v7 }
 0x1c7   :  { %10800 = vst [vmem:[#allocation32_spill] sm:$0xff] %v10020_v53  ;;  %vm1801_vm0 = vcmp.lt.s32.totalorder %v10020_v53, 16  ;;  %vm1834_vm1 = vcmp.lt.s32.totalorder %v10020_v53, 32 }
 0x1c8   :  { %v1692_v31 = vrot.slane %v1691_v14, 1  ;;  %v1775_v36 = vadd.f32 %v1774_v21, %v1773_v50  ;;  %v1704_v58 = vadd.f32 %v1703_v28, %v1702_v8  ;;  %v1787_v46 = vrot.slane %v1786_v54, 2 }
 0x1ca   :  { %v1693_v11 = vadd.f32 %v1692_v31, %v1691_v14  ;;  %v1776_v26 = vrot.slane %v1775_v36, 1  ;;  %v1705_v51 = vrot.slane %v1704_v58, 1  ;;  %v1788_v63 = vadd.f32 %v1787_v46, %v1786_v54 }
 0x1cc   :  { %1795 = vrot.lane.b32.xlu1 %v1693_v11, %s9116_s1  ;;  %v1777_v27 = vadd.f32 %v1776_v26, %v1775_v36  ;;  %v1706_v55 = vadd.f32 %v1705_v51, %v1704_v58  ;;  %v1789_v20 = vrot.slane %v1788_v63, 1 }
 0x1ce   :  { %1814 = vrot.lane.b32.xlu0 %v1777_v27, %s9116_s1  ;;  %v1790_v5 = vadd.f32 %v1789_v20, %v1788_v63 }
 0x1d0   :  { %1797 = vrot.lane.b32.xlu1 %v1706_v55, %s9116_s1 }
 0x1d4   :  { %1816 = vrot.lane.b32.xlu1 %v1790_v5, %s9116_s1 }
 0x1fc   :  { %v1792_v59 = vpop.permute.xlu0 %1791 }
 0x200   :  { %v1794_v61 = vpop.permute.xlu0 %1793  ;;  %v1813_v49 = vpop.permute.xlu1 %1812 }
 0x201   :  { %v1804_v29 = vsel %vm1801_vm0, %v1792_v59, %v1794_v61 }
 0x202   :  { %v1807_v3 = vadd.f32 %v1804_v29, %v9913_v15 }
 0x204   :  { %1828 = vrot.lane.b32.xlu1 %v1807_v3, %s9117_s26  ;;  %v1811_v7 = vpop.permute.xlu0 %1810 }
 0x205   :  { %v1820_v8 = vsel %vm1801_vm0, %v1811_v7, %v1813_v49 }
 0x206   :  { %v1823_v52 = vadd.f32 %v1820_v8, %v9911_v4 }
 0x208   :  { %1845 = vrot.lane.b32.xlu1 %v1823_v52, %s9117_s26 }
 0x23e   :  { %v1796_v41 = vpop.permute.xlu1 %1795 }
 0x23f   :  { %v1803_v50 = vsel %vm1801_vm0, %v1794_v61, %v1796_v41 }
 0x240   :  { %v1808_v14 = vadd.f32 %v1803_v50, %v1693_v11  ;;  %v1815_v4 = vpop.permute.xlu0 %1814 }
 0x241   :  { %v1819_v51 = vsel %vm1801_vm0, %v1813_v49, %v1815_v4 }
 0x242   :  { %v1798_v21 = vpop.permute.xlu1 %1797  ;;  %1830 = vrot.lane.b32.xlu0 %v1808_v14, %s9117_s26 }
 0x243   :  { %v1802_v15 = vsel %vm1801_vm0, %v1796_v41, %v1798_v21  ;;  %v1805_v28 = vsel %vm1801_vm0, %v1798_v21, %v1792_v59  ;;  %v9119_v41 = vmov 0.0  }
 0x244   :  { %v1806_v54 = vadd.f32 %v1805_v28, %v9907_v32  ;;  %v1809_v31 = vadd.f32 %v1802_v15, %v1706_v55  ;;  %v1824_v32 = vadd.f32 %v1819_v51, %v1777_v27  ;;  %111 = vst [vmem:[#allocation4 + $0x30] sm:$0xff] %v9119_v41  ;;  %112 = vst [vmem:[#allocation4] sm:$0xff] %v9119_v41 }
 0x245   :  { %117 = vst [vmem:[#allocation4 + $0x8] sm:$0xff] %v9119_v41  ;;  %118 = vst [vmem:[#allocation4 + $0x48] sm:$0xff] %v9119_v41 }
 0x246   :  { %v1817_v36 = vpop.permute.xlu1 %1816  ;;  %1826 = vrot.lane.b32.xlu0 %v1806_v54, %s9117_s26  ;;  %1832 = vrot.lane.b32.xlu1 %v1809_v31, %s9117_s26  ;;  %119 = vst [vmem:[#allocation4 + $0x40] sm:$0xff] %v9119_v41  ;;  %120 = vst [vmem:[#allocation4 + $0x20] sm:$0xff] %v9119_v41 }
 0x247   :  { %v1818_v58 = vsel %vm1801_vm0, %v1815_v4, %v1817_v36  ;;  %v1821_v46 = vsel %vm1801_vm0, %v1817_v36, %v1811_v7  ;;  %125 = vst [vmem:[#allocation4 + $0x78] sm:$0xff] %v9119_v41  ;;  %126 = vst [vmem:[#allocation4 + $0x28] sm:$0xff] %v9119_v41 }
 0x248   :  { %v1822_v11 = vadd.f32 %v1821_v46, %v9919_v18  ;;  %v1825_v26 = vadd.f32 %v1818_v58, %v1790_v5 }
 0x24a   :  { %1843 = vrot.lane.b32.xlu0 %v1822_v11, %s9117_s26  ;;  %1849 = vrot.lane.b32.xlu1 %v1825_v26, %s9117_s26 }
 0x24e   :  { %1847 = vrot.lane.b32.xlu0 %v1824_v32, %s9117_s26 }
 0x276   :  { %v1829_v63 = vpop.permute.xlu1 %1828 }
 0x27a   :  { %v1846_v55 = vpop.permute.xlu1 %1845 }
 0x2b4   :  { %v1831_v20 = vpop.permute.xlu0 %1830 }
 0x2b5   :  { %v1836_v59 = vsel %vm1834_vm1, %v1829_v63, %v1831_v20 }
 0x2b6   :  { %v10054_v18 = vadd.f32 %v1836_v59, %v1808_v14 }
 0x2b8   :  { %v1833_v5 = vpop.permute.xlu1 %1832  ;;  %1863 = vrot.lane.b32.xlu0 %v10054_v18, %s9118_s27  ;;  %v1827_v61 = vpop.permute.xlu0 %1826 }
 0x2b9   :  { %v1837_v27 = vsel %vm1834_vm1, %v1827_v61, %v1829_v63  ;;  %v1838_v29 = vsel %vm1834_vm1, %v1833_v5, %v1827_v61  ;;  %v1835_v8 = vsel %vm1834_vm1, %v1831_v20, %v1833_v5 }
 0x2ba   :  { %v10062_v49 = vadd.f32 %v1838_v29, %v1806_v54  ;;  %v1840_v7 = vadd.f32 %v1837_v27, %v1807_v3  ;;  %v1842_v21 = vadd.f32 %v1835_v8, %v1809_v31 }
 0x2bc   :  { %v1850_v50 = vpop.permute.xlu1 %1849  ;;  %1859 = vrot.lane.b32.xlu0 %v10062_v49, %s9118_s27  ;;  %1861 = vrot.lane.b32.xlu1 %v1840_v7, %s9118_s27  ;;  %v1844_v14 = vpop.permute.xlu0 %1843 }
 0x2bd   :  { %v1854_v3 = vsel %vm1834_vm1, %v1850_v50, %v1844_v14  ;;  %v1853_v28 = vsel %vm1834_vm1, %v1844_v14, %v1846_v55 }
 0x2be   :  { %v10071_v15 = vadd.f32 %v1854_v3, %v1822_v11  ;;  %v1856_v36 = vadd.f32 %v1853_v28, %v1823_v52 }
 0x2c0   :  { %1865 = vrot.lane.b32.xlu1 %v1842_v21, %s9118_s27  ;;  %1876 = vrot.lane.b32.xlu0 %v10071_v15, %s9118_s27  ;;  %v1848_v54 = vpop.permute.xlu0 %1847 }
 0x2c1   :  { %v1852_v4 = vsel %vm1834_vm1, %v1846_v55, %v1848_v54  ;;  %v1851_v46 = vsel %vm1834_vm1, %v1848_v54, %v1850_v50 }
 0x2c2   :  { %v1857_v58 = vadd.f32 %v1852_v4, %v1824_v32  ;;  %v1858_v31 = vadd.f32 %v1851_v46, %v1825_v26 }
 0x2c4   :  { %1878 = vrot.lane.b32.xlu1 %v1856_v36, %s9118_s27  ;;  %1880 = vrot.lane.b32.xlu0 %v1857_v58, %s9118_s27 }
 0x2c8   :  { %1882 = vrot.lane.b32.xlu1 %v1858_v31, %s9118_s27 }
 0x2c9   :  { %9057 = shalt.err (!%p9054_p1)  }
 0x2ca   :  { %98 = dma.hbm_to_vmem [thread:$0]  %s10776_s2, 40960, %s96_s29, [#allocation7] }
 0x2cb   :  { %s9066_s12 = scalar_lea.vmem %s108_s4, 16384  ;;  %p9071_p3 = scmp.lt.s32.totalorder %s108_s4, %s108_s4 }
 0x2cc   :  { %p9067_p2 = scmp.ne.s32.totalorder %s108_s4, %s9066_s12  ;;  %p9072_p4 = scmp.lt.s32.totalorder %s9066_s12, %s9066_s12 }
 0x2ce   :  { %p9073_p5 = por %p9072_p4, %p9071_p3 }
 0x2d0   :  { %p9074_p6 = pnand %p9073_p5, %p9067_p2 }
 0x2d2   :  { %9077 = shalt.err (!%p9074_p6)  }
 0x2d3   :  { %110 = dma.hbm_to_vmem [thread:$0]  %s10777_s3, 16384, %s108_s4, [#allocation7 + $0x1]  ;;  %vm1867_vm2 = vcmp.lt.s32.totalorder %v10020_v53, 64  ;;  %v10135_v43 = vld [vmem:[#allocation4 + $0x78] sm:$0x1]  ;;  %vm2164_vm3 = vcmask 1040384  }
 0x2d4   :  { %vm2165_vm4 = vcmask 1044484   ;;  %vm2325_vm5 = vcmask 1042432   ;;  %vm2326_vm6 = vcmask 1046532   ;;  %vm2201_vm7 = vsmask.f32 256 }
 0x2d5   :  { %vm2202_vm8 = vsmask.f32 4368  ;;  %vm2271_vm9 = vsmask.f32 3328  ;;  %vm2272_vm10 = vsmask.f32 7440  ;;  %vm10282_vm11 = vmor %vm2164_vm3, %vm2165_vm4 }
 0x2d6   :  { %vm10312_vm12 = vmor %vm2325_vm5, %vm2326_vm6 }
 0x2d7   :  { %vm10327_vm13 = vmor %vm2201_vm7, %vm2202_vm8 }
 0x2d8   :  { %vm10352_vm14 = vmor %vm2271_vm9, %vm2272_vm10 }
 0x32a   :  { %v1864_v52 = vpop.permute.xlu0 %1863 }
 0x32e   :  { %v1862_v11 = vpop.permute.xlu1 %1861  ;;  %v1860_v26 = vpop.permute.xlu0 %1859 }
 0x32f   :  { %v1869_v51 = vsel %vm1867_vm2, %v1862_v11, %v1864_v52  ;;  %v1870_v32 = vsel %vm1867_vm2, %v1860_v26, %v1862_v11 }
 0x330   :  { %v1874_v20 = vadd.f32 %v1869_v51, %v10054_v18  ;;  %v1873_v59 = vadd.f32 %v1870_v32, %v1840_v7 }
 0x332   :  { %v1866_v63 = vpop.permute.xlu1 %1865  ;;  %v1877_v55 = vpop.permute.xlu0 %1876  ;;  %v1894_v28 = vadd.f32 %v1874_v20, %v1873_v59 }
 0x333   :  { %v1868_v5 = vsel %vm1867_vm2, %v1864_v52, %v1866_v63  ;;  %v1871_v61 = vsel %vm1867_vm2, %v1866_v63, %v1860_v26 }
 0x334   :  { %v1872_v27 = vadd.f32 %v1871_v61, %v10062_v49  ;;  %v1875_v29 = vadd.f32 %v1868_v5, %v1842_v21 }
 0x336   :  { %v1892_v8 = vadd.f32 %v1875_v29, %v1872_v27  ;;  %v1893_v41 = vadd.f32 %v1873_v59, %v1872_v27  ;;  %v1895_v50 = vadd.f32 %v1875_v29, %v1874_v20  ;;  %v1879_v14 = vpop.permute.xlu1 %1878  ;;  %v1881_v3 = vpop.permute.xlu0 %1880 }
 0x337   :  { %v1886_v54 = vsel %vm1867_vm2, %v1877_v55, %v1879_v14  ;;  %v1885_v18 = vsel %vm1867_vm2, %v1879_v14, %v1881_v3 }
 0x338   :  { %v1900_v7 = vadd.f32 %v1894_v28, %v1892_v8  ;;  %v1901_v4 = vadd.f32 %v1895_v50, %v1893_v41  ;;  %v1889_v46 = vadd.f32 %v1886_v54, %v1856_v36  ;;  %v1890_v52 = vadd.f32 %v1885_v18, %v1857_v58 }
 0x33a   :  { %v1883_v11 = vpop.permute.xlu1 %1882  ;;  %v1904_v32 = vmul.f32 0.00048828125, %v1900_v7  ;;  %v1905_v63 = vmul.f32 0.00048828125, %v1901_v4  ;;  %v1898_v20 = vadd.f32 %v1890_v52, %v1889_v46 }
 0x33b   :  { %v1884_v49 = vsel %vm1867_vm2, %v1881_v3, %v1883_v11  ;;  %v1887_v21 = vsel %vm1867_vm2, %v1883_v11, %v1877_v55  ;;  %v10112_v55 = vshrl.u32 %v10784_v38, 7 }
 0x33c   :  { %v1888_v26 = vadd.f32 %v1887_v21, %v10071_v15  ;;  %v1891_v51 = vadd.f32 %v1884_v49, %v1858_v31  ;;  %v1908_v8 = vmul.f32 %v1904_v32, %v1904_v32  ;;  %v1909_v41 = vmul.f32 %v1905_v63, %v1905_v63 }
 0x33d   :  { %v9122_v15 = vmov 1966171168   ;;  %10801 = vst [vmem:[#allocation33_spill] sm:$0xff] %v10112_v55  ;;  %v10121_v11 = vsub.s32 1, %v10112_v55  ;;  %v10125_v21 = vsub.s32 2, %v10112_v55 }
 0x33e   :  { %v1896_v59 = vadd.f32 %v1891_v51, %v1888_v26  ;;  %v1897_v5 = vadd.f32 %v1889_v46, %v1888_v26  ;;  %v1899_v61 = vadd.f32 %v1891_v51, %v1890_v52  ;;  %v1920_v31 = vunpack.c.l.s4 %v9122_v15  ;;  %v1653_v51 = vld [vmem:[#allocation8] sm:$0xf]  ;;  %v2373_v15 = vld [vmem:[#allocation4 + $0x40] sm:$0x80] }
 0x33f   :  { %v10118_v52 = vsub.s32 0, %v10112_v55  ;;  %10803 = vst [vmem:[#allocation35_spill] sm:$0xff] %v10121_v11  ;;  %10804 = vst [vmem:[#allocation36_spill] sm:$0xff] %v10125_v21  ;;  %v10128_v26 = vsub.s32 3, %v10112_v55 }
 0x340   :  { %v1902_v27 = vadd.f32 %v1898_v20, %v1896_v59  ;;  %v1903_v29 = vadd.f32 %v1899_v61, %v1897_v5  ;;  %v1921_v54 = vunpack.c.0.s8 %v1920_v31  ;;  %v2141_v20 = vld [vmem:[#allocation4 + $0x30] sm:$0xc0]  ;;  %v2142_v5 = vld [vmem:[#allocation4] sm:$0xc0] }
 0x341   :  { %10802 = vst [vmem:[#allocation34_spill] sm:$0xff] %v10118_v52  ;;  %10805 = vst [vmem:[#allocation37_spill] sm:$0xff] %v10128_v26  ;;  %v2339_v61 = vld [vmem:[#allocation4 + $0x40] sm:$0xc0] }
 0x342   :  { %v1906_v36 = vmul.f32 0.00048828125, %v1902_v27  ;;  %v1907_v58 = vmul.f32 0.00048828125, %v1903_v29  ;;  %v10115_v7 = vsub.s32 %v1921_v54, %v10112_v55  ;;  %v2340_v27 = vld [vmem:[#allocation4 + $0x20] sm:$0xc0]  ;;  %v2178_v29 = vld [vmem:[#allocation4 + $0x30] sm:$0x80] }
 0x343   :  { %v2374_v31 = vld [vmem:[#allocation4 + $0x20] sm:$0x80] }
 0x344   :  { %v1910_v50 = vsub.f32 %v1906_v36, %v1908_v8  ;;  %v1911_v14 = vsub.f32 %v1907_v58, %v1909_v41  ;;  %v2179_v36 = vld [vmem:[#allocation4] sm:$0x80]  ;;  %v2306_v58 = vld [vmem:[#allocation4 + $0x8] sm:$0x3] }
 0x345   :  { %v2252_v41 = vld [vmem:[#allocation4 + $0x8] sm:$0x1]  ;;  %v7830_v54 = vpack.c.bf16 %v2179_v36, %v2178_v29  ;;  %v10139_v29 = vld [vmem:[#allocation4 + $0x78] sm:$0x3] }
 0x346   :  { %v1912_v3 = vadd.f32 1e-05, %v1910_v50  ;;  %v1913_v28 = vadd.f32 1e-05, %v1911_v14  ;;  %v2253_v50 = vld [vmem:[#allocation4 + $0x48] sm:$0x1] }
 0x347   :  { %v2307_v14 = vld [vmem:[#allocation4 + $0x48] sm:$0x3]  ;;  %v10145_v36 = vshrl.u32 %v7830_v54, 16 }
 0x348   :  { %8318 = vrsqrt.f32 %v1912_v3 }
 0x349   :  { %8320 = vrsqrt.f32 %v1913_v28  ;;  %v7827_v28 = vpack.c.bf16 %v2142_v5, %v2141_v20 }
 0x355   :  { %v8319_v18 = vpop.eup %8318 }
 0x356   :  { %v8321_v4 = vpop.eup %8320 }
 0x357   :  { %v1918_v46 = vcombine.low %v8319_v18, %v8321_v4  ;;  %v7837_v18 = vpack.c.bf16 %v2253_v50, %v2252_v41  ;;  %v7840_v4 = vpack.c.bf16 %v2307_v14, %v2306_v58 }
 0x359   :  { %v1925_v49 = vrot.slane %v1918_v46, %v10115_v7  ;;  %v7841_v46 = vpack.c.bf16 %v2340_v27, %v2339_v61  ;;  %v10141_v61 = vld [vmem:[#allocation4 + $0x28] sm:$0x3]  ;;  %v10143_v27 = vrot.slane %v7827_v28, 11  ;;  %v10147_v58 = vrot.slane %v7840_v4, 5 }
 0x35a   :  { %v10149_v14 = vshll.u32 %v7837_v18, 16 }
 0x35b   :  { %v1926_v59 = vcombine.low %v1925_v49, %v1925_v49 }
 0x35d   :  { %v1933_v8 = vrot.slane %v1926_v59, %v10115_v7  ;;  %v7844_v59 = vpack.c.bf16 %v2374_v31, %v2373_v15 }
 0x35f   :  { %v1935_v3 = vmul.f32 %v1933_v8, %v1653_v51  ;;  %v10137_v8 = vld [vmem:[#allocation4 + $0x28] sm:$0x1] }
 0x361   :  { %v1940_v49 = vrot.slane %v1935_v3, %v10118_v52  ;;  %v1944_v38 = vrot.slane %v1935_v3, %v10121_v11  ;;  %v1948_v55 = vrot.slane %v1935_v3, %v10125_v21  ;;  %v1952_v53 = vrot.slane %v1935_v3, %v10128_v26 }
 0x362   :  { %v10151_v3 = vrot.slane %v7841_v46, 11 }
 0x363   :  { %v1957_v35 = vmul.f32 %v1940_v49, %v1904_v32  ;;  %v1958_v51 = vmul.f32 %v1944_v38, %v1905_v63  ;;  %v1959_v20 = vmul.f32 %v1948_v55, %v1904_v32  ;;  %v1960_v5 = vmul.f32 %v1952_v53, %v1905_v63 }
 0x364   :  { %v1991_v32 = vmul.f32 %v1940_v49, %v9826_v44  ;;  %v10154_v63 = vshrl.u32 %v7844_v59, 16  ;;  %v1993_v18 = vmul.f32 %v1948_v55, %v9933_v37  ;;  %v1994_v4 = vmul.f32 %v1952_v53, %v9939_v12 }
 0x365   :  { %v1965_v41 = vcombine.low %v1957_v35, %v1958_v51  ;;  %v1966_v50 = vcombine.low %v1959_v20, %v1960_v5  ;;  %v1992_v35 = vmul.f32 %v1944_v38, %v9832_v16  ;;  %v1995_v44 = vmul.f32 %v1940_v49, %v9824_v40 }
 0x366   :  { %v1996_v46 = vmul.f32 %v1944_v38, %v9828_v10  ;;  %v1997_v59 = vmul.f32 %v1948_v55, %v9931_v25  ;;  %v1998_v20 = vmul.f32 %v1952_v53, %v9935_v39  ;;  %v1999_v5 = vmul.f32 %v1940_v49, %v9830_v47 }
 0x367   :  { %v1973_v31 = vrot.slane %v1965_v41, %v10115_v7  ;;  %v1980_v54 = vrot.slane %v1966_v50, %v10115_v7  ;;  %v2000_v41 = vmul.f32 %v1944_v38, %v9836_v56  ;;  %v1654_v50 = vld [vmem:[#allocation11] sm:$0xf]  ;;  %v2001_v16 = vmul.f32 %v1948_v55, %v9937_v42 }
 0x368   :  { %v2002_v37 = vmul.f32 %v1952_v53, %v9943_v60  ;;  %v2003_v12 = vmul.f32 %v1940_v49, %v9838_v22  ;;  %v2004_v40 = vmul.f32 %v1944_v38, %v9846_v62  ;;  %v2005_v25 = vmul.f32 %v1948_v55, %v9945_v13 }
 0x369   :  { %v1981_v51 = vcombine.low %v1973_v31, %v1980_v54  ;;  %v2006_v31 = vmul.f32 %v1952_v53, %v9953_v17  ;;  %v2007_v39 = vmul.f32 %v1940_v49, %v9848_v34  ;;  %v2008_v47 = vmul.f32 %v1944_v38, %v9858_v23 }
 0x36a   :  { %v2009_v56 = vmul.f32 %v1948_v55, %v9955_v48  ;;  %v2010_v42 = vmul.f32 %v1952_v53, %v9965_v9  ;;  %v2011_v60 = vmul.f32 %v1940_v49, %v9863_v6  ;;  %v2012_v22 = vmul.f32 %v1944_v38, %v9871_v19 }
 0x36b   :  { %v1988_v10 = vrot.slane %v1981_v51, %v10115_v7  ;;  %v2013_v62 = vmul.f32 %v1948_v55, %v9970_v24  ;;  %v2014_v51 = vmul.f32 %v1952_v53, %v9978_v1  ;;  %v2015_v13 = vmul.f32 %v1940_v49, %v9880_v33 }
 0x36c   :  { %v2016_v17 = vmul.f32 %v1944_v38, %v9889_v45  ;;  %v2017_v34 = vmul.f32 %v1948_v55, %v9987_v2  ;;  %v2018_v23 = vmul.f32 %v1952_v53, %v9997_v30  ;;  %v2019_v24 = vmul.f32 %v1940_v49, %v9896_v57 }
 0x36d   :  { %v1990_v54 = vsub.f32 %v1654_v50, %v1988_v10  ;;  %v2020_v1 = vmul.f32 %v1944_v38, %v9902_v0  ;;  %v10806_v50 = vld [vmem:[#allocation30_spill] sm:$0xff]  ;;  %v10807_v10 = vld [vmem:[#allocation31_spill] sm:$0xff] }
 0x36e   :  { %v2021_v33 = vmul.f32 %v1948_v55, %v10806_v50  ;;  %v2022_v45 = vmul.f32 %v1952_v53, %v10807_v10 }
 0x36f   :  { %v2027_v48 = vrot.slane %v1990_v54, %v10118_v52  ;;  %v2031_v9 = vrot.slane %v1990_v54, %v10121_v11  ;;  %v2035_v6 = vrot.slane %v1990_v54, %v10125_v21  ;;  %v2039_v19 = vrot.slane %v1990_v54, %v10128_v26 }
 0x371   :  { %v10198_v28 = vadd.f32 %v2027_v48, %v1991_v32  ;;  %v10200_v2 = vadd.f32 %v2031_v9, %v1992_v35  ;;  %v10202_v30 = vadd.f32 %v2035_v6, %v1993_v18  ;;  %v10204_v15 = vadd.f32 %v2039_v19, %v1994_v4 }
 0x372   :  { %v10206_v11 = vadd.f32 %v2027_v48, %v1995_v44  ;;  %v10208_v21 = vadd.f32 %v2031_v9, %v1996_v46  ;;  %v10210_v54 = vadd.f32 %v2035_v6, %v1997_v59  ;;  %v10212_v57 = vadd.f32 %v2039_v19, %v1998_v20 }
 0x373   :  { %v10214_v0 = vadd.f32 %v2027_v48, %v1999_v5  ;;  %v10216_v38 = vadd.f32 %v2031_v9, %v2000_v41  ;;  %v10218_v53 = vadd.f32 %v2035_v6, %v2001_v16  ;;  %v10220_v55 = vadd.f32 %v2039_v19, %v2002_v37 }
 0x374   :  { %v10222_v49 = vadd.f32 %v2027_v48, %v2003_v12  ;;  %v10224_v32 = vadd.f32 %v2031_v9, %v2004_v40  ;;  %v10226_v35 = vadd.f32 %v2035_v6, %v2005_v25  ;;  %v10228_v18 = vadd.f32 %v2039_v19, %v2006_v31 }
 0x375   :  { %v10230_v4 = vadd.f32 %v2027_v48, %v2007_v39  ;;  %v10232_v44 = vadd.f32 %v2031_v9, %v2008_v47  ;;  %v2062_v46 = vadd.f32 %v2035_v6, %v2009_v56  ;;  %v2063_v59 = vadd.f32 %v2039_v19, %v2010_v42 }
 0x376   :  { %v2064_v20 = vadd.f32 %v2027_v48, %v2011_v60  ;;  %v2065_v5 = vadd.f32 %v2031_v9, %v2012_v22  ;;  %v2066_v41 = vadd.f32 %v2035_v6, %v2013_v62  ;;  %v2067_v16 = vadd.f32 %v2039_v19, %v2014_v51 }
 0x377   :  { %v2068_v37 = vadd.f32 %v2027_v48, %v2015_v13  ;;  %v2069_v50 = vadd.f32 %v2031_v9, %v2016_v17  ;;  %v2070_v12 = vadd.f32 %v2035_v6, %v2017_v34  ;;  %v2071_v10 = vadd.f32 %v2039_v19, %v2018_v23 }
 0x378   :  { %v2072_v40 = vadd.f32 %v2027_v48, %v2019_v24  ;;  %v2073_v26 = vadd.f32 %v2031_v9, %v2020_v1  ;;  %v2074_v25 = vadd.f32 %v2035_v6, %v2021_v33  ;;  %v2075_v52 = vadd.f32 %v2039_v19, %v2022_v45 }
 0x379   :  { %v2076_v31 = vmax.f32 %v10198_v28, 0.0  ;;  %v2077_v39 = vmax.f32 %v10200_v2, 0.0  ;;  %v2078_v47 = vmax.f32 %v10202_v30, 0.0  ;;  %v2079_v56 = vmax.f32 %v10204_v15, 0.0 }
 0x37a   :  { %v2080_v42 = vmax.f32 %v10206_v11, 0.0  ;;  %v2081_v60 = vmax.f32 %v10208_v21, 0.0  ;;  %v2082_v22 = vmax.f32 %v10210_v54, 0.0  ;;  %v2083_v62 = vmax.f32 %v10212_v57, 0.0 }
 0x37b   :  { %v2084_v51 = vmax.f32 %v10214_v0, 0.0  ;;  %v2085_v13 = vmax.f32 %v10216_v38, 0.0  ;;  %v2086_v28 = vmax.f32 %v10218_v53, 0.0  ;;  %v2087_v17 = vmax.f32 %v10220_v55, 0.0 }
 0x37c   :  { %v2088_v34 = vmax.f32 %v10222_v49, 0.0  ;;  %v2089_v15 = vmax.f32 %v10224_v32, 0.0  ;;  %v2090_v11 = vmax.f32 %v10226_v35, 0.0  ;;  %v2091_v21 = vmax.f32 %v10228_v18, 0.0 }
 0x37d   :  { %v2092_v23 = vmax.f32 %v10230_v4, 0.0  ;;  %v2093_v48 = vmax.f32 %v10232_v44, 0.0  ;;  %v2094_v9 = vmax.f32 %v2062_v46, 0.0  ;;  %v2095_v6 = vmax.f32 %v2063_v59, 0.0 }
 0x37e   :  { %v2096_v19 = vmax.f32 %v2064_v20, 0.0  ;;  %v2097_v24 = vmax.f32 %v2065_v5, 0.0  ;;  %v2098_v1 = vmax.f32 %v2066_v41, 0.0  ;;  %v2099_v33 = vmax.f32 %v2067_v16, 0.0 }
 0x37f   :  { %v2100_v45 = vmax.f32 %v2068_v37, 0.0  ;;  %v2101_v2 = vmax.f32 %v2069_v50, 0.0  ;;  %v2102_v30 = vmax.f32 %v2070_v12, 0.0  ;;  %v2103_v54 = vmax.f32 %v2071_v10, 0.0 }
 0x380   :  { %v2104_v57 = vmax.f32 %v2072_v40, 0.0  ;;  %v2105_v0 = vmax.f32 %v2073_v26, 0.0  ;;  %v2106_v38 = vmax.f32 %v2074_v25, 0.0  ;;  %v2107_v53 = vmax.f32 %v2075_v52, 0.0 }
 0x381   :  { %v2108_v55 = vmax.f32 %v2076_v31, %v2078_v47  ;;  %v2109_v49 = vmax.f32 %v2077_v39, %v2079_v56  ;;  %v2110_v32 = vmax.f32 %v2080_v42, %v2082_v22  ;;  %v2111_v35 = vmax.f32 %v2081_v60, %v2083_v62 }
 0x382   :  { %v2112_v18 = vmax.f32 %v2084_v51, %v2086_v28  ;;  %v2113_v4 = vmax.f32 %v2085_v13, %v2087_v17  ;;  %v2114_v44 = vmax.f32 %v2088_v34, %v2090_v11  ;;  %v2115_v46 = vmax.f32 %v2089_v15, %v2091_v21 }
 0x383   :  { %v2116_v59 = vmax.f32 %v2092_v23, %v2094_v9  ;;  %v2117_v20 = vmax.f32 %v2093_v48, %v2095_v6  ;;  %v2118_v5 = vmax.f32 %v2096_v19, %v2098_v1  ;;  %v2119_v41 = vmax.f32 %v2097_v24, %v2099_v33 }
 0x384   :  { %v2120_v16 = vmax.f32 %v2100_v45, %v2102_v30  ;;  %v2121_v37 = vmax.f32 %v2101_v2, %v2103_v54  ;;  %v2122_v50 = vmax.f32 %v2104_v57, %v2106_v38  ;;  %v2123_v26 = vmax.f32 %v2105_v0, %v2107_v53 }
 0x385   :  { %v10252_v52 = vmax.f32 %v2108_v55, %v2112_v18  ;;  %v10254_v12 = vmax.f32 %v2109_v49, %v2113_v4  ;;  %v10256_v10 = vmax.f32 %v2110_v32, %v2114_v44  ;;  %v10258_v40 = vmax.f32 %v2111_v35, %v2115_v46 }
 0x386   :  { %v10260_v25 = vmax.f32 %v2116_v59, %v2120_v16  ;;  %v10262_v31 = vmax.f32 %v2117_v20, %v2121_v37  ;;  %v10264_v39 = vmax.f32 %v2118_v5, %v2122_v50  ;;  %v10266_v47 = vmax.f32 %v2119_v41, %v2123_v26 }
 0x387   :  { %2128 = vst [vmem:[#allocation4 + $0x58] sm:$0xff] %v10252_v52  ;;  %2129 = vst [vmem:[#allocation4 + $0x18] sm:$0xff] %v10254_v12  ;;  %v7828_v56 = vpack.c.bf16 %v10254_v12, %v10252_v52  ;;  %v7329_v42 = vrot.slane %v10145_v36, 11  ;;  %v10277_v60 = vpack.c.bf16 %v10258_v40, %v10256_v10  ;;  %v2296_v22 = vrot.slane %v10149_v14, 5 }
 0x388   :  { %2130 = vst [vmem:[#allocation4 + $0x50] sm:$0xff] %v10256_v10  ;;  %2131 = vst [vmem:[#allocation4 + $0x68] sm:$0xff] %v10258_v40  ;;  %v7842_v36 = vpack.c.bf16 %v10262_v31, %v10260_v25  ;;  %v7346_v51 = vrot.slane %v10154_v63, 11  ;;  %v10810_v13 = vpack.c.bf16 %v10137_v8, %v10135_v43  ;;  %v10811_v17 = vpack.c.bf16 %v10141_v61, %v10139_v29 }
 0x389   :  { %2137 = vst [vmem:[#allocation4 + $0x10] sm:$0xff] %v10260_v25  ;;  %2138 = vst [vmem:[#allocation4 + $0x38] sm:$0xff] %v10262_v31  ;;  %v2169_v15 = vrot.slane %v7828_v56, 7  ;;  %v2210_v11 = vshrl.u32 %v7828_v56, 16  ;;  %v2284_v21 = vshll.u32 %v10277_v60, 16  ;;  %v10306_v23 = vpack.c.bf16 %v10266_v47, %v10264_v39 }
 0x38a   :  { %2139 = vst [vmem:[#allocation4 + $0x60] sm:$0xff] %v10264_v39  ;;  %2140 = vst [vmem:[#allocation4 + $0x70] sm:$0xff] %v10266_v47  ;;  %v10296_v28 = vshll.u32 %v10810_v13, 16  ;;  %v10301_v34 = vrot.slane %v10811_v17, 5  ;;  %v2288_v63 = vshrl.u32 %v10277_v60, 16  ;;  %v2330_v48 = vrot.slane %v10277_v60, 5 }
 0x38b   :  { %v2364_v43 = vrot.slane %v7842_v36, 7  ;;  %v2402_v8 = vshrl.u32 %v7842_v36, 16  ;;  %v10319_v61 = vsel %vm10282_vm11, %v10143_v27, %v2169_v15  ;;  %v10321_v9 = vrot.slane %v2210_v11, 7 }
 0x38c   :  { %v2213_v6 = vshll.u32 %v7828_v56, 16  ;;  %v10323_v19 = vrot.slane %v2284_v21, 5  ;;  %v2171_v1 = vrot.slane %v2169_v15, 4  ;;  %v2290_v33 = vrot.slane %v2288_v63, 4 }
 0x38d   :  { %v2332_v45 = vrot.slane %v2330_v48, 4  ;;  %v10334_v2 = vsel %vm10282_vm11, %v10151_v3, %v2364_v43  ;;  %v2366_v30 = vrot.slane %v2364_v43, 4  ;;  %v10337_v54 = vrot.slane %v2402_v8, 7 }
 0x38e   :  { %v2215_v27 = vor.u32 %v2213_v6, %v10321_v9  ;;  %v2405_v57 = vshll.u32 %v7842_v36, 16  ;;  %v2291_v55 = vor.u32 %v2290_v33, %v10323_v19  ;;  %v2248_v18 = vld [vmem:[#allocation4 + $0x58] sm:$0xfe]  ;;  %v2473_v60 = vshll.u32 %v10306_v23, 16 }
 0x38f   :  { %v2145_v0 = vld [vmem:[#allocation4 + $0x50] sm:$0x3f]  ;;  %v2146_v38 = vld [vmem:[#allocation4 + $0x68] sm:$0x3f]  ;;  %v10343_v49 = vsel %vm10312_vm12, %v2332_v45, %v10147_v58  ;;  %v2249_v4 = vld [vmem:[#allocation4 + $0x18] sm:$0xfe] }
 0x390   :  { %v2182_v53 = vld [vmem:[#allocation4 + $0x50] sm:$0x7f]  ;;  %v7829_v32 = vpack.c.bf16 %v2146_v38, %v2145_v0  ;;  %v2183_v35 = vld [vmem:[#allocation4 + $0x68] sm:$0x7f]  ;;  %v10347_v3 = vsel %vm10327_vm13, %v7329_v42, %v2215_v27  ;;  %v2407_v44 = vor.u32 %v2405_v57, %v10337_v54  ;;  %v2217_v58 = vrot.slane %v10321_v9, 4 }
 0x391   :  { %v7832_v59 = vpack.c.bf16 %v2183_v35, %v2182_v53  ;;  %v7835_v20 = vpack.c.bf16 %v2249_v4, %v2248_v18  ;;  %v2292_v5 = vrot.slane %v2291_v55, 4  ;;  %v2302_v41 = vld [vmem:[#allocation4 + $0x58] sm:$0xfc]  ;;  %v2343_v26 = vld [vmem:[#allocation4 + $0x60] sm:$0x3f]  ;;  %v2475_v14 = vrot.slane %v2473_v60, 5 }
 0x392   :  { %v2303_v16 = vld [vmem:[#allocation4 + $0x18] sm:$0xfc]  ;;  %v2172_v37 = vrot.slane %v7829_v32, 7  ;;  %v2344_v56 = vld [vmem:[#allocation4 + $0x70] sm:$0x3f]  ;;  %v10359_v42 = vsel %vm10327_vm13, %v7346_v51, %v2407_v44 }
 0x393   :  { %v7838_v50 = vpack.c.bf16 %v2303_v16, %v2302_v41  ;;  %v2219_v36 = vshrl.u32 %v7832_v59, 16  ;;  %v2222_v13 = vshll.u32 %v7832_v59, 16  ;;  %v2275_v17 = vshrl.u32 %v7835_v20, 16  ;;  %v2377_v11 = vld [vmem:[#allocation4 + $0x60] sm:$0x7f] }
 0x394   :  { %v2278_v15 = vshll.u32 %v7835_v20, 16  ;;  %v10364_v21 = vsel %vm10282_vm11, %v2171_v1, %v2172_v37  ;;  %v10370_v63 = vsel %vm10352_vm14, %v2292_v5, %v2296_v22  ;;  %v7843_v51 = vpack.c.bf16 %v2344_v56, %v2343_v26  ;;  %v2378_v8 = vld [vmem:[#allocation4 + $0x70] sm:$0x7f]  ;;  %v2441_v57 = vld [vmem:[#allocation4 + $0x38] sm:$0xfe] }
 0x395   :  { %v7338_v43 = vrot.slane %v7838_v50, 9  ;;  %v2440_v9 = vld [vmem:[#allocation4 + $0x10] sm:$0xfe]  ;;  %v2221_v6 = vrot.slane %v2219_v36, 7  ;;  %v2277_v33 = vrot.slane %v2275_v17, 4  ;;  %v7846_v27 = vpack.c.bf16 %v2378_v8, %v2377_v11 }
 0x396   :  { %v2280_v45 = vrot.slane %v2278_v15, 5  ;;  %v2367_v1 = vrot.slane %v7843_v51, 7  ;;  %v7849_v38 = vpack.c.bf16 %v2441_v57, %v2440_v9  ;;  %v2491_v53 = vld [vmem:[#allocation4 + $0x10] sm:$0xfc]  ;;  %v2492_v55 = vld [vmem:[#allocation4 + $0x38] sm:$0xfc] }
 0x397   :  { %v10374_v0 = vsel %vm10312_vm12, %v7338_v43, %v2330_v48  ;;  %v2224_v22 = vor.u32 %v2222_v13, %v2221_v6  ;;  %v2411_v35 = vshrl.u32 %v7846_v27, 16  ;;  %v2414_v18 = vshll.u32 %v7846_v27, 16 }
 0x398   :  { %v2281_v32 = vor.u32 %v2280_v45, %v2277_v33  ;;  %v10378_v4 = vsel %vm10282_vm11, %v2366_v30, %v2367_v1  ;;  %v2464_v44 = vshrl.u32 %v7849_v38, 16  ;;  %v2467_v59 = vshll.u32 %v7849_v38, 16 }
 0x399   :  { %v2477_v20 = vshrl.u32 %v10306_v23, 16  ;;  %v10383_v48 = vsel %vm10327_vm13, %v2217_v58, %v2224_v22  ;;  %v2413_v41 = vrot.slane %v2411_v35, 7  ;;  %v7852_v16 = vpack.c.bf16 %v2492_v55, %v2491_v53 }
 0x39a   :  { %v2282_v5 = vrot.slane %v2281_v32, 4  ;;  %v2466_v37 = vrot.slane %v2464_v44, 4  ;;  %v2469_v50 = vrot.slane %v2467_v59, 5  ;;  %v2516_v56 = vrot.slane %v10306_v23, 5 }
 0x39b   :  { %v2479_v26 = vrot.slane %v2477_v20, 4  ;;  %v2409_v30 = vrot.slane %v10337_v54, 4  ;;  %v2416_v60 = vor.u32 %v2414_v18, %v2413_v41  ;;  %v7355_v36 = vrot.slane %v7852_v16, 9 }
 0x39c   :  { %v10389_v62 = vsel %vm10352_vm14, %v2282_v5, %v10323_v19  ;;  %v2470_v13 = vor.u32 %v2469_v50, %v2466_v37  ;;  %v2485_v17 = vrot.slane %v10296_v28, 5  ;;  %v2518_v15 = vrot.slane %v2516_v56, 4 }
 0x39d   :  { %v2480_v58 = vor.u32 %v2479_v26, %v2475_v14  ;;  %v10395_v11 = vsel %vm10327_vm13, %v2409_v30, %v2416_v60  ;;  %v10399_v23 = vsel %vm10312_vm12, %v7355_v36, %v2516_v56 }
 0x39e   :  { %v2471_v43 = vrot.slane %v2470_v13, 4  ;;  %v10404_v54 = vsel %vm10312_vm12, %v2518_v15, %v10301_v34 }
 0x39f   :  { %v2481_v19 = vrot.slane %v2480_v58, 4 }
 0x3a0   :  { %v10408_v51 = vsel %vm10352_vm14, %v2471_v43, %v2475_v14 }
 0x3a1   :  { %v10412_v28 = vsel %vm10352_vm14, %v2481_v19, %v2485_v17 }
 0x3a2   :  { %9104 = dma.done.wait [#allocation7], 40960 }
 0x3a3   :  { %9105 = vsyncadd [#allocation7], 4294926336  ;;  %v10416_v24 = vcombine.high %v10319_v61, %v10364_v21  ;;  %v10420_v8 = vcombine.high %v10347_v3, %v10383_v48  ;;  %v8322_v34 = vld [vmem:[#allocation2 + $0xe4] ss:$16 sps:$4 sm:$0xff]   ;;  %v8326_v46 = vld [vmem:[#allocation2 + $0xe0] ss:$16 sps:$4 sm:$0xff]  }
 0x3a4   :  { %v8324_v29 = vld [vmem:[#allocation2 + $0x2e4] ss:$16 sps:$4 sm:$0xff]   ;;  %4569 = vmatprep.subr.bf16.mxu0 %v8322_v34  ;;  %v8327_v9 = vld [vmem:[#allocation2 + $0x2e0] ss:$16 sps:$4 sm:$0xff]  }
 0x3a5   :  { %4601 = vmatprep.mubr.bf16.mxu0 %v10416_v24  ;;  %4654 = vmatprep.mubr.bf16.mxu1 %v10420_v8  ;;  %v8328_v6 = vld [vmem:[#allocation2 + $0xc4] ss:$16 sps:$4 sm:$0xff]   ;;  %v8332_v45 = vld [vmem:[#allocation2 + $0xc0] ss:$16 sps:$4 sm:$0xff]  }
 0x3a6   :  { %4622 = vmatprep.subr.bf16.mxu1 %v8324_v29  ;;  %4570 = vmatpush1.bf16.msra.mxu0 %v8326_v46  ;;  %v8330_v33 = vld [vmem:[#allocation2 + $0x2c4] ss:$16 sps:$4 sm:$0xff]   ;;  %v8333_v27 = vld [vmem:[#allocation2 + $0x2c0] ss:$16 sps:$4 sm:$0xff]  }
 0x3a7   :  { %4623 = vmatpush1.bf16.msra.mxu1 %v8327_v9  ;;  %4571 = vmatprep.subr.bf16.mxu0 %v8328_v6  ;;  %v8334_v57 = vld [vmem:[#allocation2 + $0xa4] ss:$16 sps:$4 sm:$0xff]   ;;  %v8338_v38 = vld [vmem:[#allocation2 + $0xa0] ss:$16 sps:$4 sm:$0xff]  }
 0x3a8   :  { %4624 = vmatprep.subr.bf16.mxu1 %v8330_v33  ;;  %v8336_v1 = vld [vmem:[#allocation2 + $0x2a4] ss:$16 sps:$4 sm:$0xff]   ;;  %v8339_v14 = vld [vmem:[#allocation2 + $0x2a0] ss:$16 sps:$4 sm:$0xff]  }
 0x3a9   :  { %v8340_v53 = vld [vmem:[#allocation2 + $0x84] ss:$16 sps:$4 sm:$0xff]   ;;  %v8344_v22 = vld [vmem:[#allocation2 + $0x80] ss:$16 sps:$4 sm:$0xff]  }
 0x3aa   :  { %4572 = vmatpush1.bf16.msra.mxu0 %v8332_v45  ;;  %v8342_v55 = vld [vmem:[#allocation2 + $0x284] ss:$16 sps:$4 sm:$0xff]   ;;  %v8345_v32 = vld [vmem:[#allocation2 + $0x280] ss:$16 sps:$4 sm:$0xff]  }
 0x3ab   :  { %4625 = vmatpush1.bf16.msra.mxu1 %v8333_v27  ;;  %4573 = vmatprep.subr.bf16.mxu0 %v8334_v57  ;;  %v8346_v35 = vld [vmem:[#allocation2 + $0x64] ss:$16 sps:$4 sm:$0xff]   ;;  %v8350_v44 = vld [vmem:[#allocation2 + $0x60] ss:$16 sps:$4 sm:$0xff]  }
 0x3ac   :  { %4626 = vmatprep.subr.bf16.mxu1 %v8336_v1  ;;  %v8348_v18 = vld [vmem:[#allocation2 + $0x264] ss:$16 sps:$4 sm:$0xff]   ;;  %v8351_v59 = vld [vmem:[#allocation2 + $0x260] ss:$16 sps:$4 sm:$0xff]  }
 0x3ad   :  { %v8352_v20 = vld [vmem:[#allocation2 + $0x44] ss:$16 sps:$4 sm:$0xff]   ;;  %v8356_v41 = vld [vmem:[#allocation2 + $0x40] ss:$16 sps:$4 sm:$0xff]  }
 0x3ae   :  { %4574 = vmatpush1.bf16.msra.mxu0 %v8338_v38  ;;  %v8354_v5 = vld [vmem:[#allocation2 + $0x244] ss:$16 sps:$4 sm:$0xff]   ;;  %v8357_v16 = vld [vmem:[#allocation2 + $0x240] ss:$16 sps:$4 sm:$0xff]  }
 0x3af   :  { %4627 = vmatpush1.bf16.msra.mxu1 %v8339_v14  ;;  %4575 = vmatprep.subr.bf16.mxu0 %v8340_v53  ;;  %v8358_v37 = vld [vmem:[#allocation2 + $0x24] ss:$16 sps:$4 sm:$0xff]   ;;  %v8362_v26 = vld [vmem:[#allocation2 + $0x20] ss:$16 sps:$4 sm:$0xff]  }
 0x3b0   :  { %4628 = vmatprep.subr.bf16.mxu1 %v8342_v55  ;;  %v8360_v50 = vld [vmem:[#allocation2 + $0x224] ss:$16 sps:$4 sm:$0xff]   ;;  %v8363_v56 = vld [vmem:[#allocation2 + $0x220] ss:$16 sps:$4 sm:$0xff]  }
 0x3b1   :  { %v8364_v30 = vld [vmem:[#allocation2 + $0x4] ss:$16 sps:$4 sm:$0xff]   ;;  %v8368_v36 = vld [vmem:[#allocation2] ss:$16 sps:$4 sm:$0xff]  }
 0x3b2   :  { %4576 = vmatpush1.bf16.msra.mxu0 %v8344_v22  ;;  %v8366_v60 = vld [vmem:[#allocation2 + $0x204] ss:$16 sps:$4 sm:$0xff]   ;;  %v8369_v13 = vld [vmem:[#allocation2 + $0x200] ss:$16 sps:$4 sm:$0xff]  }
 0x3b3   :  { %4629 = vmatpush1.bf16.msra.mxu1 %v8345_v32  ;;  %4577 = vmatprep.subr.bf16.mxu0 %v8346_v35  ;;  %v8370_v58 = vld [vmem:[#allocation2 + $0x1e4] ss:$16 sps:$4 sm:$0xff]   ;;  %v8374_v15 = vld [vmem:[#allocation2 + $0x1e0] ss:$16 sps:$4 sm:$0xff]  }
 0x3b4   :  { %4630 = vmatprep.subr.bf16.mxu1 %v8348_v18  ;;  %v8372_v17 = vld [vmem:[#allocation2 + $0x3e4] ss:$16 sps:$4 sm:$0xff]   ;;  %v8375_v43 = vld [vmem:[#allocation2 + $0x3e0] ss:$16 sps:$4 sm:$0xff]  }
 0x3b5   :  { %v8376_v19 = vld [vmem:[#allocation2 + $0x1c4] ss:$16 sps:$4 sm:$0xff]   ;;  %v8380_v29 = vld [vmem:[#allocation2 + $0x1c0] ss:$16 sps:$4 sm:$0xff]  }
 0x3b6   :  { %4578 = vmatpush1.bf16.msra.mxu0 %v8350_v44  ;;  %v8378_v34 = vld [vmem:[#allocation2 + $0x3c4] ss:$16 sps:$4 sm:$0xff]   ;;  %v8381_v46 = vld [vmem:[#allocation2 + $0x3c0] ss:$16 sps:$4 sm:$0xff]  }
 0x3b7   :  { %4631 = vmatpush1.bf16.msra.mxu1 %v8351_v59  ;;  %4579 = vmatprep.subr.bf16.mxu0 %v8352_v20  ;;  %v8382_v9 = vld [vmem:[#allocation2 + $0x1a4] ss:$16 sps:$4 sm:$0xff]   ;;  %v8386_v33 = vld [vmem:[#allocation2 + $0x1a0] ss:$16 sps:$4 sm:$0xff]  }
 0x3b8   :  { %4632 = vmatprep.subr.bf16.mxu1 %v8354_v5  ;;  %v8384_v6 = vld [vmem:[#allocation2 + $0x3a4] ss:$16 sps:$4 sm:$0xff]   ;;  %v8387_v45 = vld [vmem:[#allocation2 + $0x3a0] ss:$16 sps:$4 sm:$0xff]  }
 0x3b9   :  { %v8388_v27 = vld [vmem:[#allocation2 + $0x184] ss:$16 sps:$4 sm:$0xff]   ;;  %v8392_v1 = vld [vmem:[#allocation2 + $0x180] ss:$16 sps:$4 sm:$0xff]  }
 0x3ba   :  { %4580 = vmatpush1.bf16.msra.mxu0 %v8356_v41  ;;  %v8390_v57 = vld [vmem:[#allocation2 + $0x384] ss:$16 sps:$4 sm:$0xff]   ;;  %v8393_v38 = vld [vmem:[#allocation2 + $0x380] ss:$16 sps:$4 sm:$0xff]  }
 0x3bb   :  { %4633 = vmatpush1.bf16.msra.mxu1 %v8357_v16  ;;  %4581 = vmatprep.subr.bf16.mxu0 %v8358_v37  ;;  %v8394_v14 = vld [vmem:[#allocation2 + $0x164] ss:$16 sps:$4 sm:$0xff]   ;;  %v8398_v55 = vld [vmem:[#allocation2 + $0x160] ss:$16 sps:$4 sm:$0xff]  }
 0x3bc   :  { %4634 = vmatprep.subr.bf16.mxu1 %v8360_v50  ;;  %v8396_v53 = vld [vmem:[#allocation2 + $0x364] ss:$16 sps:$4 sm:$0xff]   ;;  %v8399_v22 = vld [vmem:[#allocation2 + $0x360] ss:$16 sps:$4 sm:$0xff]  }
 0x3bd   :  { %v8400_v32 = vld [vmem:[#allocation2 + $0x144] ss:$16 sps:$4 sm:$0xff]   ;;  %v8404_v18 = vld [vmem:[#allocation2 + $0x140] ss:$16 sps:$4 sm:$0xff]  }
 0x3be   :  { %4582 = vmatpush1.bf16.msra.mxu0 %v8362_v26  ;;  %v8402_v35 = vld [vmem:[#allocation2 + $0x344] ss:$16 sps:$4 sm:$0xff]   ;;  %v8405_v44 = vld [vmem:[#allocation2 + $0x340] ss:$16 sps:$4 sm:$0xff]  }
 0x3bf   :  { %4635 = vmatpush1.bf16.msra.mxu1 %v8363_v56  ;;  %4583 = vmatprep.subr.bf16.mxu0 %v8364_v30  ;;  %v8406_v59 = vld [vmem:[#allocation2 + $0x124] ss:$16 sps:$4 sm:$0xff]   ;;  %v8410_v5 = vld [vmem:[#allocation2 + $0x120] ss:$16 sps:$4 sm:$0xff]  }
 0x3c0   :  { %4636 = vmatprep.subr.bf16.mxu1 %v8366_v60  ;;  %v8408_v20 = vld [vmem:[#allocation2 + $0x324] ss:$16 sps:$4 sm:$0xff]   ;;  %v8411_v41 = vld [vmem:[#allocation2 + $0x320] ss:$16 sps:$4 sm:$0xff]   ;;  %v10426_v60 = vcombine.low %v10319_v61, %v10364_v21  ;;  %v10438_v61 = vcombine.high %v10359_v42, %v10395_v11 }
 0x3c1   :  { %v8412_v16 = vld [vmem:[#allocation2 + $0x104] ss:$16 sps:$4 sm:$0xff]   ;;  %v8416_v50 = vld [vmem:[#allocation2 + $0x100] ss:$16 sps:$4 sm:$0xff]  }
 0x3c2   :  { %4584 = vmatpush1.bf16.msra.mxu0 %v8368_v36  ;;  %v8414_v37 = vld [vmem:[#allocation2 + $0x304] ss:$16 sps:$4 sm:$0xff]   ;;  %v8417_v26 = vld [vmem:[#allocation2 + $0x300] ss:$16 sps:$4 sm:$0xff]   ;;  %v10430_v36 = vcombine.low %v10347_v3, %v10383_v48 }
 0x3c3   :  { %4637 = vmatpush1.bf16.msra.mxu1 %v8369_v13  ;;  %4585 = vmatprep.subr.bf16.mxu0 %v8370_v58  ;;  %v8420_v56 = vld [vmem:[#allocation2 + $0x4e4] ss:$16 sps:$4 sm:$0xff]   ;;  %v8418_v13 = vld [vmem:[#allocation2 + $0x4e0] ss:$16 sps:$4 sm:$0xff]  }
 0x3c4   :  { %4638 = vmatprep.subr.bf16.mxu1 %v8372_v17  ;;  %v8423_v30 = vld [vmem:[#allocation2 + $0x6e4] ss:$16 sps:$4 sm:$0xff]   ;;  %v8421_v58 = vld [vmem:[#allocation2 + $0x6e0] ss:$16 sps:$4 sm:$0xff]  }
 0x3c5   :  { %v8426_v17 = vld [vmem:[#allocation2 + $0x4c4] ss:$16 sps:$4 sm:$0xff]   ;;  %v8424_v3 = vld [vmem:[#allocation2 + $0x4c0] ss:$16 sps:$4 sm:$0xff]  }
 0x3c6   :  { %4586 = vmatpush2.bf16.msra.mxu0 %v8374_v15  ;;  %v8429_v15 = vld [vmem:[#allocation2 + $0x6c4] ss:$16 sps:$4 sm:$0xff]   ;;  %v8427_v21 = vld [vmem:[#allocation2 + $0x6c0] ss:$16 sps:$4 sm:$0xff]  }
 0x3c7   :  { %4639 = vmatpush2.bf16.msra.mxu1 %v8375_v43  ;;  %4587 = vmatprep.subr.bf16.mxu0 %v8376_v19  ;;  %v10434_v43 = vcombine.high %v10334_v2, %v10378_v4  ;;  %v8432_v48 = vld [vmem:[#allocation2 + $0x4a4] ss:$16 sps:$4 sm:$0xff]  }
 0x3c8   :  { %4640 = vmatprep.subr.bf16.mxu1 %v8378_v34  ;;  %v8435_v19 = vld [vmem:[#allocation2 + $0x6a4] ss:$16 sps:$4 sm:$0xff]   ;;  %v8430_v34 = vld [vmem:[#allocation2 + $0x4a0] ss:$16 sps:$4 sm:$0xff]  }
 0x3ca   :  { %4588 = vmatpush2.bf16.msra.mxu0 %v8380_v29  ;;  %v8433_v29 = vld [vmem:[#allocation2 + $0x6a0] ss:$16 sps:$4 sm:$0xff]  }
 0x3cb   :  { %4641 = vmatpush2.bf16.msra.mxu1 %v8381_v46  ;;  %4589 = vmatprep.subr.bf16.mxu0 %v8382_v9  ;;  %v10446_v46 = vcombine.low %v10334_v2, %v10378_v4  ;;  %v10450_v9 = vcombine.low %v10359_v42, %v10395_v11  ;;  %v8436_v2 = vld [vmem:[#allocation2 + $0x480] ss:$16 sps:$4 sm:$0xff]   ;;  %v8444_v42 = vld [vmem:[#allocation2 + $0x464] ss:$16 sps:$4 sm:$0xff]  }
 0x3cc   :  { %4642 = vmatprep.subr.bf16.mxu1 %v8384_v6  ;;  %v8438_v6 = vld [vmem:[#allocation2 + $0x484] ss:$16 sps:$4 sm:$0xff]   ;;  %v8439_v4 = vld [vmem:[#allocation2 + $0x680] ss:$16 sps:$4 sm:$0xff]  }
 0x3cd   :  { %v8447_v11 = vld [vmem:[#allocation2 + $0x664] ss:$16 sps:$4 sm:$0xff]  }
 0x3ce   :  { %4590 = vmatpush2.bf16.msra.mxu0 %v8386_v33  ;;  %v8441_v33 = vld [vmem:[#allocation2 + $0x684] ss:$16 sps:$4 sm:$0xff]  }
 0x3cf   :  { %4643 = vmatpush2.bf16.msra.mxu1 %v8387_v45  ;;  %4591 = vmatprep.subr.bf16.mxu0 %v8388_v27  ;;  %v10454_v45 = vpack.c.bf16 %v10258_v40, %v10254_v12  ;;  %v10458_v27 = vcombine.high %v10389_v62, %v10370_v63  ;;  %v8442_v12 = vld [vmem:[#allocation2 + $0x460] ss:$16 sps:$4 sm:$0xff]  }
 0x3d0   :  { %4644 = vmatprep.subr.bf16.mxu1 %v8390_v57  ;;  %v8445_v40 = vld [vmem:[#allocation2 + $0x660] ss:$16 sps:$4 sm:$0xff]   ;;  %v8450_v57 = vld [vmem:[#allocation2 + $0x444] ss:$16 sps:$4 sm:$0xff]  }
 0x3d2   :  { %4592 = vmatpush2.bf16.msra.mxu0 %v8392_v1  ;;  %v8453_v1 = vld [vmem:[#allocation2 + $0x644] ss:$16 sps:$4 sm:$0xff]  }
 0x3d3   :  { %4645 = vmatpush2.bf16.msra.mxu1 %v8393_v38  ;;  %4593 = vmatprep.subr.bf16.mxu0 %v8394_v14  ;;  %v8448_v38 = vld [vmem:[#allocation2 + $0x440] ss:$16 sps:$4 sm:$0xff]  }
 0x3d4   :  { %4646 = vmatprep.subr.bf16.mxu1 %v8396_v53  ;;  %v8451_v14 = vld [vmem:[#allocation2 + $0x640] ss:$16 sps:$4 sm:$0xff]   ;;  %v8456_v53 = vld [vmem:[#allocation2 + $0x424] ss:$16 sps:$4 sm:$0xff]  }
 0x3d6   :  { %4594 = vmatpush2.bf16.msra.mxu0 %v8398_v55  ;;  %v8459_v55 = vld [vmem:[#allocation2 + $0x624] ss:$16 sps:$4 sm:$0xff]  }
 0x3d7   :  { %4647 = vmatpush2.bf16.msra.mxu1 %v8399_v22  ;;  %4595 = vmatprep.subr.bf16.mxu0 %v8400_v32  ;;  %v8454_v22 = vld [vmem:[#allocation2 + $0x420] ss:$16 sps:$4 sm:$0xff]  }
 0x3d8   :  { %4648 = vmatprep.subr.bf16.mxu1 %v8402_v35  ;;  %v8457_v32 = vld [vmem:[#allocation2 + $0x620] ss:$16 sps:$4 sm:$0xff]   ;;  %v8462_v35 = vld [vmem:[#allocation2 + $0x404] ss:$16 sps:$4 sm:$0xff]  }
 0x3da   :  { %4596 = vmatpush2.bf16.msra.mxu0 %v8404_v18  ;;  %v8465_v18 = vld [vmem:[#allocation2 + $0x604] ss:$16 sps:$4 sm:$0xff]  }
 0x3db   :  { %4649 = vmatpush2.bf16.msra.mxu1 %v8405_v44  ;;  %4597 = vmatprep.subr.bf16.mxu0 %v8406_v59  ;;  %v8460_v44 = vld [vmem:[#allocation2 + $0x400] ss:$16 sps:$4 sm:$0xff]  }
 0x3dc   :  { %4650 = vmatprep.subr.bf16.mxu1 %v8408_v20  ;;  %v8463_v59 = vld [vmem:[#allocation2 + $0x600] ss:$16 sps:$4 sm:$0xff]   ;;  %v8468_v20 = vld [vmem:[#allocation2 + $0x5e4] ss:$16 sps:$4 sm:$0xff]  }
 0x3de   :  { %4598 = vmatpush2.bf16.msra.mxu0 %v8410_v5  ;;  %v8471_v5 = vld [vmem:[#allocation2 + $0x7e4] ss:$16 sps:$4 sm:$0xff]  }
 0x3df   :  { %4651 = vmatpush2.bf16.msra.mxu1 %v8411_v41  ;;  %4599 = vmatprep.subr.bf16.mxu0 %v8412_v16  ;;  %v8466_v41 = vld [vmem:[#allocation2 + $0x5e0] ss:$16 sps:$4 sm:$0xff]  }
 0x3e0   :  { %4652 = vmatprep.subr.bf16.mxu1 %v8414_v37  ;;  %v8469_v16 = vld [vmem:[#allocation2 + $0x7e0] ss:$16 sps:$4 sm:$0xff]   ;;  %v8474_v37 = vld [vmem:[#allocation2 + $0x5c4] ss:$16 sps:$4 sm:$0xff]  }
 0x3e2   :  { %4600 = vmatpush2.bf16.msra.mxu0 %v8416_v50  ;;  %v8477_v50 = vld [vmem:[#allocation2 + $0x7c4] ss:$16 sps:$4 sm:$0xff]  }
 0x3e3   :  { %4653 = vmatpush2.bf16.msra.mxu1 %v8417_v26  ;;  %4675 = vmatprep.subr.bf16.mxu0 %v8420_v56  ;;  %v8472_v26 = vld [vmem:[#allocation2 + $0x5c0] ss:$16 sps:$4 sm:$0xff]  }
 0x3e4   :  { %4728 = vmatprep.subr.bf16.mxu1 %v8423_v30  ;;  %v8475_v56 = vld [vmem:[#allocation2 + $0x7c0] ss:$16 sps:$4 sm:$0xff]   ;;  %v8480_v30 = vld [vmem:[#allocation2 + $0x5a4] ss:$16 sps:$4 sm:$0xff]  }
 0x3e5   :  { %4602 = vmatmul.mubr.bf16.vlgmr.msra.gmra.mxu0 %v10426_v60 }
 0x3e6   :  { %4655 = vmatmul.mubr.bf16.vlgmr.msra.gmra.mxu1 %v10430_v36  ;;  %4676 = vmatpush1.bf16.msra.mxu0 %v8418_v13  ;;  %v8483_v13 = vld [vmem:[#allocation2 + $0x7a4] ss:$16 sps:$4 sm:$0xff]  }
 0x3e7   :  { %4729 = vmatpush1.bf16.msra.mxu1 %v8421_v58  ;;  %4677 = vmatprep.subr.bf16.mxu0 %v8426_v17  ;;  %v8478_v58 = vld [vmem:[#allocation2 + $0x5a0] ss:$16 sps:$4 sm:$0xff]  }
 0x3e8   :  { %4730 = vmatprep.subr.bf16.mxu1 %v8429_v15  ;;  %4611 = vmatprep.mubr.bf16.mxu0 %v10434_v43  ;;  %v8481_v17 = vld [vmem:[#allocation2 + $0x7a0] ss:$16 sps:$4 sm:$0xff]   ;;  %v8486_v15 = vld [vmem:[#allocation2 + $0x584] ss:$16 sps:$4 sm:$0xff]  }
 0x3e9   :  { %4664 = vmatprep.mubr.bf16.mxu1 %v10438_v61 }
 0x3ea   :  { %4678 = vmatpush1.bf16.msra.mxu0 %v8424_v3  ;;  %v8489_v3 = vld [vmem:[#allocation2 + $0x784] ss:$16 sps:$4 sm:$0xff]  }
 0x3eb   :  { %4731 = vmatpush1.bf16.msra.mxu1 %v8427_v21  ;;  %4679 = vmatprep.subr.bf16.mxu0 %v8432_v48  ;;  %v8484_v21 = vld [vmem:[#allocation2 + $0x580] ss:$16 sps:$4 sm:$0xff]  }
 0x3ec   :  { %4732 = vmatprep.subr.bf16.mxu1 %v8435_v19  ;;  %v8487_v48 = vld [vmem:[#allocation2 + $0x780] ss:$16 sps:$4 sm:$0xff]   ;;  %v8492_v19 = vld [vmem:[#allocation2 + $0x564] ss:$16 sps:$4 sm:$0xff]  }
 0x3ed   :  { %4612 = vmatmul.mubr.bf16.gmra.mxu0 %v10446_v46 }
 0x3ee   :  { %4665 = vmatmul.mubr.bf16.gmra.mxu1 %v10450_v9  ;;  %4680 = vmatpush1.bf16.msra.mxu0 %v8430_v34  ;;  %v8495_v34 = vld [vmem:[#allocation2 + $0x764] ss:$16 sps:$4 sm:$0xff]  }
 0x3ef   :  { %4733 = vmatpush1.bf16.msra.mxu1 %v8433_v29  ;;  %4681 = vmatprep.subr.bf16.mxu0 %v8438_v6  ;;  %v8490_v29 = vld [vmem:[#allocation2 + $0x560] ss:$16 sps:$4 sm:$0xff]  }
 0x3f0   :  { %4734 = vmatprep.subr.bf16.mxu1 %v8441_v33  ;;  %4707 = vmatprep.mubr.bf16.mxu0 %v10454_v45  ;;  %v8493_v6 = vld [vmem:[#allocation2 + $0x760] ss:$16 sps:$4 sm:$0xff]   ;;  %v8498_v33 = vld [vmem:[#allocation2 + $0x544] ss:$16 sps:$4 sm:$0xff]  }
 0x3f1   :  { %4760 = vmatprep.mubr.bf16.mxu1 %v10458_v27 }
 0x3f2   :  { %4682 = vmatpush1.bf16.msra.mxu0 %v8436_v2  ;;  %v8501_v2 = vld [vmem:[#allocation2 + $0x744] ss:$16 sps:$4 sm:$0xff]  }
 0x3f3   :  { %4735 = vmatpush1.bf16.msra.mxu1 %v8439_v4  ;;  %4683 = vmatprep.subr.bf16.mxu0 %v8444_v42  ;;  %v8496_v4 = vld [vmem:[#allocation2 + $0x540] ss:$16 sps:$4 sm:$0xff]  }
 0x3f4   :  { %4736 = vmatprep.subr.bf16.mxu1 %v8447_v11  ;;  %v8499_v42 = vld [vmem:[#allocation2 + $0x740] ss:$16 sps:$4 sm:$0xff]   ;;  %v8504_v11 = vld [vmem:[#allocation2 + $0x524] ss:$16 sps:$4 sm:$0xff]  }
 0x3f6   :  { %4684 = vmatpush1.bf16.msra.mxu0 %v8442_v12  ;;  %v8507_v12 = vld [vmem:[#allocation2 + $0x724] ss:$16 sps:$4 sm:$0xff]  }
 0x3f7   :  { %4737 = vmatpush1.bf16.msra.mxu1 %v8445_v40  ;;  %4685 = vmatprep.subr.bf16.mxu0 %v8450_v57  ;;  %v8502_v40 = vld [vmem:[#allocation2 + $0x520] ss:$16 sps:$4 sm:$0xff]  }
 0x3f8   :  { %4738 = vmatprep.subr.bf16.mxu1 %v8453_v1  ;;  %v8505_v57 = vld [vmem:[#allocation2 + $0x720] ss:$16 sps:$4 sm:$0xff]   ;;  %v8510_v1 = vld [vmem:[#allocation2 + $0x504] ss:$16 sps:$4 sm:$0xff]  }
 0x3fa   :  { %4686 = vmatpush1.bf16.msra.mxu0 %v8448_v38  ;;  %v8513_v38 = vld [vmem:[#allocation2 + $0x704] ss:$16 sps:$4 sm:$0xff]  }
 0x3fb   :  { %4739 = vmatpush1.bf16.msra.mxu1 %v8451_v14  ;;  %4687 = vmatprep.subr.bf16.mxu0 %v8456_v53  ;;  %v8508_v14 = vld [vmem:[#allocation2 + $0x500] ss:$16 sps:$4 sm:$0xff]  }
 0x3fc   :  { %4740 = vmatprep.subr.bf16.mxu1 %v8459_v55  ;;  %v8511_v53 = vld [vmem:[#allocation2 + $0x700] ss:$16 sps:$4 sm:$0xff]   ;;  %v8516_v55 = vld [vmem:[#allocation2 + $0x8e4] ss:$16 sps:$4 sm:$0xff]  }
 0x3fe   :  { %4688 = vmatpush1.bf16.msra.mxu0 %v8454_v22  ;;  %v8519_v22 = vld [vmem:[#allocation2 + $0xec] ss:$16 sps:$4 sm:$0xff]  }
 0x3ff   :  { %4741 = vmatpush1.bf16.msra.mxu1 %v8457_v32  ;;  %4689 = vmatprep.subr.bf16.mxu0 %v8462_v35  ;;  %v10466_v32 = vpack.c.bf16 %v10256_v10, %v10252_v52  ;;  %v10470_v35 = vcombine.low %v10389_v62, %v10370_v63  ;;  %v10478_v52 = vcombine.high %v10408_v51, %v10412_v28  ;;  %v8520_v10 = vld [vmem:[#allocation2 + $0x8c0] ss:$16 sps:$4 sm:$0xff]   ;;  %v8523_v63 = vld [vmem:[#allocation2 + $0xc8] ss:$16 sps:$4 sm:$0xff]   ;;  %v8528_v62 = vld [vmem:[#allocation2 + $0x8a4] ss:$16 sps:$4 sm:$0xff]  }
 0x400   :  { %4742 = vmatprep.subr.bf16.mxu1 %v8465_v18  ;;  %v8514_v18 = vld [vmem:[#allocation2 + $0x8e0] ss:$16 sps:$4 sm:$0xff]  }
 0x402   :  { %4690 = vmatpush1.bf16.msra.mxu0 %v8460_v44  ;;  %v8517_v44 = vld [vmem:[#allocation2 + $0xe8] ss:$16 sps:$4 sm:$0xff]  }
 0x403   :  { %4743 = vmatpush1.bf16.msra.mxu1 %v8463_v59  ;;  %4691 = vmatprep.subr.bf16.mxu0 %v8468_v20  ;;  %v8522_v59 = vld [vmem:[#allocation2 + $0x8c4] ss:$16 sps:$4 sm:$0xff]   ;;  %v8525_v20 = vld [vmem:[#allocation2 + $0xcc] ss:$16 sps:$4 sm:$0xff]  }
 0x404   :  { %4744 = vmatprep.subr.bf16.mxu1 %v8471_v5  ;;  %v10474_v5 = vpack.c.bf16 %v10266_v47, %v10262_v31  ;;  %v10486_v31 = vpack.c.bf16 %v10264_v39, %v10260_v25  ;;  %v8526_v47 = vld [vmem:[#allocation2 + $0x8a0] ss:$16 sps:$4 sm:$0xff]   ;;  %v8535_v39 = vld [vmem:[#allocation2 + $0x88] ss:$16 sps:$4 sm:$0xff]  }
 0x405   :  { %v8532_v25 = vld [vmem:[#allocation2 + $0x880] ss:$16 sps:$4 sm:$0xff]  }
 0x406   :  { %4692 = vmatpush2.bf16.msra.mxu0 %v8466_v41  ;;  %v8531_v41 = vld [vmem:[#allocation2 + $0xac] ss:$16 sps:$4 sm:$0xff]  }
 0x407   :  { %4745 = vmatpush2.bf16.msra.mxu1 %v8469_v16  ;;  %4693 = vmatprep.subr.bf16.mxu0 %v8474_v37  ;;  %v8529_v16 = vld [vmem:[#allocation2 + $0xa8] ss:$16 sps:$4 sm:$0xff]   ;;  %v10490_v37 = vcombine.low %v10408_v51, %v10412_v28  ;;  %v8540_v51 = vld [vmem:[#allocation2 + $0x864] ss:$16 sps:$4 sm:$0xff]   ;;  %v8543_v28 = vld [vmem:[#allocation2 + $0x6c] ss:$16 sps:$4 sm:$0xff]  }
 0x408   :  { %4746 = vmatprep.subr.bf16.mxu1 %v8477_v50  ;;  %v8534_v50 = vld [vmem:[#allocation2 + $0x884] ss:$16 sps:$4 sm:$0xff]  }
 0x40a   :  { %4694 = vmatpush2.bf16.msra.mxu0 %v8472_v26  ;;  %v8537_v26 = vld [vmem:[#allocation2 + $0x8c] ss:$16 sps:$4 sm:$0xff]  }
 0x40b   :  { %4747 = vmatpush2.bf16.msra.mxu1 %v8475_v56  ;;  %4695 = vmatprep.subr.bf16.mxu0 %v8480_v30  ;;  %v10494_v56 = vcombine.high %v10374_v0, %v10343_v49  ;;  %v8538_v30 = vld [vmem:[#allocation2 + $0x860] ss:$16 sps:$4 sm:$0xff]  }
 0x40c   :  { %4748 = vmatprep.subr.bf16.mxu1 %v8483_v13  ;;  %v8541_v13 = vld [vmem:[#allocation2 + $0x68] ss:$16 sps:$4 sm:$0xff]  }
 0x40e   :  { %4696 = vmatpush2.bf16.msra.mxu0 %v8478_v58  ;;  %v8546_v58 = vld [vmem:[#allocation2 + $0x844] ss:$16 sps:$4 sm:$0xff]  }
 0x40f   :  { %4749 = vmatpush2.bf16.msra.mxu1 %v8481_v17  ;;  %4697 = vmatprep.subr.bf16.mxu0 %v8486_v15  ;;  %v8549_v17 = vld [vmem:[#allocation2 + $0x4c] ss:$16 sps:$4 sm:$0xff]   ;;  %v8544_v15 = vld [vmem:[#allocation2 + $0x840] ss:$16 sps:$4 sm:$0xff]  }
 0x410   :  { %4750 = vmatprep.subr.bf16.mxu1 %v8489_v3  ;;  %v8547_v3 = vld [vmem:[#allocation2 + $0x48] ss:$16 sps:$4 sm:$0xff]  }
 0x412   :  { %4698 = vmatpush2.bf16.msra.mxu0 %v8484_v21  ;;  %v8552_v21 = vld [vmem:[#allocation2 + $0x824] ss:$16 sps:$4 sm:$0xff]  }
 0x413   :  { %4751 = vmatpush2.bf16.msra.mxu1 %v8487_v48  ;;  %4699 = vmatprep.subr.bf16.mxu0 %v8492_v19  ;;  %v8555_v48 = vld [vmem:[#allocation2 + $0x2c] ss:$16 sps:$4 sm:$0xff]   ;;  %v8550_v19 = vld [vmem:[#allocation2 + $0x820] ss:$16 sps:$4 sm:$0xff]  }
 0x414   :  { %4752 = vmatprep.subr.bf16.mxu1 %v8495_v34  ;;  %v8553_v34 = vld [vmem:[#allocation2 + $0x28] ss:$16 sps:$4 sm:$0xff]  }
 0x416   :  { %4700 = vmatpush2.bf16.msra.mxu0 %v8490_v29  ;;  %v8561_v29 = vld [vmem:[#allocation2 + $0xc] ss:$16 sps:$4 sm:$0xff]  }
 0x417   :  { %4753 = vmatpush2.bf16.msra.mxu1 %v8493_v6  ;;  %4701 = vmatprep.subr.bf16.mxu0 %v8498_v33  ;;  %v8556_v6 = vld [vmem:[#allocation2 + $0x800] ss:$16 sps:$4 sm:$0xff]   ;;  %v8559_v33 = vld [vmem:[#allocation2 + $0x8] ss:$16 sps:$4 sm:$0xff]  }
 0x418   :  { %4754 = vmatprep.subr.bf16.mxu1 %v8501_v2  ;;  %v8564_v2 = vld [vmem:[#allocation2 + $0x9e4] ss:$16 sps:$4 sm:$0xff]  }
 0x41a   :  { %4702 = vmatpush2.bf16.msra.mxu0 %v8496_v4  ;;  %v8567_v4 = vld [vmem:[#allocation2 + $0x1ec] ss:$16 sps:$4 sm:$0xff]  }
 0x41b   :  { %4755 = vmatpush2.bf16.msra.mxu1 %v8499_v42  ;;  %4703 = vmatprep.subr.bf16.mxu0 %v8504_v11  ;;  %v8562_v42 = vld [vmem:[#allocation2 + $0x9e0] ss:$16 sps:$4 sm:$0xff]   ;;  %v8565_v11 = vld [vmem:[#allocation2 + $0x1e8] ss:$16 sps:$4 sm:$0xff]  }
 0x41c   :  { %4756 = vmatprep.subr.bf16.mxu1 %v8507_v12  ;;  %v8570_v12 = vld [vmem:[#allocation2 + $0x9c4] ss:$16 sps:$4 sm:$0xff]  }
 0x41e   :  { %4704 = vmatpush2.bf16.msra.mxu0 %v8502_v40  ;;  %v8573_v40 = vld [vmem:[#allocation2 + $0x1cc] ss:$16 sps:$4 sm:$0xff]  }
 0x41f   :  { %4757 = vmatpush2.bf16.msra.mxu1 %v8505_v57  ;;  %4705 = vmatprep.subr.bf16.mxu0 %v8510_v1  ;;  %v8568_v57 = vld [vmem:[#allocation2 + $0x9c0] ss:$16 sps:$4 sm:$0xff]   ;;  %v8571_v1 = vld [vmem:[#allocation2 + $0x1c8] ss:$16 sps:$4 sm:$0xff]  }
 0x420   :  { %4758 = vmatprep.subr.bf16.mxu1 %v8513_v38  ;;  %v8576_v38 = vld [vmem:[#allocation2 + $0x9a4] ss:$16 sps:$4 sm:$0xff]  }
 0x422   :  { %4706 = vmatpush2.bf16.msra.mxu0 %v8508_v14  ;;  %v8579_v14 = vld [vmem:[#allocation2 + $0x1ac] ss:$16 sps:$4 sm:$0xff]  }
 0x423   :  { %4759 = vmatpush2.bf16.msra.mxu1 %v8511_v53  ;;  %4781 = vmatprep.subr.bf16.mxu0 %v8516_v55  ;;  %v8574_v53 = vld [vmem:[#allocation2 + $0x9a0] ss:$16 sps:$4 sm:$0xff]   ;;  %v8577_v55 = vld [vmem:[#allocation2 + $0x1a8] ss:$16 sps:$4 sm:$0xff]  }
 0x424   :  { %4834 = vmatprep.subr.bf16.mxu1 %v8519_v22  ;;  %v8582_v22 = vld [vmem:[#allocation2 + $0x984] ss:$16 sps:$4 sm:$0xff]  }
 0x425   :  { %4708 = vmatmul.mubr.bf16.vlgmr.msra.gmra.mxu0 %v10466_v32 }
 0x426   :  { %4761 = vmatmul.mubr.bf16.vlgmr.msra.gmra.mxu1 %v10470_v35  ;;  %4782 = vmatpush1.bf16.msra.mxu0 %v8514_v18  ;;  %v8585_v18 = vld [vmem:[#allocation2 + $0x18c] ss:$16 sps:$4 sm:$0xff]  }
 0x427   :  { %4835 = vmatpush1.bf16.msra.mxu1 %v8517_v44  ;;  %4783 = vmatprep.subr.bf16.mxu0 %v8522_v59  ;;  %v8580_v44 = vld [vmem:[#allocation2 + $0x980] ss:$16 sps:$4 sm:$0xff]   ;;  %v8583_v59 = vld [vmem:[#allocation2 + $0x188] ss:$16 sps:$4 sm:$0xff]  }
 0x428   :  { %4836 = vmatprep.subr.bf16.mxu1 %v8525_v20  ;;  %4717 = vmatprep.mubr.bf16.mxu0 %v10474_v5  ;;  %v8588_v20 = vld [vmem:[#allocation2 + $0x964] ss:$16 sps:$4 sm:$0xff]  }
 0x429   :  { %4770 = vmatprep.mubr.bf16.mxu1 %v10478_v52 }
 0x42a   :  { %4784 = vmatpush1.bf16.msra.mxu0 %v8520_v10  ;;  %v8591_v10 = vld [vmem:[#allocation2 + $0x16c] ss:$16 sps:$4 sm:$0xff]  }
 0x42b   :  { %4837 = vmatpush1.bf16.msra.mxu1 %v8523_v63  ;;  %4785 = vmatprep.subr.bf16.mxu0 %v8528_v62  ;;  %v8586_v63 = vld [vmem:[#allocation2 + $0x960] ss:$16 sps:$4 sm:$0xff]   ;;  %v8589_v62 = vld [vmem:[#allocation2 + $0x168] ss:$16 sps:$4 sm:$0xff]  }
 0x42c   :  { %4838 = vmatprep.subr.bf16.mxu1 %v8531_v41  ;;  %v8594_v41 = vld [vmem:[#allocation2 + $0x944] ss:$16 sps:$4 sm:$0xff]  }
 0x42d   :  { %4718 = vmatmul.mubr.bf16.gmra.mxu0 %v10486_v31 }
 0x42e   :  { %4771 = vmatmul.mubr.bf16.gmra.mxu1 %v10490_v37  ;;  %4786 = vmatpush1.bf16.msra.mxu0 %v8526_v47  ;;  %v8597_v47 = vld [vmem:[#allocation2 + $0x14c] ss:$16 sps:$4 sm:$0xff]  }
 0x42f   :  { %4839 = vmatpush1.bf16.msra.mxu1 %v8529_v16  ;;  %4787 = vmatprep.subr.bf16.mxu0 %v8534_v50  ;;  %v8592_v16 = vld [vmem:[#allocation2 + $0x940] ss:$16 sps:$4 sm:$0xff]   ;;  %v8595_v50 = vld [vmem:[#allocation2 + $0x148] ss:$16 sps:$4 sm:$0xff]  }
 0x430   :  { %4840 = vmatprep.subr.bf16.mxu1 %v8537_v26  ;;  %4813 = vmatprep.mubr.bf16.mxu0 %v10494_v56  ;;  %v8600_v26 = vld [vmem:[#allocation2 + $0x924] ss:$16 sps:$4 sm:$0xff]  }
 0x431   :  { %4866 = vmatprep.mubr.bf16.mxu1 %v10416_v24  ;;  %v8558_v24 = vld [vmem:[#allocation2 + $0x804] ss:$16 sps:$4 sm:$0xff]  }
 0x432   :  { %4788 = vmatpush1.bf16.msra.mxu0 %v8532_v25  ;;  %v8603_v25 = vld [vmem:[#allocation2 + $0x12c] ss:$16 sps:$4 sm:$0xff]  }
 0x433   :  { %4841 = vmatpush1.bf16.msra.mxu1 %v8535_v39  ;;  %4789 = vmatprep.subr.bf16.mxu0 %v8540_v51  ;;  %v8598_v39 = vld [vmem:[#allocation2 + $0x920] ss:$16 sps:$4 sm:$0xff]   ;;  %v8601_v51 = vld [vmem:[#allocation2 + $0x128] ss:$16 sps:$4 sm:$0xff]  }
 0x434   :  { %4842 = vmatprep.subr.bf16.mxu1 %v8543_v28  ;;  %v8606_v28 = vld [vmem:[#allocation2 + $0x904] ss:$16 sps:$4 sm:$0xff]  }
 0x436   :  { %4790 = vmatpush1.bf16.msra.mxu0 %v8538_v30  ;;  %v8609_v30 = vld [vmem:[#allocation2 + $0x10c] ss:$16 sps:$4 sm:$0xff]  }
 0x437   :  { %4843 = vmatpush1.bf16.msra.mxu1 %v8541_v13  ;;  %4791 = vmatprep.subr.bf16.mxu0 %v8546_v58  ;;  %v8604_v13 = vld [vmem:[#allocation2 + $0x900] ss:$16 sps:$4 sm:$0xff]   ;;  %v8607_v58 = vld [vmem:[#allocation2 + $0x108] ss:$16 sps:$4 sm:$0xff]  }
 0x438   :  { %4844 = vmatprep.subr.bf16.mxu1 %v8549_v17  ;;  %v8612_v17 = vld [vmem:[#allocation2 + $0x2ec] ss:$16 sps:$4 sm:$0xff]  }
 0x43a   :  { %4792 = vmatpush1.bf16.msra.mxu0 %v8544_v15  ;;  %v8615_v15 = vld [vmem:[#allocation2 + $0x4ec] ss:$16 sps:$4 sm:$0xff]  }
 0x43b   :  { %4845 = vmatpush1.bf16.msra.mxu1 %v8547_v3  ;;  %4793 = vmatprep.subr.bf16.mxu0 %v8552_v21  ;;  %v10502_v3 = vcombine.low %v10374_v0, %v10343_v49  ;;  %v8610_v21 = vld [vmem:[#allocation2 + $0x2e8] ss:$16 sps:$4 sm:$0xff]   ;;  %v8624_v49 = vld [vmem:[#allocation2 + $0x2ac] ss:$16 sps:$4 sm:$0xff]  }
 0x43c   :  { %4846 = vmatprep.subr.bf16.mxu1 %v8555_v48  ;;  %v8613_v48 = vld [vmem:[#allocation2 + $0x4e8] ss:$16 sps:$4 sm:$0xff]   ;;  %v8627_v0 = vld [vmem:[#allocation2 + $0x4ac] ss:$16 sps:$4 sm:$0xff]  }
 0x43e   :  { %4794 = vmatpush1.bf16.msra.mxu0 %v8550_v19  ;;  %v8618_v19 = vld [vmem:[#allocation2 + $0x2cc] ss:$16 sps:$4 sm:$0xff]  }
 0x43f   :  { %4847 = vmatpush1.bf16.msra.mxu1 %v8553_v34  ;;  %4795 = vmatprep.subr.bf16.mxu0 %v8558_v24  ;;  %v8621_v34 = vld [vmem:[#allocation2 + $0x4cc] ss:$16 sps:$4 sm:$0xff]   ;;  %v10506_v24 = vcombine.high %v10399_v23, %v10404_v54 }
 0x440   :  { %4848 = vmatprep.subr.bf16.mxu1 %v8561_v29  ;;  %v8616_v29 = vld [vmem:[#allocation2 + $0x2c8] ss:$16 sps:$4 sm:$0xff]  }
 0x442   :  { %4796 = vmatpush1.bf16.msra.mxu0 %v8556_v6  ;;  %v8619_v6 = vld [vmem:[#allocation2 + $0x4c8] ss:$16 sps:$4 sm:$0xff]  }
 0x443   :  { %4849 = vmatpush1.bf16.msra.mxu1 %v8559_v33  ;;  %4797 = vmatprep.subr.bf16.mxu0 %v8564_v2  ;;  %v10514_v33 = vcombine.low %v10399_v23, %v10404_v54  ;;  %v8622_v2 = vld [vmem:[#allocation2 + $0x2a8] ss:$16 sps:$4 sm:$0xff]   ;;  %v8639_v23 = vld [vmem:[#allocation2 + $0x46c] ss:$16 sps:$4 sm:$0xff]  }
 0x444   :  { %4850 = vmatprep.subr.bf16.mxu1 %v8567_v4  ;;  %v8625_v4 = vld [vmem:[#allocation2 + $0x4a8] ss:$16 sps:$4 sm:$0xff]  }
 0x445   :  { %v8634_v54 = vld [vmem:[#allocation2 + $0x268] ss:$16 sps:$4 sm:$0xff]  }
 0x446   :  { %4798 = vmatpush2.bf16.msra.mxu0 %v8562_v42  ;;  %v8633_v42 = vld [vmem:[#allocation2 + $0x48c] ss:$16 sps:$4 sm:$0xff]  }
 0x447   :  { %4851 = vmatpush2.bf16.msra.mxu1 %v8565_v11  ;;  %4799 = vmatprep.subr.bf16.mxu0 %v8570_v12  ;;  %v8628_v11 = vld [vmem:[#allocation2 + $0x288] ss:$16 sps:$4 sm:$0xff]  }
 0x448   :  { %4852 = vmatprep.subr.bf16.mxu1 %v8573_v40  ;;  %v8631_v12 = vld [vmem:[#allocation2 + $0x488] ss:$16 sps:$4 sm:$0xff]  }
 0x449   :  { %v8637_v40 = vld [vmem:[#allocation2 + $0x468] ss:$16 sps:$4 sm:$0xff]  }
 0x44a   :  { %4800 = vmatpush2.bf16.msra.mxu0 %v8568_v57  ;;  %v8642_v57 = vld [vmem:[#allocation2 + $0x24c] ss:$16 sps:$4 sm:$0xff]  }
 0x44b   :  { %4853 = vmatpush2.bf16.msra.mxu1 %v8571_v1  ;;  %4801 = vmatprep.subr.bf16.mxu0 %v8576_v38  ;;  %v8645_v1 = vld [vmem:[#allocation2 + $0x44c] ss:$16 sps:$4 sm:$0xff]   ;;  %v8640_v38 = vld [vmem:[#allocation2 + $0x248] ss:$16 sps:$4 sm:$0xff]  }
 0x44c   :  { %4854 = vmatprep.subr.bf16.mxu1 %v8579_v14  ;;  %v8648_v14 = vld [vmem:[#allocation2 + $0x22c] ss:$16 sps:$4 sm:$0xff]  }
 0x44e   :  { %4802 = vmatpush2.bf16.msra.mxu0 %v8574_v53  ;;  %v8651_v53 = vld [vmem:[#allocation2 + $0x42c] ss:$16 sps:$4 sm:$0xff]  }
 0x44f   :  { %4855 = vmatpush2.bf16.msra.mxu1 %v8577_v55  ;;  %4803 = vmatprep.subr.bf16.mxu0 %v8582_v22  ;;  %v8654_v55 = vld [vmem:[#allocation2 + $0x20c] ss:$16 sps:$4 sm:$0xff]  }
 0x450   :  { %4856 = vmatprep.subr.bf16.mxu1 %v8585_v18  ;;  %v8657_v22 = vld [vmem:[#allocation2 + $0x40c] ss:$16 sps:$4 sm:$0xff]   ;;  %v8652_v18 = vld [vmem:[#allocation2 + $0x208] ss:$16 sps:$4 sm:$0xff]  }
 0x452   :  { %4804 = vmatpush2.bf16.msra.mxu0 %v8580_v44  ;;  %v8655_v44 = vld [vmem:[#allocation2 + $0x408] ss:$16 sps:$4 sm:$0xff]  }
 0x453   :  { %4857 = vmatpush2.bf16.msra.mxu1 %v8583_v59  ;;  %4805 = vmatprep.subr.bf16.mxu0 %v8588_v20  ;;  %v8660_v59 = vld [vmem:[#allocation2 + $0x3ec] ss:$16 sps:$4 sm:$0xff]  }
 0x454   :  { %4858 = vmatprep.subr.bf16.mxu1 %v8591_v10  ;;  %v8663_v20 = vld [vmem:[#allocation2 + $0x5ec] ss:$16 sps:$4 sm:$0xff]   ;;  %v8658_v10 = vld [vmem:[#allocation2 + $0x3e8] ss:$16 sps:$4 sm:$0xff]  }
 0x456   :  { %4806 = vmatpush2.bf16.msra.mxu0 %v8586_v63  ;;  %v8661_v63 = vld [vmem:[#allocation2 + $0x5e8] ss:$16 sps:$4 sm:$0xff]  }
 0x457   :  { %4859 = vmatpush2.bf16.msra.mxu1 %v8589_v62  ;;  %4807 = vmatprep.subr.bf16.mxu0 %v8594_v41  ;;  %v8666_v62 = vld [vmem:[#allocation2 + $0x3cc] ss:$16 sps:$4 sm:$0xff]  }
 0x458   :  { %4860 = vmatprep.subr.bf16.mxu1 %v8597_v47  ;;  %v8669_v41 = vld [vmem:[#allocation2 + $0x5cc] ss:$16 sps:$4 sm:$0xff]   ;;  %v8664_v47 = vld [vmem:[#allocation2 + $0x3c8] ss:$16 sps:$4 sm:$0xff]  }
 0x45a   :  { %4808 = vmatpush2.bf16.msra.mxu0 %v8592_v16  ;;  %v8667_v16 = vld [vmem:[#allocation2 + $0x5c8] ss:$16 sps:$4 sm:$0xff]  }
 0x45b   :  { %4861 = vmatpush2.bf16.msra.mxu1 %v8595_v50  ;;  %4809 = vmatprep.subr.bf16.mxu0 %v8600_v26  ;;  %v8672_v50 = vld [vmem:[#allocation2 + $0x3ac] ss:$16 sps:$4 sm:$0xff]  }
 0x45c   :  { %4862 = vmatprep.subr.bf16.mxu1 %v8603_v25  ;;  %v8675_v26 = vld [vmem:[#allocation2 + $0x5ac] ss:$16 sps:$4 sm:$0xff]   ;;  %v8670_v25 = vld [vmem:[#allocation2 + $0x3a8] ss:$16 sps:$4 sm:$0xff]  }
 0x45e   :  { %4810 = vmatpush2.bf16.msra.mxu0 %v8598_v39  ;;  %v8673_v39 = vld [vmem:[#allocation2 + $0x5a8] ss:$16 sps:$4 sm:$0xff]  }
 0x45f   :  { %4863 = vmatpush2.bf16.msra.mxu1 %v8601_v51  ;;  %4811 = vmatprep.subr.bf16.mxu0 %v8606_v28  ;;  %v8678_v51 = vld [vmem:[#allocation2 + $0x38c] ss:$16 sps:$4 sm:$0xff]  }
 0x460   :  { %4864 = vmatprep.subr.bf16.mxu1 %v8609_v30  ;;  %v8681_v28 = vld [vmem:[#allocation2 + $0x58c] ss:$16 sps:$4 sm:$0xff]   ;;  %v8676_v30 = vld [vmem:[#allocation2 + $0x388] ss:$16 sps:$4 sm:$0xff]  }
 0x462   :  { %4812 = vmatpush2.bf16.msra.mxu0 %v8604_v13  ;;  %v8679_v13 = vld [vmem:[#allocation2 + $0x588] ss:$16 sps:$4 sm:$0xff]  }
 0x463   :  { %4865 = vmatpush2.bf16.msra.mxu1 %v8607_v58  ;;  %4887 = vmatprep.subr.bf16.mxu0 %v8612_v17  ;;  %v8684_v58 = vld [vmem:[#allocation2 + $0x36c] ss:$16 sps:$4 sm:$0xff]  }
 0x464   :  { %4940 = vmatprep.subr.bf16.mxu1 %v8615_v15  ;;  %v8687_v17 = vld [vmem:[#allocation2 + $0x56c] ss:$16 sps:$4 sm:$0xff]   ;;  %v8682_v15 = vld [vmem:[#allocation2 + $0x368] ss:$16 sps:$4 sm:$0xff]  }
 0x465   :  { %4814 = vmatmul.mubr.bf16.vlgmr.msra.gmra.mxu0 %v10502_v3 }
 0x466   :  { %4867 = vmatmul.mubr.bf16.vlgmr.msra.gmra.mxu1 %v10426_v60  ;;  %4888 = vmatpush1.bf16.msra.mxu0 %v8610_v21  ;;  %v8630_v60 = vld [vmem:[#allocation2 + $0x28c] ss:$16 sps:$4 sm:$0xff]   ;;  %v8685_v21 = vld [vmem:[#allocation2 + $0x568] ss:$16 sps:$4 sm:$0xff]  }
 0x467   :  { %4941 = vmatpush1.bf16.msra.mxu1 %v8613_v48  ;;  %4889 = vmatprep.subr.bf16.mxu0 %v8618_v19  ;;  %v8690_v48 = vld [vmem:[#allocation2 + $0x34c] ss:$16 sps:$4 sm:$0xff]  }
 0x468   :  { %4942 = vmatprep.subr.bf16.mxu1 %v8621_v34  ;;  %4823 = vmatprep.mubr.bf16.mxu0 %v10506_v24  ;;  %v8693_v19 = vld [vmem:[#allocation2 + $0x54c] ss:$16 sps:$4 sm:$0xff]   ;;  %v8688_v34 = vld [vmem:[#allocation2 + $0x348] ss:$16 sps:$4 sm:$0xff]  }
 0x469   :  { %4876 = vmatprep.mubr.bf16.mxu1 %v10434_v43  ;;  %v8636_v43 = vld [vmem:[#allocation2 + $0x26c] ss:$16 sps:$4 sm:$0xff]  }
 0x46a   :  { %4890 = vmatpush1.bf16.msra.mxu0 %v8616_v29  ;;  %v8691_v29 = vld [vmem:[#allocation2 + $0x548] ss:$16 sps:$4 sm:$0xff]  }
 0x46b   :  { %4943 = vmatpush1.bf16.msra.mxu1 %v8619_v6  ;;  %4891 = vmatprep.subr.bf16.mxu0 %v8624_v49  ;;  %v8696_v6 = vld [vmem:[#allocation2 + $0x32c] ss:$16 sps:$4 sm:$0xff]  }
 0x46c   :  { %4944 = vmatprep.subr.bf16.mxu1 %v8627_v0  ;;  %v8699_v49 = vld [vmem:[#allocation2 + $0x52c] ss:$16 sps:$4 sm:$0xff]   ;;  %v8694_v0 = vld [vmem:[#allocation2 + $0x328] ss:$16 sps:$4 sm:$0xff]  }
 0x46d   :  { %4824 = vmatmul.mubr.bf16.gmra.mxu0 %v10514_v33 }
 0x46e   :  { %4877 = vmatmul.mubr.bf16.gmra.mxu1 %v10446_v46  ;;  %4892 = vmatpush1.bf16.msra.mxu0 %v8622_v2  ;;  %v8643_v46 = vld [vmem:[#allocation2 + $0x448] ss:$16 sps:$4 sm:$0xff]  }
 0x46f   :  { %4945 = vmatpush1.bf16.msra.mxu1 %v8625_v4  ;;  %4893 = vmatprep.subr.bf16.mxu0 %v8630_v60  ;;  %v8697_v2 = vld [vmem:[#allocation2 + $0x528] ss:$16 sps:$4 sm:$0xff]   ;;  %v8702_v4 = vld [vmem:[#allocation2 + $0x30c] ss:$16 sps:$4 sm:$0xff]  }
 0x470   :  { %4946 = vmatprep.subr.bf16.mxu1 %v8633_v42  ;;  %4919 = vmatprep.mubr.bf16.mxu0 %v10420_v8  ;;  %v8646_v8 = vld [vmem:[#allocation2 + $0x228] ss:$16 sps:$4 sm:$0xff]   ;;  %v8705_v60 = vld [vmem:[#allocation2 + $0x50c] ss:$16 sps:$4 sm:$0xff]  }
 0x471   :  { %4972 = vmatprep.mubr.bf16.mxu1 %v10454_v45  ;;  %v8649_v45 = vld [vmem:[#allocation2 + $0x428] ss:$16 sps:$4 sm:$0xff]  }
 0x472   :  { %4894 = vmatpush1.bf16.msra.mxu0 %v8628_v11  ;;  %v8700_v42 = vld [vmem:[#allocation2 + $0x308] ss:$16 sps:$4 sm:$0xff]  }
 0x473   :  { %4947 = vmatpush1.bf16.msra.mxu1 %v8631_v12  ;;  %4895 = vmatprep.subr.bf16.mxu0 %v8636_v43  ;;  %v8703_v11 = vld [vmem:[#allocation2 + $0x508] ss:$16 sps:$4 sm:$0xff]   ;;  %v8708_v12 = vld [vmem:[#allocation2 + $0x6ec] ss:$16 sps:$4 sm:$0xff]  }
 0x474   :  { %4948 = vmatprep.subr.bf16.mxu1 %v8639_v23  ;;  %v8711_v43 = vld [vmem:[#allocation2 + $0x8ec] ss:$16 sps:$4 sm:$0xff]   ;;  %v8706_v23 = vld [vmem:[#allocation2 + $0x6e8] ss:$16 sps:$4 sm:$0xff]  }
 0x476   :  { %4896 = vmatpush1.bf16.msra.mxu0 %v8634_v54  ;;  %v8709_v54 = vld [vmem:[#allocation2 + $0x8e8] ss:$16 sps:$4 sm:$0xff]  }
 0x477   :  { %4949 = vmatpush1.bf16.msra.mxu1 %v8637_v40  ;;  %4897 = vmatprep.subr.bf16.mxu0 %v8642_v57  ;;  %v8714_v40 = vld [vmem:[#allocation2 + $0x6cc] ss:$16 sps:$4 sm:$0xff]  }
 0x478   :  { %4950 = vmatprep.subr.bf16.mxu1 %v8645_v1  ;;  %v8717_v57 = vld [vmem:[#allocation2 + $0x8cc] ss:$16 sps:$4 sm:$0xff]   ;;  %v8712_v1 = vld [vmem:[#allocation2 + $0x6c8] ss:$16 sps:$4 sm:$0xff]  }
 0x47a   :  { %4898 = vmatpush1.bf16.msra.mxu0 %v8640_v38  ;;  %v8715_v38 = vld [vmem:[#allocation2 + $0x8c8] ss:$16 sps:$4 sm:$0xff]  }
 0x47b   :  { %4951 = vmatpush1.bf16.msra.mxu1 %v8643_v46  ;;  %4899 = vmatprep.subr.bf16.mxu0 %v8648_v14  ;;  %v8720_v46 = vld [vmem:[#allocation2 + $0x6ac] ss:$16 sps:$4 sm:$0xff]  }
 0x47c   :  { %4952 = vmatprep.subr.bf16.mxu1 %v8651_v53  ;;  %v8723_v14 = vld [vmem:[#allocation2 + $0x8ac] ss:$16 sps:$4 sm:$0xff]   ;;  %v8718_v53 = vld [vmem:[#allocation2 + $0x6a8] ss:$16 sps:$4 sm:$0xff]  }
 0x47e   :  { %4900 = vmatpush1.bf16.msra.mxu0 %v8646_v8  ;;  %v8721_v8 = vld [vmem:[#allocation2 + $0x8a8] ss:$16 sps:$4 sm:$0xff]  }
 0x47f   :  { %4953 = vmatpush1.bf16.msra.mxu1 %v8649_v45  ;;  %4901 = vmatprep.subr.bf16.mxu0 %v8654_v55  ;;  %v8724_v45 = vld [vmem:[#allocation2 + $0x688] ss:$16 sps:$4 sm:$0xff]  }
 0x480   :  { %4954 = vmatprep.subr.bf16.mxu1 %v8657_v22  ;;  %v8727_v55 = vld [vmem:[#allocation2 + $0x888] ss:$16 sps:$4 sm:$0xff]  }
 0x481   :  { %v8730_v22 = vld [vmem:[#allocation2 + $0x668] ss:$16 sps:$4 sm:$0xff]  }
 0x482   :  { %4902 = vmatpush1.bf16.msra.mxu0 %v8652_v18  ;;  %v8733_v18 = vld [vmem:[#allocation2 + $0x868] ss:$16 sps:$4 sm:$0xff]  }
 0x483   :  { %4955 = vmatpush1.bf16.msra.mxu1 %v8655_v44  ;;  %4903 = vmatprep.subr.bf16.mxu0 %v8660_v59  ;;  %v8736_v44 = vld [vmem:[#allocation2 + $0x648] ss:$16 sps:$4 sm:$0xff]  }
 0x484   :  { %4956 = vmatprep.subr.bf16.mxu1 %v8663_v20  ;;  %v8739_v59 = vld [vmem:[#allocation2 + $0x848] ss:$16 sps:$4 sm:$0xff]   ;;  %v8744_v20 = vld [vmem:[#allocation2 + $0x62c] ss:$16 sps:$4 sm:$0xff]  }
 0x486   :  { %4904 = vmatpush2.bf16.msra.mxu0 %v8658_v10  ;;  %v8747_v10 = vld [vmem:[#allocation2 + $0x82c] ss:$16 sps:$4 sm:$0xff]  }
 0x487   :  { %4957 = vmatpush2.bf16.msra.mxu1 %v8661_v63  ;;  %4905 = vmatprep.subr.bf16.mxu0 %v8666_v62  ;;  %v8750_v63 = vld [vmem:[#allocation2 + $0x60c] ss:$16 sps:$4 sm:$0xff]  }
 0x488   :  { %4958 = vmatprep.subr.bf16.mxu1 %v8669_v41  ;;  %v8753_v62 = vld [vmem:[#allocation2 + $0x80c] ss:$16 sps:$4 sm:$0xff]   ;;  %v8748_v41 = vld [vmem:[#allocation2 + $0x608] ss:$16 sps:$4 sm:$0xff]  }
 0x48a   :  { %4906 = vmatpush2.bf16.msra.mxu0 %v8664_v47  ;;  %v8751_v47 = vld [vmem:[#allocation2 + $0x808] ss:$16 sps:$4 sm:$0xff]  }
 0x48b   :  { %4959 = vmatpush2.bf16.msra.mxu1 %v8667_v16  ;;  %4907 = vmatprep.subr.bf16.mxu0 %v8672_v50  ;;  %v8756_v16 = vld [vmem:[#allocation2 + $0x7ec] ss:$16 sps:$4 sm:$0xff]  }
 0x48c   :  { %4960 = vmatprep.subr.bf16.mxu1 %v8675_v26  ;;  %v8759_v50 = vld [vmem:[#allocation2 + $0x9ec] ss:$16 sps:$4 sm:$0xff]   ;;  %v8754_v26 = vld [vmem:[#allocation2 + $0x7e8] ss:$16 sps:$4 sm:$0xff]  }
 0x48e   :  { %4908 = vmatpush2.bf16.msra.mxu0 %v8670_v25  ;;  %v8757_v25 = vld [vmem:[#allocation2 + $0x9e8] ss:$16 sps:$4 sm:$0xff]  }
 0x48f   :  { %4961 = vmatpush2.bf16.msra.mxu1 %v8673_v39  ;;  %4909 = vmatprep.subr.bf16.mxu0 %v8678_v51  ;;  %v8762_v39 = vld [vmem:[#allocation2 + $0x7cc] ss:$16 sps:$4 sm:$0xff]  }
 0x490   :  { %4962 = vmatprep.subr.bf16.mxu1 %v8681_v28  ;;  %v8765_v51 = vld [vmem:[#allocation2 + $0x9cc] ss:$16 sps:$4 sm:$0xff]   ;;  %v8760_v28 = vld [vmem:[#allocation2 + $0x7c8] ss:$16 sps:$4 sm:$0xff]  }
 0x492   :  { %4910 = vmatpush2.bf16.msra.mxu0 %v8676_v30  ;;  %v8763_v30 = vld [vmem:[#allocation2 + $0x9c8] ss:$16 sps:$4 sm:$0xff]  }
 0x493   :  { %4963 = vmatpush2.bf16.msra.mxu1 %v8679_v13  ;;  %4911 = vmatprep.subr.bf16.mxu0 %v8684_v58  ;;  %v8768_v13 = vld [vmem:[#allocation2 + $0x7ac] ss:$16 sps:$4 sm:$0xff]  }
 0x494   :  { %4964 = vmatprep.subr.bf16.mxu1 %v8687_v17  ;;  %v8771_v58 = vld [vmem:[#allocation2 + $0x9ac] ss:$16 sps:$4 sm:$0xff]   ;;  %v8766_v17 = vld [vmem:[#allocation2 + $0x7a8] ss:$16 sps:$4 sm:$0xff]  }
 0x496   :  { %4912 = vmatpush2.bf16.msra.mxu0 %v8682_v15  ;;  %v8769_v15 = vld [vmem:[#allocation2 + $0x9a8] ss:$16 sps:$4 sm:$0xff]  }
 0x497   :  { %4965 = vmatpush2.bf16.msra.mxu1 %v8685_v21  ;;  %4913 = vmatprep.subr.bf16.mxu0 %v8690_v48  ;;  %v8774_v21 = vld [vmem:[#allocation2 + $0x78c] ss:$16 sps:$4 sm:$0xff]  }
 0x498   :  { %4966 = vmatprep.subr.bf16.mxu1 %v8693_v19  ;;  %v8777_v48 = vld [vmem:[#allocation2 + $0x98c] ss:$16 sps:$4 sm:$0xff]   ;;  %v8772_v19 = vld [vmem:[#allocation2 + $0x788] ss:$16 sps:$4 sm:$0xff]  }
 0x49a   :  { %4914 = vmatpush2.bf16.msra.mxu0 %v8688_v34  ;;  %v8775_v34 = vld [vmem:[#allocation2 + $0x988] ss:$16 sps:$4 sm:$0xff]  }
 0x49b   :  { %4967 = vmatpush2.bf16.msra.mxu1 %v8691_v29  ;;  %4915 = vmatprep.subr.bf16.mxu0 %v8696_v6  ;;  %v8780_v29 = vld [vmem:[#allocation2 + $0x76c] ss:$16 sps:$4 sm:$0xff]  }
 0x49c   :  { %4968 = vmatprep.subr.bf16.mxu1 %v8699_v49  ;;  %v8783_v6 = vld [vmem:[#allocation2 + $0x96c] ss:$16 sps:$4 sm:$0xff]   ;;  %v8778_v49 = vld [vmem:[#allocation2 + $0x768] ss:$16 sps:$4 sm:$0xff]  }
 0x49e   :  { %4916 = vmatpush2.bf16.msra.mxu0 %v8694_v0  ;;  %v8781_v0 = vld [vmem:[#allocation2 + $0x968] ss:$16 sps:$4 sm:$0xff]  }
 0x49f   :  { %4969 = vmatpush2.bf16.msra.mxu1 %v8697_v2  ;;  %4917 = vmatprep.subr.bf16.mxu0 %v8702_v4  ;;  %v8786_v2 = vld [vmem:[#allocation2 + $0x74c] ss:$16 sps:$4 sm:$0xff]  }
 0x4a0   :  { %4970 = vmatprep.subr.bf16.mxu1 %v8705_v60  ;;  %v8789_v4 = vld [vmem:[#allocation2 + $0x94c] ss:$16 sps:$4 sm:$0xff]   ;;  %v8784_v60 = vld [vmem:[#allocation2 + $0x748] ss:$16 sps:$4 sm:$0xff]  }
 0x4a2   :  { %4918 = vmatpush2.bf16.msra.mxu0 %v8700_v42  ;;  %v8787_v42 = vld [vmem:[#allocation2 + $0x948] ss:$16 sps:$4 sm:$0xff]  }
 0x4a3   :  { %4971 = vmatpush2.bf16.msra.mxu1 %v8703_v11  ;;  %4993 = vmatprep.subr.bf16.mxu0 %v8708_v12  ;;  %v8792_v11 = vld [vmem:[#allocation2 + $0x72c] ss:$16 sps:$4 sm:$0xff]  }
 0x4a4   :  { %5046 = vmatprep.subr.bf16.mxu1 %v8711_v43  ;;  %v8795_v12 = vld [vmem:[#allocation2 + $0x92c] ss:$16 sps:$4 sm:$0xff]   ;;  %v8790_v43 = vld [vmem:[#allocation2 + $0x728] ss:$16 sps:$4 sm:$0xff]  }
 0x4a5   :  { %4920 = vmatmul.mubr.bf16.vlgmr.msra.gmra.mxu0 %v10430_v36  ;;  %v8726_v36 = vld [vmem:[#allocation2 + $0x68c] ss:$16 sps:$4 sm:$0xff]  }
 0x4a6   :  { %4973 = vmatmul.mubr.bf16.vlgmr.msra.gmra.mxu1 %v10466_v32  ;;  %4994 = vmatpush1.bf16.msra.mxu0 %v8706_v23  ;;  %v8729_v32 = vld [vmem:[#allocation2 + $0x88c] ss:$16 sps:$4 sm:$0xff]   ;;  %v8793_v23 = vld [vmem:[#allocation2 + $0x928] ss:$16 sps:$4 sm:$0xff]  }
 0x4a7   :  { %5047 = vmatpush1.bf16.msra.mxu1 %v8709_v54  ;;  %4995 = vmatprep.subr.bf16.mxu0 %v8714_v40  ;;  %v8798_v54 = vld [vmem:[#allocation2 + $0x70c] ss:$16 sps:$4 sm:$0xff]  }
 0x4a8   :  { %5048 = vmatprep.subr.bf16.mxu1 %v8717_v57  ;;  %4929 = vmatprep.mubr.bf16.mxu0 %v10438_v61  ;;  %v8732_v61 = vld [vmem:[#allocation2 + $0x66c] ss:$16 sps:$4 sm:$0xff]   ;;  %v8796_v57 = vld [vmem:[#allocation2 + $0x708] ss:$16 sps:$4 sm:$0xff]  }
 0x4a9   :  { %4982 = vmatprep.mubr.bf16.mxu1 %v10474_v5  ;;  %v8735_v5 = vld [vmem:[#allocation2 + $0x86c] ss:$16 sps:$4 sm:$0xff]  }
 0x4aa   :  { %4996 = vmatpush1.bf16.msra.mxu0 %v8712_v1  ;;  %v8801_v40 = vld [vmem:[#allocation2 + $0x90c] ss:$16 sps:$4 sm:$0xff]   ;;  %v8799_v1 = vld [vmem:[#allocation2 + $0x908] ss:$16 sps:$4 sm:$0xff]  }
 0x4ab   :  { %5049 = vmatpush1.bf16.msra.mxu1 %v8715_v38  ;;  %4997 = vmatprep.subr.bf16.mxu0 %v8720_v46  ;;  %v4603_v38 = vpop.f32.mrf.mxu0 }
 0x4ac   :  { %5050 = vmatprep.subr.bf16.mxu1 %v8723_v14 }
 0x4ad   :  { %4930 = vmatmul.mubr.bf16.gmra.mxu0 %v10450_v9  ;;  %v8738_v9 = vld [vmem:[#allocation2 + $0x64c] ss:$16 sps:$4 sm:$0xff]   ;;  %v4605_v46 = vpop.f32.mrf.mxu0 }
 0x4ae   :  { %4983 = vmatmul.mubr.bf16.gmra.mxu1 %v10486_v31  ;;  %4998 = vmatpush1.bf16.msra.mxu0 %v8718_v53  ;;  %v8741_v31 = vld [vmem:[#allocation2 + $0x84c] ss:$16 sps:$4 sm:$0xff]  }
 0x4af   :  { %5051 = vmatpush1.bf16.msra.mxu1 %v8721_v8  ;;  %4999 = vmatprep.subr.bf16.mxu0 %v8726_v36  ;;  %v4607_v14 = vpop.f32.mrf.mxu0  ;;  %v4656_v8 = vpop.f32.mrf.mxu1 }
 0x4b0   :  { %5052 = vmatprep.subr.bf16.mxu1 %v8729_v32  ;;  %5025 = vmatprep.mubr.bf16.mxu0 %v10458_v27  ;;  %v8742_v27 = vld [vmem:[#allocation2 + $0x628] ss:$16 sps:$4 sm:$0xff]  }
 0x4b1   :  { %5078 = vmatprep.mubr.bf16.mxu1 %v10494_v56  ;;  %v8745_v56 = vld [vmem:[#allocation2 + $0x828] ss:$16 sps:$4 sm:$0xff]   ;;  %v4609_v53 = vpop.f32.mrf.mxu0  ;;  %v4658_v32 = vpop.f32.mrf.mxu1 }
 0x4b2   :  { %5000 = vmatpush1.bf16.msra.mxu0 %v8724_v45 }
 0x4b3   :  { %5053 = vmatpush1.bf16.msra.mxu1 %v8727_v55  ;;  %5001 = vmatprep.subr.bf16.mxu0 %v8732_v61  ;;  %v4613_v36 = vpop.f32.mrf.mxu0  ;;  %v4660_v55 = vpop.f32.mrf.mxu1 }
 0x4b4   :  { %5054 = vmatprep.subr.bf16.mxu1 %v8735_v5 }
 0x4b5   :  { %v4615_v45 = vpop.f32.mrf.mxu0  ;;  %v4662_v61 = vpop.f32.mrf.mxu1 }
 0x4b6   :  { %5002 = vmatpush1.bf16.msra.mxu0 %v8730_v22 }
 0x4b7   :  { %5055 = vmatpush1.bf16.msra.mxu1 %v8733_v18  ;;  %5003 = vmatprep.subr.bf16.mxu0 %v8738_v9  ;;  %v4666_v5 = vpop.f32.mrf.mxu1 }
 0x4b8   :  { %5056 = vmatprep.subr.bf16.mxu1 %v8741_v31 }
 0x4b9   :  { %v4668_v22 = vpop.f32.mrf.mxu1 }
 0x4ba   :  { %5004 = vmatpush1.bf16.msra.mxu0 %v8736_v44 }
 0x4bb   :  { %5057 = vmatpush1.bf16.msra.mxu1 %v8739_v59  ;;  %5005 = vmatprep.subr.bf16.mxu0 %v8744_v20  ;;  %v4670_v18 = vpop.f32.mrf.mxu1 }
 0x4bc   :  { %5058 = vmatprep.subr.bf16.mxu1 %v8747_v10 }
 0x4be   :  { %5006 = vmatpush1.bf16.msra.mxu0 %v8742_v27 }
 0x4bf   :  { %5059 = vmatpush1.bf16.msra.mxu1 %v8745_v56  ;;  %5007 = vmatprep.subr.bf16.mxu0 %v8750_v63  ;;  %v4661_v63 = vadd.f32 %v4660_v55, %v4607_v14 }
 0x4c0   :  { %5060 = vmatprep.subr.bf16.mxu1 %v8753_v62 }
 0x4c2   :  { %5008 = vmatpush1.bf16.msra.mxu0 %v8748_v41  ;;  %v4657_v41 = vadd.f32 %v4656_v8, %v4603_v38 }
 0x4c3   :  { %5061 = vmatpush1.bf16.msra.mxu1 %v8751_v47  ;;  %5009 = vmatprep.subr.bf16.mxu0 %v8756_v16  ;;  %v4663_v16 = vadd.f32 %v4662_v61, %v4609_v53 }
 0x4c4   :  { %5062 = vmatprep.subr.bf16.mxu1 %v8759_v50 }
 0x4c6   :  { %5010 = vmatpush2.bf16.msra.mxu0 %v8754_v26  ;;  %v4659_v26 = vadd.f32 %v4658_v32, %v4605_v46 }
 0x4c7   :  { %5063 = vmatpush2.bf16.msra.mxu1 %v8757_v25  ;;  %5011 = vmatprep.subr.bf16.mxu0 %v8762_v39 }
 0x4c8   :  { %5064 = vmatprep.subr.bf16.mxu1 %v8765_v51  ;;  %v4667_v51 = vadd.f32 %v4666_v5, %v4613_v36 }
 0x4ca   :  { %5012 = vmatpush2.bf16.msra.mxu0 %v8760_v28 }
 0x4cb   :  { %5065 = vmatpush2.bf16.msra.mxu1 %v8763_v30  ;;  %5013 = vmatprep.subr.bf16.mxu0 %v8768_v13 }
 0x4cc   :  { %5066 = vmatprep.subr.bf16.mxu1 %v8771_v58 }
 0x4ce   :  { %5014 = vmatpush2.bf16.msra.mxu0 %v8766_v17  ;;  %v4669_v17 = vadd.f32 %v4668_v22, %v4615_v45 }
 0x4cf   :  { %5067 = vmatpush2.bf16.msra.mxu1 %v8769_v15  ;;  %5015 = vmatprep.subr.bf16.mxu0 %v8774_v21 }
 0x4d0   :  { %5068 = vmatprep.subr.bf16.mxu1 %v8777_v48 }
 0x4d2   :  { %5016 = vmatpush2.bf16.msra.mxu0 %v8772_v19 }
 0x4d3   :  { %5069 = vmatpush2.bf16.msra.mxu1 %v8775_v34  ;;  %5017 = vmatprep.subr.bf16.mxu0 %v8780_v29 }
 0x4d4   :  { %5070 = vmatprep.subr.bf16.mxu1 %v8783_v6 }
 0x4d6   :  { %5018 = vmatpush2.bf16.msra.mxu0 %v8778_v49 }
 0x4d7   :  { %5071 = vmatpush2.bf16.msra.mxu1 %v8781_v0  ;;  %5019 = vmatprep.subr.bf16.mxu0 %v8786_v2 }
 0x4d8   :  { %5072 = vmatprep.subr.bf16.mxu1 %v8789_v4 }
 0x4da   :  { %5020 = vmatpush2.bf16.msra.mxu0 %v8784_v60 }
 0x4db   :  { %5073 = vmatpush2.bf16.msra.mxu1 %v8787_v42  ;;  %5021 = vmatprep.subr.bf16.mxu0 %v8792_v11 }
 0x4dc   :  { %5074 = vmatprep.subr.bf16.mxu1 %v8795_v12 }
 0x4de   :  { %5022 = vmatpush2.bf16.msra.mxu0 %v8790_v43 }
 0x4df   :  { %5075 = vmatpush2.bf16.msra.mxu1 %v8793_v23  ;;  %5023 = vmatprep.subr.bf16.mxu0 %v8798_v54 }
 0x4e0   :  { %5076 = vmatprep.subr.bf16.mxu1 %v8801_v40 }
 0x4e2   :  { %5024 = vmatpush2.bf16.msra.mxu0 %v8796_v57 }
 0x4e3   :  { %5077 = vmatpush2.bf16.msra.mxu1 %v8799_v1 }
 0x4e5   :  { %5026 = vmatmul.mubr.bf16.vlgmr.msra.gmra.mxu0 %v10470_v35  ;;  %v4617_v35 = vpop.f32.mrf.mxu0 }
 0x4e6   :  { %5079 = vmatmul.mubr.bf16.vlgmr.msra.gmra.mxu1 %v10502_v3  ;;  %5035 = vmatprep.mubr.bf16.mxu0 %v10478_v52  ;;  %v4671_v34 = vadd.f32 %v4670_v18, %v4617_v35 }
 0x4e7   :  { %5088 = vmatprep.mubr.bf16.mxu1 %v10506_v24  ;;  %v4619_v3 = vpop.f32.mrf.mxu0 }
 0x4e9   :  { %v4709_v52 = vpop.f32.mrf.mxu0 }
 0x4ea   :  { %v4710_v25 = vadd.f32 %v4709_v52, %v4657_v41 }
 0x4eb   :  { %v4711_v24 = vpop.f32.mrf.mxu0 }
 0x4ec   :  { %v4712_v13 = vadd.f32 %v4711_v24, %v4659_v26 }
 0x4ed   :  { %5036 = vmatmul.mubr.bf16.gmra.mxu0 %v10490_v37  ;;  %v4713_v9 = vpop.f32.mrf.mxu0  ;;  %v4672_v37 = vpop.f32.mrf.mxu1 }
 0x4ee   :  { %5089 = vmatmul.mubr.bf16.gmra.mxu1 %v10514_v33  ;;  %v4714_v50 = vadd.f32 %v4713_v9, %v4661_v63  ;;  %v4673_v2 = vadd.f32 %v4672_v37, %v4619_v3 }
 0x4ef   :  { %v4715_v31 = vpop.f32.mrf.mxu0  ;;  %v4762_v33 = vpop.f32.mrf.mxu1 }
 0x4f0   :  { %v4716_v28 = vadd.f32 %v4715_v31, %v4663_v16  ;;  %v4763_v48 = vadd.f32 %v4762_v33, %v4710_v25 }
 0x4f1   :  { %v4719_v44 = vpop.f32.mrf.mxu0  ;;  %v4764_v59 = vpop.f32.mrf.mxu1 }
 0x4f2   :  { %v4720_v21 = vadd.f32 %v4719_v44, %v4667_v51  ;;  %v4765_v4 = vadd.f32 %v4764_v59, %v4712_v13 }
 0x4f3   :  { %v4721_v20 = vpop.f32.mrf.mxu0  ;;  %v4766_v10 = vpop.f32.mrf.mxu1 }
 0x4f4   :  { %v4767_v15 = vadd.f32 %v4766_v10, %v4714_v50  ;;  %v4722_v6 = vadd.f32 %v4721_v20, %v4669_v17 }
 0x4f5   :  { %v4723_v27 = vpop.f32.mrf.mxu0  ;;  %v4768_v56 = vpop.f32.mrf.mxu1 }
 0x4f6   :  { %v4769_v29 = vadd.f32 %v4768_v56, %v4716_v28  ;;  %v4724_v12 = vadd.f32 %v4723_v27, %v4671_v34 }
 0x4f7   :  { %v4772_v62 = vpop.f32.mrf.mxu1  ;;  %v4725_v47 = vpop.f32.mrf.mxu0 }
 0x4f8   :  { %v4773_v11 = vadd.f32 %v4772_v62, %v4720_v21  ;;  %v4726_v23 = vadd.f32 %v4725_v47, %v4673_v2 }
 0x4f9   :  { %v4774_v30 = vpop.f32.mrf.mxu1 }
 0x4fa   :  { %v4775_v1 = vadd.f32 %v4774_v30, %v4722_v6 }
 0x4fb   :  { %v4776_v49 = vpop.f32.mrf.mxu1 }
 0x4fc   :  { %v4777_v36 = vadd.f32 %v4776_v49, %v4724_v12 }
 0x4fd   :  { %v4778_v38 = vpop.f32.mrf.mxu1 }
 0x4fe   :  { %v4779_v35 = vadd.f32 %v4778_v38, %v4726_v23 }
 0x525   :  { %v4815_v39 = vpop.f32.mrf.mxu0 }
 0x526   :  { %v10536_v60 = vadd.f32 %v4815_v39, %v4763_v48 }
 0x527   :  { %v4817_v58 = vpop.f32.mrf.mxu0 }
 0x528   :  { %v10540_v54 = vadd.f32 %v4817_v58, %v4765_v4  ;;  %v5137_v14 = vmul.f32 %v10536_v60, %v10536_v60 }
 0x529   :  { %v4819_v19 = vpop.f32.mrf.mxu0 }
 0x52a   :  { %v10534_v0 = vadd.f32 %v4819_v19, %v4767_v15  ;;  %v5138_v61 = vmul.f32 %v10540_v54, %v10540_v54 }
 0x52b   :  { %v4821_v42 = vpop.f32.mrf.mxu0 }
 0x52c   :  { %v10538_v43 = vadd.f32 %v4821_v42, %v4769_v29  ;;  %v5141_v40 = vmul.f32 %v10534_v0, %v10534_v0  ;;  %v5101_v32 = vadd.f32 %v10534_v0, %v10536_v60 }
 0x52d   :  { %v4825_v57 = vpop.f32.mrf.mxu0 }
 0x52e   :  { %v10544_v46 = vadd.f32 %v4825_v57, %v4773_v11  ;;  %v5142_v53 = vmul.f32 %v10538_v43, %v10538_v43  ;;  %v5153_v3 = vadd.f32 %v5141_v40, %v5137_v14  ;;  %v5110_v52 = vadd.f32 %v10538_v43, %v10540_v54  ;;  %v4868_v11 = vpop.f32.mrf.mxu1 }
 0x52f   :  { %v4827_v8 = vpop.f32.mrf.mxu0 }
 0x530   :  { %v5145_v45 = vmul.f32 %v10544_v46, %v10544_v46  ;;  %v10554_v55 = vadd.f32 %v4827_v8, %v4775_v1  ;;  %v5102_v22 = vadd.f32 %v5101_v32, %v10544_v46  ;;  %v5162_v9 = vadd.f32 %v5142_v53, %v5138_v61  ;;  %v4870_v12 = vpop.f32.mrf.mxu1 }
 0x531   :  { %v4829_v5 = vpop.f32.mrf.mxu0 }
 0x532   :  { %v5146_v24 = vmul.f32 %v10554_v55, %v10554_v55  ;;  %v10563_v18 = vadd.f32 %v4829_v5, %v4777_v36  ;;  %v5154_v37 = vadd.f32 %v5153_v3, %v5145_v45  ;;  %v5111_v33 = vadd.f32 %v5110_v52, %v10554_v55  ;;  %v4872_v23 = vpop.f32.mrf.mxu1 }
 0x533   :  { %v4831_v31 = vpop.f32.mrf.mxu0 }
 0x534   :  { %v5103_v44 = vadd.f32 %v5102_v22, %v10563_v18  ;;  %v5149_v59 = vmul.f32 %v10563_v18, %v10563_v18  ;;  %v10569_v20 = vadd.f32 %v4831_v31, %v4779_v35  ;;  %v5163_v10 = vadd.f32 %v5162_v9, %v5146_v24  ;;  %v4874_v40 = vpop.f32.mrf.mxu1 }
 0x536   :  { %v5104_v27 = vrot.slane %v5103_v44, 4  ;;  %v5155_v56 = vadd.f32 %v5154_v37, %v5149_v59  ;;  %v5112_v63 = vadd.f32 %v5111_v33, %v10569_v20  ;;  %v5150_v62 = vmul.f32 %v10569_v20, %v10569_v20  ;;  %v4878_v57 = vpop.f32.mrf.mxu1 }
 0x538   :  { %v5113_v41 = vrot.slane %v5112_v63, 4  ;;  %v5164_v47 = vadd.f32 %v5163_v10, %v5150_v62  ;;  %v5105_v16 = vadd.f32 %v5104_v27, %v5103_v44  ;;  %v5156_v50 = vrot.slane %v5155_v56, 4  ;;  %v4880_v1 = vpop.f32.mrf.mxu1 }
 0x53a   :  { %v5106_v26 = vrot.slane %v5105_v16, 2  ;;  %v5165_v25 = vrot.slane %v5164_v47, 4  ;;  %v5114_v39 = vadd.f32 %v5113_v41, %v5112_v63  ;;  %v5157_v51 = vadd.f32 %v5156_v50, %v5155_v56  ;;  %v4882_v38 = vpop.f32.mrf.mxu1 }
 0x53c   :  { %v5107_v28 = vadd.f32 %v5106_v26, %v5105_v16  ;;  %v5166_v30 = vadd.f32 %v5165_v25, %v5164_v47  ;;  %v5115_v13 = vrot.slane %v5114_v39, 2  ;;  %v5158_v58 = vrot.slane %v5157_v51, 2  ;;  %v4884_v14 = vpop.f32.mrf.mxu1 }
 0x53e   :  { %v5108_v17 = vrot.slane %v5107_v28, 1  ;;  %v5167_v15 = vrot.slane %v5166_v30, 2  ;;  %v5116_v21 = vadd.f32 %v5115_v13, %v5114_v39  ;;  %v5159_v29 = vadd.f32 %v5158_v58, %v5157_v51 }
 0x540   :  { %v10574_v48 = vadd.f32 %v5108_v17, %v5107_v28  ;;  %v5168_v19 = vadd.f32 %v5167_v15, %v5166_v30  ;;  %v5117_v34 = vrot.slane %v5116_v21, 1  ;;  %v5160_v4 = vrot.slane %v5159_v29, 1 }
 0x542   :  { %5189 = vrot.lane.b32.xlu0 %v10574_v48, %s9117_s26  ;;  %v5169_v6 = vrot.slane %v5168_v19, 1  ;;  %v10580_v2 = vadd.f32 %v5117_v34, %v5116_v21  ;;  %v10586_v42 = vadd.f32 %v5160_v4, %v5159_v29 }
 0x544   :  { %v10578_v49 = vadd.f32 %v5169_v6, %v5168_v19 }
 0x546   :  { %5207 = vrot.lane.b32.xlu1 %v10578_v49, %s9117_s26  ;;  %5191 = vrot.lane.b32.xlu0 %v10580_v2, %s9117_s26 }
 0x54a   :  { %5205 = vrot.lane.b32.xlu0 %v10586_v42, %s9117_s26 }
 0x565   :  { %v4921_v53 = vpop.f32.mrf.mxu0 }
 0x566   :  { %v4974_v8 = vpop.f32.mrf.mxu1  ;;  %v4922_v31 = vadd.f32 %v4921_v53, %v4868_v11 }
 0x567   :  { %v4923_v36 = vpop.f32.mrf.mxu0 }
 0x568   :  { %v4976_v32 = vpop.f32.mrf.mxu1  ;;  %v4924_v10 = vadd.f32 %v4923_v36, %v4870_v12  ;;  %v4975_v62 = vadd.f32 %v4974_v8, %v4922_v31 }
 0x569   :  { %v4925_v45 = vpop.f32.mrf.mxu0 }
 0x56a   :  { %v4978_v35 = vpop.f32.mrf.mxu1  ;;  %v4926_v59 = vadd.f32 %v4925_v45, %v4872_v23  ;;  %v4977_v26 = vadd.f32 %v4976_v32, %v4924_v10 }
 0x56b   :  { %v4927_v61 = vpop.f32.mrf.mxu0 }
 0x56c   :  { %v4980_v3 = vpop.f32.mrf.mxu1  ;;  %v4928_v63 = vadd.f32 %v4927_v61, %v4874_v40  ;;  %v4979_v16 = vadd.f32 %v4978_v35, %v4926_v59 }
 0x56d   :  { %v4931_v5 = vpop.f32.mrf.mxu0 }
 0x56e   :  { %v4984_v52 = vpop.f32.mrf.mxu1  ;;  %v4932_v50 = vadd.f32 %v4931_v5, %v4878_v57  ;;  %v4981_v28 = vadd.f32 %v4980_v3, %v4928_v63 }
 0x56f   :  { %v4933_v22 = vpop.f32.mrf.mxu0 }
 0x570   :  { %v4986_v24 = vpop.f32.mrf.mxu1  ;;  %v4934_v13 = vadd.f32 %v4933_v22, %v4880_v1  ;;  %v4985_v21 = vadd.f32 %v4984_v52, %v4932_v50 }
 0x571   :  { %v4935_v9 = vpop.f32.mrf.mxu0 }
 0x572   :  { %v4988_v37 = vpop.f32.mrf.mxu1  ;;  %v4936_v19 = vadd.f32 %v4935_v9, %v4882_v38  ;;  %v4987_v57 = vadd.f32 %v4986_v24, %v4934_v13 }
 0x573   :  { %v4937_v33 = vpop.f32.mrf.mxu0 }
 0x574   :  { %v4990_v44 = vpop.f32.mrf.mxu1  ;;  %v4938_v12 = vadd.f32 %v4937_v33, %v4884_v14  ;;  %v4989_v38 = vadd.f32 %v4988_v37, %v4936_v19 }
 0x576   :  { %v4991_v5 = vadd.f32 %v4990_v44, %v4938_v12 }
 0x5a5   :  { %v5027_v27 = vpop.f32.mrf.mxu0 }
 0x5a6   :  { %v5080_v56 = vpop.f32.mrf.mxu1  ;;  %v5028_v25 = vadd.f32 %v5027_v27, %v4975_v62 }
 0x5a7   :  { %v5029_v41 = vpop.f32.mrf.mxu0 }
 0x5a8   :  { %v5082_v47 = vpop.f32.mrf.mxu1  ;;  %v5030_v58 = vadd.f32 %v5029_v41, %v4977_v26  ;;  %v10592_v6 = vadd.f32 %v5080_v56, %v5028_v25 }
 0x5a9   :  { %v5031_v39 = vpop.f32.mrf.mxu0 }
 0x5aa   :  { %v5084_v51 = vpop.f32.mrf.mxu1  ;;  %v5032_v30 = vadd.f32 %v5031_v39, %v4979_v16  ;;  %v10596_v53 = vadd.f32 %v5082_v47, %v5030_v58  ;;  %v5139_v45 = vmul.f32 %v10592_v6, %v10592_v6 }
 0x5ab   :  { %v5033_v17 = vpop.f32.mrf.mxu0 }
 0x5ac   :  { %v5086_v15 = vpop.f32.mrf.mxu1  ;;  %v10590_v34 = vadd.f32 %v5084_v51, %v5032_v30  ;;  %v5034_v29 = vadd.f32 %v5033_v17, %v4981_v28  ;;  %v5140_v9 = vmul.f32 %v10596_v53, %v10596_v53 }
 0x5ad   :  { %v5037_v4 = vpop.f32.mrf.mxu0 }
 0x5ae   :  { %v5090_v11 = vpop.f32.mrf.mxu1  ;;  %v10594_v23 = vadd.f32 %v5086_v15, %v5034_v29  ;;  %v5038_v40 = vadd.f32 %v5037_v4, %v4985_v21  ;;  %v5143_v1 = vmul.f32 %v10590_v34, %v10590_v34  ;;  %v5119_v52 = vadd.f32 %v10590_v34, %v10592_v6 }
 0x5af   :  { %v5039_v8 = vpop.f32.mrf.mxu0 }
 0x5b0   :  { %v5092_v36 = vpop.f32.mrf.mxu1  ;;  %v10600_v32 = vadd.f32 %v5090_v11, %v5038_v40  ;;  %v5144_v14 = vmul.f32 %v10594_v23, %v10594_v23  ;;  %v5040_v35 = vadd.f32 %v5039_v8, %v4987_v57  ;;  %v5171_v37 = vadd.f32 %v5143_v1, %v5139_v45 }
 0x5b1   :  { %v5041_v61 = vpop.f32.mrf.mxu0  ;;  %v5128_v59 = vadd.f32 %v10594_v23, %v10596_v53 }
 0x5b2   :  { %v5094_v3 = vpop.f32.mrf.mxu1  ;;  %v5147_v22 = vmul.f32 %v10600_v32, %v10600_v32  ;;  %v5042_v24 = vadd.f32 %v5041_v61, %v4989_v38  ;;  %v10612_v31 = vadd.f32 %v5092_v36, %v5040_v35  ;;  %v5120_v10 = vadd.f32 %v5119_v52, %v10600_v32 }
 0x5b3   :  { %v5043_v33 = vpop.f32.mrf.mxu0  ;;  %v5180_v56 = vadd.f32 %v5144_v14, %v5140_v9 }
 0x5b4   :  { %v10617_v44 = vadd.f32 %v5094_v3, %v5042_v24  ;;  %v5044_v27 = vadd.f32 %v5043_v33, %v4991_v5  ;;  %v5172_v63 = vadd.f32 %v5171_v37, %v5147_v22  ;;  %v5148_v62 = vmul.f32 %v10612_v31, %v10612_v31  ;;  %v5096_v41 = vpop.f32.mrf.mxu1  ;;  %v5190_v1 = vpop.permute.xlu0 %5189 }
 0x5b5   :  { %v5129_v47 = vadd.f32 %v5128_v59, %v10612_v31 }
 0x5b6   :  { %v5121_v16 = vadd.f32 %v5120_v10, %v10617_v44  ;;  %v5151_v50 = vmul.f32 %v10617_v44, %v10617_v44  ;;  %v10625_v26 = vadd.f32 %v5096_v41, %v5044_v27  ;;  %v5181_v25 = vadd.f32 %v5180_v56, %v5148_v62 }
 0x5b8   :  { %v5122_v39 = vrot.slane %v5121_v16, 4  ;;  %v5173_v51 = vadd.f32 %v5172_v63, %v5151_v50  ;;  %v5130_v28 = vadd.f32 %v5129_v47, %v10625_v26  ;;  %v5152_v30 = vmul.f32 %v10625_v26, %v10625_v26  ;;  %v5192_v52 = vpop.permute.xlu0 %5191  ;;  %v5208_v10 = vpop.permute.xlu1 %5207 }
 0x5b9   :  { %v5199_v33 = vsel %vm1834_vm1, %v5190_v1, %v5192_v52 }
 0x5ba   :  { %v5131_v13 = vrot.slane %v5130_v28, 4  ;;  %v5182_v58 = vadd.f32 %v5181_v25, %v5152_v30  ;;  %v5123_v17 = vadd.f32 %v5122_v39, %v5121_v16  ;;  %v5174_v15 = vrot.slane %v5173_v51, 4 }
 0x5bb   :  { %v5202_v27 = vadd.f32 %v5199_v33, %v10580_v2 }
 0x5bc   :  { %v5124_v21 = vrot.slane %v5123_v17, 2  ;;  %v5175_v19 = vadd.f32 %v5174_v15, %v5173_v51  ;;  %v5132_v29 = vadd.f32 %v5131_v13, %v5130_v28  ;;  %v5183_v4 = vrot.slane %v5182_v58, 4  ;;  %v5206_v59 = vpop.permute.xlu0 %5205 }
 0x5bd   :  { %v5215_v56 = vsel %vm1834_vm1, %v5206_v59, %v5208_v10 }
 0x5be   :  { %v5125_v11 = vadd.f32 %v5124_v21, %v5123_v17  ;;  %v5176_v12 = vrot.slane %v5175_v19, 2  ;;  %v5133_v40 = vrot.slane %v5132_v29, 2  ;;  %v5184_v57 = vadd.f32 %v5183_v4, %v5182_v58 }
 0x5bf   :  { %v5218_v63 = vadd.f32 %v5215_v56, %v10578_v49 }
 0x5c0   :  { %v5126_v8 = vrot.slane %v5125_v11, 1  ;;  %v5177_v36 = vadd.f32 %v5176_v12, %v5175_v19  ;;  %v5134_v38 = vadd.f32 %v5133_v40, %v5132_v29  ;;  %v5185_v45 = vrot.slane %v5184_v57, 2 }
 0x5c2   :  { %v5127_v14 = vadd.f32 %v5126_v8, %v5125_v11  ;;  %v5178_v35 = vrot.slane %v5177_v36, 1  ;;  %v5135_v61 = vrot.slane %v5134_v38, 1  ;;  %v5186_v3 = vadd.f32 %v5185_v45, %v5184_v57 }
 0x5c4   :  { %5193 = vrot.lane.b32.xlu1 %v5127_v14, %s9117_s26  ;;  %v5179_v5 = vadd.f32 %v5178_v35, %v5177_v36  ;;  %v5136_v22 = vadd.f32 %v5135_v61, %v5134_v38  ;;  %v5187_v24 = vrot.slane %v5186_v3, 1 }
 0x5c6   :  { %5209 = vrot.lane.b32.xlu0 %v5179_v5, %s9117_s26  ;;  %v5188_v9 = vadd.f32 %v5187_v24, %v5186_v3 }
 0x5c8   :  { %5195 = vrot.lane.b32.xlu1 %v5136_v22, %s9117_s26 }
 0x5cc   :  { %5211 = vrot.lane.b32.xlu1 %v5188_v9, %s9117_s26 }
 0x5d0   :  { %5223 = vrot.lane.b32.xlu1 %v5202_v27, %s9118_s27 }
 0x5d4   :  { %5239 = vrot.lane.b32.xlu1 %v5218_v63, %s9118_s27 }
 0x636   :  { %v5194_v62 = vpop.permute.xlu1 %5193 }
 0x637   :  { %v5198_v41 = vsel %vm1834_vm1, %v5192_v52, %v5194_v62 }
 0x638   :  { %v5203_v47 = vadd.f32 %v5198_v41, %v5127_v14  ;;  %v5210_v49 = vpop.permute.xlu0 %5209 }
 0x639   :  { %v5214_v17 = vsel %vm1834_vm1, %v5208_v10, %v5210_v49 }
 0x63a   :  { %v5196_v16 = vpop.permute.xlu1 %5195  ;;  %5225 = vrot.lane.b32.xlu0 %v5203_v47, %s9118_s27 }
 0x63b   :  { %v5197_v2 = vsel %vm1834_vm1, %v5194_v62, %v5196_v16  ;;  %v5200_v50 = vsel %vm1834_vm1, %v5196_v16, %v5190_v1 }
 0x63c   :  { %v5201_v25 = vadd.f32 %v5200_v50, %v10574_v48  ;;  %v5204_v39 = vadd.f32 %v5197_v2, %v5136_v22  ;;  %v5219_v48 = vadd.f32 %v5214_v17, %v5179_v5 }
 0x63e   :  { %v5212_v51 = vpop.permute.xlu1 %5211  ;;  %5221 = vrot.lane.b32.xlu0 %v5201_v25, %s9118_s27  ;;  %5227 = vrot.lane.b32.xlu1 %v5204_v39, %s9118_s27 }
 0x63f   :  { %v5213_v28 = vsel %vm1834_vm1, %v5210_v49, %v5212_v51  ;;  %v5216_v30 = vsel %vm1834_vm1, %v5212_v51, %v5206_v59 }
 0x640   :  { %v5217_v13 = vadd.f32 %v5216_v30, %v10586_v42  ;;  %v5220_v58 = vadd.f32 %v5213_v28, %v5188_v9 }
 0x642   :  { %5237 = vrot.lane.b32.xlu0 %v5217_v13, %s9118_s27  ;;  %5243 = vrot.lane.b32.xlu1 %v5220_v58, %s9118_s27  ;;  %v5224_v15 = vpop.permute.xlu1 %5223 }
 0x646   :  { %5241 = vrot.lane.b32.xlu0 %v5219_v48, %s9118_s27  ;;  %v5240_v21 = vpop.permute.xlu1 %5239 }
 0x6ac   :  { %v5226_v19 = vpop.permute.xlu0 %5225 }
 0x6ad   :  { %v5230_v29 = vsel %vm1867_vm2, %v5224_v15, %v5226_v19 }
 0x6ae   :  { %v5235_v57 = vadd.f32 %v5230_v29, %v5203_v47 }
 0x6b0   :  { %v5228_v4 = vpop.permute.xlu1 %5227  ;;  %v5222_v11 = vpop.permute.xlu0 %5221 }
 0x6b1   :  { %v5229_v42 = vsel %vm1867_vm2, %v5226_v19, %v5228_v4  ;;  %v5231_v12 = vsel %vm1867_vm2, %v5222_v11, %v5224_v15  ;;  %v5232_v40 = vsel %vm1867_vm2, %v5228_v4, %v5222_v11  ;;  %v5099_v4 = vld [vmem:[#allocation13] sm:$0xf] }
 0x6b2   :  { %v5236_v1 = vadd.f32 %v5229_v42, %v5204_v39  ;;  %v5233_v8 = vadd.f32 %v5232_v40, %v5201_v25  ;;  %v5234_v36 = vadd.f32 %v5231_v12, %v5202_v27  ;;  %v10819_v12 = vld [vmem:[#allocation34_spill] sm:$0xff] }
 0x6b4   :  { %v5256_v38 = vadd.f32 %v5236_v1, %v5235_v57  ;;  %v5253_v45 = vadd.f32 %v5236_v1, %v5233_v8  ;;  %v5254_v14 = vadd.f32 %v5234_v36, %v5233_v8  ;;  %v5255_v35 = vadd.f32 %v5235_v57, %v5234_v36  ;;  %v5244_v61 = vpop.permute.xlu1 %5243  ;;  %v5238_v3 = vpop.permute.xlu0 %5237  ;;  %v10820_v57 = vld [vmem:[#allocation35_spill] sm:$0xff]  ;;  %v10821_v8 = vld [vmem:[#allocation36_spill] sm:$0xff] }
 0x6b5   :  { %v5247_v5 = vsel %vm1867_vm2, %v5238_v3, %v5240_v21  ;;  %v5248_v52 = vsel %vm1867_vm2, %v5244_v61, %v5238_v3 }
 0x6b6   :  { %v5261_v22 = vadd.f32 %v5255_v35, %v5253_v45  ;;  %v5262_v24 = vadd.f32 %v5256_v38, %v5254_v14  ;;  %v5249_v9 = vadd.f32 %v5248_v52, %v5217_v13  ;;  %v5250_v33 = vadd.f32 %v5247_v5, %v5218_v63  ;;  %v10822_v38 = vld [vmem:[#allocation37_spill] sm:$0xff] }
 0x6b8   :  { %v5242_v59 = vpop.permute.xlu0 %5241  ;;  %v5265_v41 = vmul.f32 0.001953125, %v5261_v22  ;;  %v5266_v47 = vmul.f32 0.001953125, %v5262_v24  ;;  %v5258_v16 = vadd.f32 %v5250_v33, %v5249_v9 }
 0x6b9   :  { %v5245_v10 = vsel %vm1867_vm2, %v5242_v59, %v5244_v61  ;;  %v5246_v27 = vsel %vm1867_vm2, %v5240_v21, %v5242_v59 }
 0x6ba   :  { %v5251_v56 = vadd.f32 %v5246_v27, %v5219_v48  ;;  %v5252_v62 = vadd.f32 %v5245_v10, %v5220_v58  ;;  %v5269_v51 = vmul.f32 %v5265_v41, %v5265_v41  ;;  %v5270_v28 = vmul.f32 %v5266_v47, %v5266_v47 }
 0x6bc   :  { %v5257_v2 = vadd.f32 %v5252_v62, %v5249_v9  ;;  %v5259_v50 = vadd.f32 %v5251_v56, %v5250_v33  ;;  %v5260_v25 = vadd.f32 %v5252_v62, %v5251_v56  ;;  %v5100_v33 = vld [vmem:[#allocation14] sm:$0xf] }
 0x6be   :  { %v5263_v39 = vadd.f32 %v5259_v50, %v5257_v2  ;;  %v5264_v49 = vadd.f32 %v5260_v25, %v5258_v16 }
 0x6c0   :  { %v5267_v63 = vmul.f32 0.001953125, %v5263_v39  ;;  %v5268_v30 = vmul.f32 0.001953125, %v5264_v49 }
 0x6c2   :  { %v5271_v13 = vsub.f32 %v5267_v63, %v5269_v51  ;;  %v5272_v17 = vsub.f32 %v5268_v30, %v5270_v28 }
 0x6c4   :  { %v5273_v15 = vadd.f32 1e-05, %v5271_v13  ;;  %v5274_v19 = vadd.f32 1e-05, %v5272_v17 }
 0x6c6   :  { %8802 = vrsqrt.f32 %v5273_v15 }
 0x6c7   :  { %8804 = vrsqrt.f32 %v5274_v19 }
 0x6d3   :  { %v8803_v37 = vpop.eup %8802 }
 0x6d4   :  { %v8805_v58 = vpop.eup %8804 }
 0x6d5   :  { %v5279_v48 = vcombine.low %v8803_v37, %v8805_v58 }
 0x6d7   :  { %v5286_v21 = vrot.slane %v5279_v48, %v10115_v7 }
 0x6d9   :  { %v5287_v29 = vcombine.low %v5286_v21, %v5286_v21 }
 0x6db   :  { %v5294_v11 = vrot.slane %v5287_v29, %v10115_v7 }
 0x6dd   :  { %v5296_v42 = vmul.f32 %v5294_v11, %v5099_v4 }
 0x6df   :  { %v5301_v40 = vrot.slane %v5296_v42, %v10819_v12  ;;  %v5305_v1 = vrot.slane %v5296_v42, %v10820_v57  ;;  %v5309_v36 = vrot.slane %v5296_v42, %v10821_v8  ;;  %v5313_v45 = vrot.slane %v5296_v42, %v10822_v38 }
 0x6e1   :  { %v5318_v14 = vmul.f32 %v5301_v40, %v5265_v41  ;;  %v5319_v35 = vmul.f32 %v5305_v1, %v5266_v47  ;;  %v5320_v61 = vmul.f32 %v5309_v36, %v5265_v41  ;;  %v5321_v3 = vmul.f32 %v5313_v45, %v5266_v47 }
 0x6e2   :  { %v5352_v10 = vmul.f32 %v5301_v40, %v10536_v60  ;;  %v5353_v27 = vmul.f32 %v5305_v1, %v10540_v54  ;;  %v5354_v56 = vmul.f32 %v5309_v36, %v10592_v6  ;;  %v5355_v62 = vmul.f32 %v5313_v45, %v10596_v53 }
 0x6e3   :  { %v5326_v5 = vcombine.low %v5318_v14, %v5319_v35  ;;  %v5327_v52 = vcombine.low %v5320_v61, %v5321_v3  ;;  %v5356_v41 = vmul.f32 %v5301_v40, %v10534_v0  ;;  %v5357_v16 = vmul.f32 %v5305_v1, %v10538_v43 }
 0x6e4   :  { %v5358_v2 = vmul.f32 %v5309_v36, %v10590_v34  ;;  %v5359_v50 = vmul.f32 %v5313_v45, %v10594_v23  ;;  %v5360_v25 = vmul.f32 %v5301_v40, %v10544_v46  ;;  %v5361_v39 = vmul.f32 %v5305_v1, %v10554_v55 }
 0x6e5   :  { %v5334_v22 = vrot.slane %v5326_v5, %v10115_v7  ;;  %v5341_v24 = vrot.slane %v5327_v52, %v10115_v7  ;;  %v5362_v60 = vmul.f32 %v5309_v36, %v10600_v32  ;;  %v5363_v54 = vmul.f32 %v5313_v45, %v10612_v31 }
 0x6e6   :  { %v5364_v34 = vmul.f32 %v5301_v40, %v10563_v18  ;;  %v5365_v23 = vmul.f32 %v5305_v1, %v10569_v20  ;;  %v5366_v46 = vmul.f32 %v5309_v36, %v10617_v44  ;;  %v5367_v55 = vmul.f32 %v5313_v45, %v10625_v26 }
 0x6e7   :  { %v5342_v9 = vcombine.low %v5334_v22, %v5341_v24  ;;  %v10823_v52 = vlaneseq }
 0x6e9   :  { %v5349_v59 = vrot.slane %v5342_v9, %v10115_v7  ;;  %vm10708_vm15 = vcmp.lt.s32.totalorder %v10823_v52, 256 }
 0x6eb   :  { %v5351_v47 = vsub.f32 %v5100_v33, %v5349_v59 }
 0x6ed   :  { %v5372_v6 = vrot.slane %v5351_v47, %v10819_v12  ;;  %v5376_v53 = vrot.slane %v5351_v47, %v10820_v57  ;;  %v5380_v0 = vrot.slane %v5351_v47, %v10821_v8  ;;  %v5384_v43 = vrot.slane %v5351_v47, %v10822_v38 }
 0x6ef   :  { %v5389_v49 = vadd.f32 %v5372_v6, %v5352_v10  ;;  %v5390_v32 = vadd.f32 %v5376_v53, %v5353_v27  ;;  %v5391_v51 = vadd.f32 %v5380_v0, %v5354_v56  ;;  %v5392_v31 = vadd.f32 %v5384_v43, %v5355_v62 }
 0x6f0   :  { %v5393_v28 = vadd.f32 %v5372_v6, %v5356_v41  ;;  %v5394_v63 = vadd.f32 %v5376_v53, %v5357_v16  ;;  %v5395_v30 = vadd.f32 %v5380_v0, %v5358_v2  ;;  %v5396_v13 = vadd.f32 %v5384_v43, %v5359_v50 }
 0x6f1   :  { %v5397_v17 = vadd.f32 %v5372_v6, %v5360_v25  ;;  %v5398_v15 = vadd.f32 %v5376_v53, %v5361_v39  ;;  %v5399_v19 = vadd.f32 %v5380_v0, %v5362_v60  ;;  %v5400_v37 = vadd.f32 %v5384_v43, %v5363_v54 }
 0x6f2   :  { %v5401_v58 = vadd.f32 %v5372_v6, %v5364_v34  ;;  %v5402_v18 = vadd.f32 %v5376_v53, %v5365_v23  ;;  %v5403_v48 = vadd.f32 %v5380_v0, %v5366_v46  ;;  %v5404_v20 = vadd.f32 %v5384_v43, %v5367_v55 }
 0x6f3   :  { %v5405_v21 = vmax.f32 %v5389_v49, 0.0  ;;  %v5406_v44 = vmax.f32 %v5390_v32, 0.0  ;;  %v5407_v29 = vmax.f32 %v5391_v51, 0.0  ;;  %v5408_v26 = vmax.f32 %v5392_v31, 0.0 }
 0x6f4   :  { %v5409_v4 = vmax.f32 %v5393_v28, 0.0  ;;  %v5410_v11 = vmax.f32 %v5394_v63, 0.0  ;;  %v5411_v42 = vmax.f32 %v5395_v30, 0.0  ;;  %v5412_v12 = vmax.f32 %v5396_v13, 0.0 }
 0x6f5   :  { %v5413_v40 = vmax.f32 %v5397_v17, 0.0  ;;  %v5414_v57 = vmax.f32 %v5398_v15, 0.0  ;;  %v5415_v1 = vmax.f32 %v5399_v19, 0.0  ;;  %v5416_v8 = vmax.f32 %v5400_v37, 0.0 }
 0x6f6   :  { %v5417_v36 = vmax.f32 %v5401_v58, 0.0  ;;  %v5418_v38 = vmax.f32 %v5402_v18, 0.0  ;;  %v5419_v45 = vmax.f32 %v5403_v48, 0.0  ;;  %v5420_v14 = vmax.f32 %v5404_v20, 0.0 }
 0x6f7   :  { %v5421_v35 = vmax.f32 %v5405_v21, %v5407_v29  ;;  %v5422_v61 = vmax.f32 %v5406_v44, %v5408_v26  ;;  %v5423_v3 = vmax.f32 %v5409_v4, %v5411_v42  ;;  %v5424_v5 = vmax.f32 %v5410_v11, %v5412_v12 }
 0x6f8   :  { %v5425_v24 = vmax.f32 %v5413_v40, %v5415_v1  ;;  %v5426_v9 = vmax.f32 %v5414_v57, %v5416_v8  ;;  %v5427_v33 = vmax.f32 %v5417_v36, %v5419_v45  ;;  %v5428_v59 = vmax.f32 %v5418_v38, %v5420_v14 }
 0x6f9   :  { %v5431_v10 = vrot.slane %v5421_v35, 1  ;;  %v5432_v27 = vrot.slane %v5422_v61, 1  ;;  %v5488_v56 = vrot.slane %v5423_v3, 1  ;;  %v5489_v62 = vrot.slane %v5424_v5, 1 }
 0x6fa   :  { %v5542_v41 = vrot.slane %v5425_v24, 1  ;;  %v5543_v47 = vrot.slane %v5426_v9, 1  ;;  %v5596_v16 = vrot.slane %v5427_v33, 1  ;;  %v5597_v2 = vrot.slane %v5428_v59, 1 }
 0x6fb   :  { %v5435_v50 = vmax.f32 %v5421_v35, %v5431_v10  ;;  %v5436_v25 = vmax.f32 %v5422_v61, %v5432_v27  ;;  %v5492_v39 = vmax.f32 %v5423_v3, %v5488_v56  ;;  %v5493_v60 = vmax.f32 %v5424_v5, %v5489_v62 }
 0x6fc   :  { %v5546_v54 = vmax.f32 %v5425_v24, %v5542_v41  ;;  %v5547_v6 = vmax.f32 %v5426_v9, %v5543_v47  ;;  %v5600_v53 = vmax.f32 %v5427_v33, %v5596_v16  ;;  %v5601_v0 = vmax.f32 %v5428_v59, %v5597_v2 }
 0x6fd   :  { %v5439_v43 = vcombine.low %v5435_v50, %v5436_v25  ;;  %v5464_v34 = vcombine.high %v5435_v50, %v5436_v25  ;;  %v5496_v23 = vcombine.low %v5492_v39, %v5493_v60  ;;  %v5518_v46 = vcombine.high %v5492_v39, %v5493_v60 }
 0x6fe   :  { %v5550_v55 = vcombine.low %v5546_v54, %v5547_v6  ;;  %v5572_v49 = vcombine.high %v5546_v54, %v5547_v6  ;;  %v5604_v32 = vcombine.low %v5600_v53, %v5601_v0  ;;  %v5626_v51 = vcombine.high %v5600_v53, %v5601_v0 }
 0x6ff   :  { %v5446_v31 = vrot.slane %v5439_v43, %v10115_v7  ;;  %v5471_v28 = vrot.slane %v5464_v34, %v10115_v7  ;;  %v5503_v63 = vrot.slane %v5496_v23, %v10115_v7  ;;  %v5525_v30 = vrot.slane %v5518_v46, %v10115_v7 }
 0x700   :  { %v5557_v13 = vrot.slane %v5550_v55, %v10115_v7  ;;  %v5579_v17 = vrot.slane %v5572_v49, %v10115_v7  ;;  %v5611_v15 = vrot.slane %v5604_v32, %v10115_v7  ;;  %v5633_v19 = vrot.slane %v5626_v51, %v10115_v7 }
 0x701   :  { %v5453_v37 = vrot.slane %v5446_v31, %v10115_v7  ;;  %v5478_v58 = vrot.slane %v5471_v28, %v10115_v7  ;;  %v5510_v18 = vrot.slane %v5503_v63, %v10115_v7  ;;  %v5532_v48 = vrot.slane %v5525_v30, %v10115_v7 }
 0x702   :  { %v5564_v20 = vrot.slane %v5557_v13, %v10115_v7  ;;  %v5586_v21 = vrot.slane %v5579_v17, %v10115_v7  ;;  %v5618_v44 = vrot.slane %v5611_v15, %v10115_v7  ;;  %v5640_v29 = vrot.slane %v5633_v19, %v10115_v7 }
 0x703   :  { %5459 = vst.msk [vmem:[#allocation6] ss:$2 sm:$0x3] %vm10708_vm15, %v5453_v37  ;;  %v5460_v26 = vcombine.high %v5453_v37, %v5453_v37  ;;  %5481 = vst.msk [vmem:[#allocation6 + $0x8] ss:$2 sm:$0x3] %vm10708_vm15, %v5478_v58  ;;  %v5482_v4 = vcombine.high %v5478_v58, %v5478_v58  ;;  %v5514_v11 = vcombine.high %v5510_v18, %v5510_v18 }
 0x704   :  { %5513 = vst.msk [vmem:[#allocation6 + $0x10] ss:$2 sm:$0x3] %vm10708_vm15, %v5510_v18  ;;  %5535 = vst.msk [vmem:[#allocation6 + $0x18] ss:$2 sm:$0x3] %vm10708_vm15, %v5532_v48  ;;  %v5536_v42 = vcombine.high %v5532_v48, %v5532_v48  ;;  %v5568_v7 = vcombine.high %v5564_v20, %v5564_v20  ;;  %v5590_v12 = vcombine.high %v5586_v21, %v5586_v21 }
 0x705   :  { %5567 = vst.msk [vmem:[#allocation6 + $0x1] ss:$2 sm:$0x3] %vm10708_vm15, %v5564_v20  ;;  %5589 = vst.msk [vmem:[#allocation6 + $0x9] ss:$2 sm:$0x3] %vm10708_vm15, %v5586_v21  ;;  %v5622_v40 = vcombine.high %v5618_v44, %v5618_v44  ;;  %v5644_v57 = vcombine.high %v5640_v29, %v5640_v29 }
 0x706   :  { %5621 = vst.msk [vmem:[#allocation6 + $0x11] ss:$2 sm:$0x3] %vm10708_vm15, %v5618_v44  ;;  %5643 = vst.msk [vmem:[#allocation6 + $0x19] ss:$2 sm:$0x3] %vm10708_vm15, %v5640_v29 }
 0x707   :  { %5463 = vst.msk [vmem:[#allocation6 + $0x4] ss:$2 sm:$0x3] %vm10708_vm15, %v5460_v26  ;;  %5485 = vst.msk [vmem:[#allocation6 + $0xc] ss:$2 sm:$0x3] %vm10708_vm15, %v5482_v4 }
 0x708   :  { %5517 = vst.msk [vmem:[#allocation6 + $0x14] ss:$2 sm:$0x3] %vm10708_vm15, %v5514_v11  ;;  %5539 = vst.msk [vmem:[#allocation6 + $0x1c] ss:$2 sm:$0x3] %vm10708_vm15, %v5536_v42 }
 0x709   :  { %5571 = vst.msk [vmem:[#allocation6 + $0x5] ss:$2 sm:$0x3] %vm10708_vm15, %v5568_v7  ;;  %5593 = vst.msk [vmem:[#allocation6 + $0xd] ss:$2 sm:$0x3] %vm10708_vm15, %v5590_v12 }
 0x70a   :  { %5625 = vst.msk [vmem:[#allocation6 + $0x15] ss:$2 sm:$0x3] %vm10708_vm15, %v5622_v40  ;;  %5647 = vst.msk [vmem:[#allocation6 + $0x1d] ss:$2 sm:$0x3] %vm10708_vm15, %v5644_v57 }
 0x70b   :  { %9106 = dma.done.wait [#allocation7 + $0x1], 16384 }
 0x70c   :  { %9107 = vsyncadd [#allocation7 + $0x1], 4294950912  ;;  %v8806_v1 = vld [vmem:[#allocation3 + $0x78] sm:$0xff]   ;;  %v8810_v45 = vld [vmem:[#allocation3 + $0x70] sm:$0xff]   ;;  %v9123_v16 = vmov 1983009808  }
 0x70d   :  { %v8807_v8 = vld [vmem:[#allocation3 + $0xf8] sm:$0xff]   ;;  %7859 = vmatprep.subr.bf16.mxu0 %v8806_v1  ;;  %v8811_v14 = vld [vmem:[#allocation3 + $0xf0] sm:$0xff]   ;;  %v8814_v3 = vld [vmem:[#allocation3 + $0x68] sm:$0xff]   ;;  %v5662_v2 = vunpack.c.l.s4 %v9123_v16  ;;  %s9124_s2 = smov [#allocation17]  }
 0x70e   :  { %v8808_v36 = vld [vmem:[#allocation3 + $0x38] sm:$0xff]   ;;  %7881 = vmatprep.subr.bf16.mxu1 %v8807_v8  ;;  %v8812_v35 = vld [vmem:[#allocation3 + $0x30] sm:$0xff]   ;;  %v8815_v5 = vld [vmem:[#allocation3 + $0xe8] sm:$0xff]   ;;  %s7118_s3 = sshll.u32 %s9124_s2, 4  ;;  %s7119_s3 = int_to_ptr.vmem [resolvable:$true] %s7118_s3 }
 0x70f   :  { %v8809_v38 = vld [vmem:[#allocation3 + $0xb8] sm:$0xff]   ;;  %7860 = vmatpush3.bf16.msra.mxu0 %v8808_v36  ;;  %v8813_v61 = vld [vmem:[#allocation3 + $0xb0] sm:$0xff]   ;;  %v8816_v52 = vld [vmem:[#allocation3 + $0x28] sm:$0xff]   ;;  %v5663_v54 = vunpack.c.0.s8 %v5662_v2  ;;  %s9078_s15 = scalar_lea.vmem %s7119_s3, 32  ;;  %p9083_p8 = scmp.lt.s32.totalorder %s7119_s3, %s7119_s3 }
 0x710   :  { %7882 = vmatpush3.bf16.msra.mxu1 %v8809_v38  ;;  %7861 = vmatprep.subr.bf16.mxu0 %v8810_v45  ;;  %v8817_v22 = vld [vmem:[#allocation3 + $0xa8] sm:$0xff]   ;;  %v8818_v24 = vld [vmem:[#allocation3 + $0x60] sm:$0xff]   ;;  %v8822_v10 = vld [vmem:[#allocation3 + $0x58] sm:$0xff]   ;;  %p9079_p7 = scmp.ne.s32.totalorder %s7119_s3, %s9078_s15  ;;  %p9084_p9 = scmp.lt.s32.totalorder %s9078_s15, %s9078_s15 }
 0x711   :  { %7883 = vmatprep.subr.bf16.mxu1 %v8811_v14  ;;  %v8819_v9 = vld [vmem:[#allocation3 + $0xe0] sm:$0xff]   ;;  %v8823_v27 = vld [vmem:[#allocation3 + $0xd8] sm:$0xff]   ;;  %v8826_v41 = vld [vmem:[#allocation3 + $0x50] sm:$0xff]  }
 0x712   :  { %v8820_v33 = vld [vmem:[#allocation3 + $0x20] sm:$0xff]   ;;  %v8824_v56 = vld [vmem:[#allocation3 + $0x18] sm:$0xff]   ;;  %v8827_v47 = vld [vmem:[#allocation3 + $0xd0] sm:$0xff]   ;;  %p9085_p10 = por %p9084_p9, %p9083_p8 }
 0x713   :  { %7862 = vmatpush3.bf16.msra.mxu0 %v8812_v35  ;;  %v8821_v59 = vld [vmem:[#allocation3 + $0xa0] sm:$0xff]   ;;  %v8825_v62 = vld [vmem:[#allocation3 + $0x98] sm:$0xff]   ;;  %v8828_v50 = vld [vmem:[#allocation3 + $0x10] sm:$0xff]  }
 0x714   :  { %7884 = vmatpush3.bf16.msra.mxu1 %v8813_v61  ;;  %7863 = vmatprep.subr.bf16.mxu0 %v8814_v3  ;;  %v8829_v25 = vld [vmem:[#allocation3 + $0x90] sm:$0xff]   ;;  %v8830_v39 = vld [vmem:[#allocation3 + $0x48] sm:$0xff]   ;;  %v8834_v0 = vld [vmem:[#allocation3 + $0x40] sm:$0xff]   ;;  %p9086_p11 = pnand %p9085_p10, %p9079_p7 }
 0x715   :  { %7885 = vmatprep.subr.bf16.mxu1 %v8815_v5  ;;  %v8831_v60 = vld [vmem:[#allocation3 + $0xc8] sm:$0xff]   ;;  %v8835_v43 = vld [vmem:[#allocation3 + $0xc0] sm:$0xff]   ;;  %v8839_v31 = vld [vmem:[#allocation3 + $0x178] sm:$0xff]  }
 0x716   :  { %v8832_v6 = vld [vmem:[#allocation3 + $0x8] sm:$0xff]   ;;  %v8836_v46 = vld [vmem:[#allocation3] sm:$0xff]   ;;  %v8840_v28 = vld [vmem:[#allocation3 + $0x1f8] sm:$0xff]  }
 0x717   :  { %7864 = vmatpush3.bf16.msra.mxu0 %v8816_v52  ;;  %v8833_v53 = vld [vmem:[#allocation3 + $0x88] sm:$0xff]   ;;  %v8837_v55 = vld [vmem:[#allocation3 + $0x80] sm:$0xff]   ;;  %v8841_v19 = vld [vmem:[#allocation3 + $0x138] sm:$0xff]  }
 0x718   :  { %7886 = vmatpush3.bf16.msra.mxu1 %v8817_v22  ;;  %7865 = vmatprep.subr.bf16.mxu0 %v8818_v24  ;;  %v10826_v34 = vld [vmem:[#allocation33_spill] sm:$0xff]  ;;  %v5652_v49 = vld [vmem:[#allocation6] sm:$0xff]  ;;  %v8842_v48 = vld [vmem:[#allocation3 + $0x1b8] sm:$0xff]  }
 0x719   :  { %7887 = vmatprep.subr.bf16.mxu1 %v8819_v9  ;;  %v10761_v23 = vsub.s32 %v5663_v54, %v10826_v34  ;;  %v5660_v51 = vcombine.high %v5652_v49, %v5652_v49  ;;  %v8843_v58 = vld [vmem:[#allocation3 + $0x170] sm:$0xff]   ;;  %v8847_v44 = vld [vmem:[#allocation3 + $0x168] sm:$0xff]   ;;  %v8851_v11 = vld [vmem:[#allocation3 + $0x160] sm:$0xff]  }
 0x71a   :  { %v8844_v20 = vld [vmem:[#allocation3 + $0x1f0] sm:$0xff]   ;;  %v8848_v26 = vld [vmem:[#allocation3 + $0x1e8] sm:$0xff]   ;;  %v8852_v7 = vld [vmem:[#allocation3 + $0x1e0] sm:$0xff]  }
 0x71b   :  { %7866 = vmatpush3.bf16.msra.mxu0 %v8820_v33  ;;  %v5667_v32 = vrot.slane %v5652_v49, %v10761_v23  ;;  %v5674_v30 = vrot.slane %v5660_v51, %v10761_v23  ;;  %v8845_v21 = vld [vmem:[#allocation3 + $0x130] sm:$0xff]   ;;  %v8849_v4 = vld [vmem:[#allocation3 + $0x128] sm:$0xff]   ;;  %v8853_v12 = vld [vmem:[#allocation3 + $0x120] sm:$0xff]  }
 0x71c   :  { %7888 = vmatpush3.bf16.msra.mxu1 %v8821_v59  ;;  %7867 = vmatprep.subr.bf16.mxu0 %v8822_v10  ;;  %v8846_v29 = vld [vmem:[#allocation3 + $0x1b0] sm:$0xff]   ;;  %v8850_v42 = vld [vmem:[#allocation3 + $0x1a8] sm:$0xff]   ;;  %v8855_v40 = vld [vmem:[#allocation3 + $0x158] sm:$0xff]  }
 0x71d   :  { %7889 = vmatprep.subr.bf16.mxu1 %v8823_v27  ;;  %v5675_v63 = vcombine.high %v5667_v32, %v5667_v32  ;;  %v5744_v13 = vpack.c.bf16 %v5667_v32, %v5667_v32  ;;  %v5676_v15 = vcombine.high %v5674_v30, %v5674_v30  ;;  %v5746_v37 = vpack.c.bf16 %v5674_v30, %v5674_v30  ;;  %v8854_v57 = vld [vmem:[#allocation3 + $0x1a0] sm:$0xff]   ;;  %v8856_v1 = vld [vmem:[#allocation3 + $0x1d8] sm:$0xff]   ;;  %v8859_v36 = vld [vmem:[#allocation3 + $0x150] sm:$0xff]  }
 0x71e   :  { %v8857_v8 = vld [vmem:[#allocation3 + $0x118] sm:$0xff]   ;;  %v8860_v45 = vld [vmem:[#allocation3 + $0x1d0] sm:$0xff]   ;;  %v8863_v35 = vld [vmem:[#allocation3 + $0x148] sm:$0xff]  }
 0x71f   :  { %7868 = vmatpush3.bf16.msra.mxu0 %v8824_v56  ;;  %v5745_v17 = vpack.c.bf16 %v5675_v63, %v5675_v63  ;;  %v5747_v18 = vpack.c.bf16 %v5676_v15, %v5676_v15  ;;  %v8858_v38 = vld [vmem:[#allocation3 + $0x198] sm:$0xff]   ;;  %v8861_v14 = vld [vmem:[#allocation3 + $0x110] sm:$0xff]   ;;  %v8864_v3 = vld [vmem:[#allocation3 + $0x1c8] sm:$0xff]  }
 0x720   :  { %7890 = vmatpush3.bf16.msra.mxu1 %v8825_v62  ;;  %7869 = vmatprep.subr.bf16.mxu0 %v8826_v41  ;;  %v8862_v61 = vld [vmem:[#allocation3 + $0x190] sm:$0xff]   ;;  %v8865_v5 = vld [vmem:[#allocation3 + $0x108] sm:$0xff]   ;;  %v8867_v52 = vld [vmem:[#allocation3 + $0x140] sm:$0xff]  }
 0x721   :  { %7891 = vmatprep.subr.bf16.mxu1 %v8827_v47  ;;  %6823 = vmatprep.mubr.bf16.mxu0 %v5745_v17  ;;  %v8866_v22 = vld [vmem:[#allocation3 + $0x188] sm:$0xff]   ;;  %v8868_v24 = vld [vmem:[#allocation3 + $0x1c0] sm:$0xff]   ;;  %v8872_v27 = vld [vmem:[#allocation3 + $0x278] sm:$0xff]  }
 0x722   :  { %6863 = vmatprep.mubr.bf16.mxu1 %v5747_v18  ;;  %v5653_v9 = vld [vmem:[#allocation6 + $0x8] sm:$0xff]  ;;  %v8869_v33 = vld [vmem:[#allocation3 + $0x100] sm:$0xff]   ;;  %v8873_v16 = vld [vmem:[#allocation3 + $0x2f8] sm:$0xff]  }
 0x723   :  { %7870 = vmatpush3.bf16.msra.mxu0 %v8828_v50  ;;  %v5684_v59 = vrot.slane %v5653_v9, %v10761_v23  ;;  %v5677_v10 = vcombine.high %v5653_v9, %v5653_v9  ;;  %v8870_v56 = vld [vmem:[#allocation3 + $0x180] sm:$0xff]   ;;  %v8879_v34 = vld [vmem:[#allocation3 + $0x2b0] sm:$0xff]   ;;  %v8883_v32 = vld [vmem:[#allocation3 + $0x2a8] sm:$0xff]  }
 0x724   :  { %7892 = vmatpush3.bf16.msra.mxu1 %v8829_v25  ;;  %7871 = vmatprep.subr.bf16.mxu0 %v8830_v39  ;;  %v8874_v25 = vld [vmem:[#allocation3 + $0x238] sm:$0xff]   ;;  %v8884_v49 = vld [vmem:[#allocation3 + $0x260] sm:$0xff]   ;;  %v8892_v17 = vld [vmem:[#allocation3 + $0x250] sm:$0xff]  }
 0x725   :  { %7893 = vmatprep.subr.bf16.mxu1 %v8831_v60  ;;  %v5692_v62 = vcombine.high %v5684_v59, %v5684_v59  ;;  %v5691_v41 = vrot.slane %v5677_v10, %v10761_v23  ;;  %v5748_v47 = vpack.c.bf16 %v5684_v59, %v5684_v59  ;;  %v8876_v60 = vld [vmem:[#allocation3 + $0x270] sm:$0xff]   ;;  %v8885_v51 = vld [vmem:[#allocation3 + $0x2e0] sm:$0xff]   ;;  %v8889_v30 = vld [vmem:[#allocation3 + $0x2d8] sm:$0xff]  }
 0x726   :  { %v8887_v63 = vld [vmem:[#allocation3 + $0x2a0] sm:$0xff]   ;;  %v8891_v15 = vld [vmem:[#allocation3 + $0x298] sm:$0xff]   ;;  %v8895_v18 = vld [vmem:[#allocation3 + $0x290] sm:$0xff]  }
 0x727   :  { %7872 = vmatpush3.bf16.msra.mxu0 %v8832_v6  ;;  %v5749_v2 = vpack.c.bf16 %v5692_v62, %v5692_v62  ;;  %v5693_v50 = vcombine.high %v5691_v41, %v5691_v41  ;;  %v5750_v39 = vpack.c.bf16 %v5691_v41, %v5691_v41  ;;  %v8875_v6 = vld [vmem:[#allocation3 + $0x2b8] sm:$0xff]   ;;  %v8914_v9 = vld [vmem:[#allocation3 + $0x3e8] sm:$0xff]   ;;  %v8917_v59 = vld [vmem:[#allocation3 + $0x360] sm:$0xff]  }
 0x728   :  { %7894 = vmatpush3.bf16.msra.mxu1 %v8833_v53  ;;  %7873 = vmatprep.subr.bf16.mxu0 %v8834_v0  ;;  %v8877_v53 = vld [vmem:[#allocation3 + $0x2f0] sm:$0xff]   ;;  %v8916_v10 = vld [vmem:[#allocation3 + $0x3a8] sm:$0xff]   ;;  %v8921_v62 = vld [vmem:[#allocation3 + $0x358] sm:$0xff]  }
 0x729   :  { %7895 = vmatprep.subr.bf16.mxu1 %v8835_v43  ;;  %v5751_v54 = vpack.c.bf16 %v5693_v50, %v5693_v50  ;;  %v8878_v0 = vld [vmem:[#allocation3 + $0x230] sm:$0xff]   ;;  %v8880_v43 = vld [vmem:[#allocation3 + $0x268] sm:$0xff]   ;;  %v8920_v41 = vld [vmem:[#allocation3 + $0x3a0] sm:$0xff]  }
 0x72a   :  { %v8924_v50 = vld [vmem:[#allocation3 + $0x398] sm:$0xff]  }
 0x72b   :  { %7874 = vmatpush3.bf16.msra.mxu0 %v8836_v46  ;;  %v8881_v46 = vld [vmem:[#allocation3 + $0x2e8] sm:$0xff]  }
 0x72c   :  { %7896 = vmatpush3.bf16.msra.mxu1 %v8837_v55  ;;  %7903 = vmatprep.subr.bf16.mxu0 %v8839_v31  ;;  %v8882_v55 = vld [vmem:[#allocation3 + $0x228] sm:$0xff]   ;;  %v8886_v31 = vld [vmem:[#allocation3 + $0x220] sm:$0xff]  }
 0x72d   :  { %7925 = vmatprep.subr.bf16.mxu1 %v8840_v28  ;;  %v8888_v28 = vld [vmem:[#allocation3 + $0x258] sm:$0xff]  }
 0x72e   :  { %6824 = vmatmul.mubr.bf16.vlgmr.msra.gmra.mxu0 %v5744_v13  ;;  %v8890_v13 = vld [vmem:[#allocation3 + $0x218] sm:$0xff]  }
 0x72f   :  { %7904 = vmatpush3.bf16.msra.mxu0 %v8841_v19  ;;  %6864 = vmatmul.mubr.bf16.vlgmr.msra.gmra.mxu1 %v5746_v37  ;;  %v8893_v19 = vld [vmem:[#allocation3 + $0x2d0] sm:$0xff]  }
 0x730   :  { %7905 = vmatprep.subr.bf16.mxu0 %v8843_v58  ;;  %7926 = vmatpush3.bf16.msra.mxu1 %v8842_v48  ;;  %v8894_v37 = vld [vmem:[#allocation3 + $0x210] sm:$0xff]   ;;  %v8896_v58 = vld [vmem:[#allocation3 + $0x248] sm:$0xff]  }
 0x731   :  { %7927 = vmatprep.subr.bf16.mxu1 %v8844_v20  ;;  %6903 = vmatprep.mubr.bf16.mxu0 %v5749_v2  ;;  %v8897_v48 = vld [vmem:[#allocation3 + $0x2c8] sm:$0xff]   ;;  %v8925_v2 = vld [vmem:[#allocation3 + $0x350] sm:$0xff]  }
 0x732   :  { %6943 = vmatprep.mubr.bf16.mxu1 %v5751_v54  ;;  %v8898_v20 = vld [vmem:[#allocation3 + $0x208] sm:$0xff]   ;;  %v8928_v54 = vld [vmem:[#allocation3 + $0x390] sm:$0xff]  }
 0x733   :  { %7906 = vmatpush3.bf16.msra.mxu0 %v8845_v21  ;;  %v8900_v21 = vld [vmem:[#allocation3 + $0x240] sm:$0xff]  }
 0x734   :  { %7907 = vmatprep.subr.bf16.mxu0 %v8847_v44  ;;  %7928 = vmatpush3.bf16.msra.mxu1 %v8846_v29  ;;  %v8899_v44 = vld [vmem:[#allocation3 + $0x288] sm:$0xff]   ;;  %v8901_v29 = vld [vmem:[#allocation3 + $0x2c0] sm:$0xff]  }
 0x735   :  { %7929 = vmatprep.subr.bf16.mxu1 %v8848_v26  ;;  %v5654_v26 = vld [vmem:[#allocation6 + $0x10] sm:$0xff] }
 0x737   :  { %7908 = vmatpush3.bf16.msra.mxu0 %v8849_v4  ;;  %v8902_v4 = vld [vmem:[#allocation3 + $0x200] sm:$0xff]  }
 0x738   :  { %7909 = vmatprep.subr.bf16.mxu0 %v8851_v11  ;;  %7930 = vmatpush3.bf16.msra.mxu1 %v8850_v42  ;;  %v5701_v11 = vrot.slane %v5654_v26, %v10761_v23  ;;  %v5694_v42 = vcombine.high %v5654_v26, %v5654_v26 }
 0x739   :  { %7931 = vmatprep.subr.bf16.mxu1 %v8852_v7  ;;  %v8905_v7 = vld [vmem:[#allocation3 + $0x378] sm:$0xff]  }
 0x73b   :  { %7910 = vmatpush3.bf16.msra.mxu0 %v8853_v12  ;;  %v8903_v12 = vld [vmem:[#allocation3 + $0x280] sm:$0xff]  }
 0x73c   :  { %7911 = vmatprep.subr.bf16.mxu0 %v8855_v40  ;;  %7932 = vmatpush3.bf16.msra.mxu1 %v8854_v57  ;;  %v5709_v40 = vcombine.high %v5701_v11, %v5701_v11  ;;  %v5708_v57 = vrot.slane %v5694_v42, %v10761_v23 }
 0x73d   :  { %7933 = vmatprep.subr.bf16.mxu1 %v8856_v1  ;;  %v5752_v1 = vpack.c.bf16 %v5701_v11, %v5701_v11 }
 0x73f   :  { %7912 = vmatpush3.bf16.msra.mxu0 %v8857_v8  ;;  %v8906_v8 = vld [vmem:[#allocation3 + $0x3f8] sm:$0xff]  }
 0x740   :  { %7913 = vmatprep.subr.bf16.mxu0 %v8859_v36  ;;  %7934 = vmatpush3.bf16.msra.mxu1 %v8858_v38  ;;  %v5753_v36 = vpack.c.bf16 %v5709_v40, %v5709_v40  ;;  %v5710_v38 = vcombine.high %v5708_v57, %v5708_v57 }
 0x741   :  { %7935 = vmatprep.subr.bf16.mxu1 %v8860_v45  ;;  %v8907_v45 = vld [vmem:[#allocation3 + $0x338] sm:$0xff]  }
 0x743   :  { %7914 = vmatpush3.bf16.msra.mxu0 %v8861_v14  ;;  %v5754_v14 = vpack.c.bf16 %v5708_v57, %v5708_v57 }
 0x744   :  { %7915 = vmatprep.subr.bf16.mxu0 %v8863_v35  ;;  %7936 = vmatpush3.bf16.msra.mxu1 %v8862_v61  ;;  %v8909_v35 = vld [vmem:[#allocation3 + $0x370] sm:$0xff]   ;;  %v5755_v61 = vpack.c.bf16 %v5710_v38, %v5710_v38 }
 0x745   :  { %7937 = vmatprep.subr.bf16.mxu1 %v8864_v3  ;;  %v8908_v3 = vld [vmem:[#allocation3 + $0x3b8] sm:$0xff]  }
 0x747   :  { %7916 = vmatpush3.bf16.msra.mxu0 %v8865_v5  ;;  %v8910_v5 = vld [vmem:[#allocation3 + $0x3f0] sm:$0xff]  }
 0x748   :  { %7917 = vmatprep.subr.bf16.mxu0 %v8867_v52  ;;  %7938 = vmatpush3.bf16.msra.mxu1 %v8866_v22  ;;  %v8911_v52 = vld [vmem:[#allocation3 + $0x330] sm:$0xff]   ;;  %v8913_v22 = vld [vmem:[#allocation3 + $0x368] sm:$0xff]  }
 0x749   :  { %7939 = vmatprep.subr.bf16.mxu1 %v8868_v24  ;;  %v8912_v24 = vld [vmem:[#allocation3 + $0x3b0] sm:$0xff]  }
 0x74b   :  { %7918 = vmatpush3.bf16.msra.mxu0 %v8869_v33  ;;  %v8915_v33 = vld [vmem:[#allocation3 + $0x328] sm:$0xff]  }
 0x74c   :  { %7947 = vmatprep.subr.bf16.mxu0 %v8872_v27  ;;  %7940 = vmatpush3.bf16.msra.mxu1 %v8870_v56  ;;  %v8918_v27 = vld [vmem:[#allocation3 + $0x3e0] sm:$0xff]  }
 0x74d   :  { %7969 = vmatprep.subr.bf16.mxu1 %v8873_v16  ;;  %v8919_v56 = vld [vmem:[#allocation3 + $0x320] sm:$0xff]   ;;  %v8923_v16 = vld [vmem:[#allocation3 + $0x318] sm:$0xff]  }
 0x74e   :  { %6904 = vmatmul.mubr.bf16.vlgmr.msra.gmra.mxu0 %v5748_v47  ;;  %v8922_v47 = vld [vmem:[#allocation3 + $0x3d8] sm:$0xff]  }
 0x74f   :  { %7948 = vmatpush3.bf16.msra.mxu0 %v8874_v25  ;;  %6944 = vmatmul.mubr.bf16.vlgmr.msra.gmra.mxu1 %v5750_v39  ;;  %v8926_v25 = vld [vmem:[#allocation3 + $0x3d0] sm:$0xff]  }
 0x750   :  { %7949 = vmatprep.subr.bf16.mxu0 %v8876_v60  ;;  %7970 = vmatpush3.bf16.msra.mxu1 %v8875_v6  ;;  %v8927_v39 = vld [vmem:[#allocation3 + $0x310] sm:$0xff]   ;;  %v8929_v60 = vld [vmem:[#allocation3 + $0x348] sm:$0xff]  }
 0x751   :  { %7971 = vmatprep.subr.bf16.mxu1 %v8877_v53  ;;  %6983 = vmatprep.mubr.bf16.mxu0 %v5753_v36  ;;  %v8930_v6 = vld [vmem:[#allocation3 + $0x3c8] sm:$0xff]  }
 0x752   :  { %7023 = vmatprep.mubr.bf16.mxu1 %v5755_v61  ;;  %v8931_v53 = vld [vmem:[#allocation3 + $0x308] sm:$0xff]  }
 0x753   :  { %7950 = vmatpush3.bf16.msra.mxu0 %v8878_v0  ;;  %v8933_v0 = vld [vmem:[#allocation3 + $0x340] sm:$0xff]  }
 0x754   :  { %7951 = vmatprep.subr.bf16.mxu0 %v8880_v43  ;;  %7972 = vmatpush3.bf16.msra.mxu1 %v8879_v34  ;;  %v8932_v43 = vld [vmem:[#allocation3 + $0x388] sm:$0xff]   ;;  %v8934_v34 = vld [vmem:[#allocation3 + $0x3c0] sm:$0xff]  }
 0x755   :  { %7973 = vmatprep.subr.bf16.mxu1 %v8881_v46  ;;  %v8935_v46 = vld [vmem:[#allocation3 + $0x300] sm:$0xff]  }
 0x757   :  { %7952 = vmatpush3.bf16.msra.mxu0 %v8882_v55  ;;  %v5655_v55 = vld [vmem:[#allocation6 + $0x18] sm:$0xff] }
 0x758   :  { %7953 = vmatprep.subr.bf16.mxu0 %v8884_v49  ;;  %7974 = vmatpush3.bf16.msra.mxu1 %v8883_v32  ;;  %v5718_v49 = vrot.slane %v5655_v55, %v10761_v23  ;;  %v5711_v32 = vcombine.high %v5655_v55, %v5655_v55 }
 0x759   :  { %7975 = vmatprep.subr.bf16.mxu1 %v8885_v51  ;;  %v8936_v51 = vld [vmem:[#allocation3 + $0x380] sm:$0xff]  }
 0x75b   :  { %7954 = vmatpush3.bf16.msra.mxu0 %v8886_v31  ;;  %v5726_v31 = vcombine.high %v5718_v49, %v5718_v49 }
 0x75c   :  { %7955 = vmatprep.subr.bf16.mxu0 %v8888_v28  ;;  %7976 = vmatpush3.bf16.msra.mxu1 %v8887_v63  ;;  %v5725_v28 = vrot.slane %v5711_v32, %v10761_v23  ;;  %v5756_v63 = vpack.c.bf16 %v5718_v49, %v5718_v49 }
 0x75d   :  { %7977 = vmatprep.subr.bf16.mxu1 %v8889_v30  ;;  %v5757_v30 = vpack.c.bf16 %v5726_v31, %v5726_v31 }
 0x75f   :  { %7956 = vmatpush3.bf16.msra.mxu0 %v8890_v13  ;;  %v5727_v13 = vcombine.high %v5725_v28, %v5725_v28 }
 0x760   :  { %7957 = vmatprep.subr.bf16.mxu0 %v8892_v17  ;;  %7978 = vmatpush3.bf16.msra.mxu1 %v8891_v15  ;;  %v5758_v17 = vpack.c.bf16 %v5725_v28, %v5725_v28 }
 0x761   :  { %7979 = vmatprep.subr.bf16.mxu1 %v8893_v19  ;;  %v5759_v15 = vpack.c.bf16 %v5727_v13, %v5727_v13 }
 0x763   :  { %7958 = vmatpush3.bf16.msra.mxu0 %v8894_v37 }
 0x764   :  { %7959 = vmatprep.subr.bf16.mxu0 %v8896_v58  ;;  %7980 = vmatpush3.bf16.msra.mxu1 %v8895_v18  ;;  %v7696_v58 = vld [vmem:[#allocation16] ss:$0 sm:$0xff] }
 0x765   :  { %7981 = vmatprep.subr.bf16.mxu1 %v8897_v48 }
 0x767   :  { %7960 = vmatpush3.bf16.msra.mxu0 %v8898_v20 }
 0x768   :  { %7961 = vmatprep.subr.bf16.mxu0 %v8900_v21  ;;  %7982 = vmatpush3.bf16.msra.mxu1 %v8899_v44 }
 0x769   :  { %7983 = vmatprep.subr.bf16.mxu1 %v8901_v29 }
 0x76b   :  { %7962 = vmatpush3.bf16.msra.mxu0 %v8902_v4 }
 0x76c   :  { %7991 = vmatprep.subr.bf16.mxu0 %v8905_v7  ;;  %7984 = vmatpush3.bf16.msra.mxu1 %v8903_v12 }
 0x76d   :  { %8013 = vmatprep.subr.bf16.mxu1 %v8906_v8 }
 0x76e   :  { %6984 = vmatmul.mubr.bf16.vlgmr.msra.gmra.mxu0 %v5752_v1 }
 0x76f   :  { %7992 = vmatpush3.bf16.msra.mxu0 %v8907_v45  ;;  %7024 = vmatmul.mubr.bf16.vlgmr.msra.gmra.mxu1 %v5754_v14 }
 0x770   :  { %7993 = vmatprep.subr.bf16.mxu0 %v8909_v35  ;;  %8014 = vmatpush3.bf16.msra.mxu1 %v8908_v3 }
 0x771   :  { %8015 = vmatprep.subr.bf16.mxu1 %v8910_v5  ;;  %7063 = vmatprep.mubr.bf16.mxu0 %v5757_v30 }
 0x772   :  { %7103 = vmatprep.mubr.bf16.mxu1 %v5759_v15 }
 0x773   :  { %7994 = vmatpush3.bf16.msra.mxu0 %v8911_v52 }
 0x774   :  { %7995 = vmatprep.subr.bf16.mxu0 %v8913_v22  ;;  %8016 = vmatpush3.bf16.msra.mxu1 %v8912_v24 }
 0x775   :  { %8017 = vmatprep.subr.bf16.mxu1 %v8914_v9 }
 0x777   :  { %7996 = vmatpush3.bf16.msra.mxu0 %v8915_v33 }
 0x778   :  { %7997 = vmatprep.subr.bf16.mxu0 %v8917_v59  ;;  %8018 = vmatpush3.bf16.msra.mxu1 %v8916_v10 }
 0x779   :  { %8019 = vmatprep.subr.bf16.mxu1 %v8918_v27 }
 0x77b   :  { %7998 = vmatpush3.bf16.msra.mxu0 %v8919_v56 }
 0x77c   :  { %7999 = vmatprep.subr.bf16.mxu0 %v8921_v62  ;;  %8020 = vmatpush3.bf16.msra.mxu1 %v8920_v41 }
 0x77d   :  { %8021 = vmatprep.subr.bf16.mxu1 %v8922_v47 }
 0x77f   :  { %8000 = vmatpush3.bf16.msra.mxu0 %v8923_v16 }
 0x780   :  { %8001 = vmatprep.subr.bf16.mxu0 %v8925_v2  ;;  %8022 = vmatpush3.bf16.msra.mxu1 %v8924_v50 }
 0x781   :  { %8023 = vmatprep.subr.bf16.mxu1 %v8926_v25 }
 0x783   :  { %8002 = vmatpush3.bf16.msra.mxu0 %v8927_v39 }
 0x784   :  { %8003 = vmatprep.subr.bf16.mxu0 %v8929_v60  ;;  %8024 = vmatpush3.bf16.msra.mxu1 %v8928_v54 }
 0x785   :  { %8025 = vmatprep.subr.bf16.mxu1 %v8930_v6 }
 0x787   :  { %8004 = vmatpush3.bf16.msra.mxu0 %v8931_v53 }
 0x788   :  { %8005 = vmatprep.subr.bf16.mxu0 %v8933_v0  ;;  %8026 = vmatpush3.bf16.msra.mxu1 %v8932_v43 }
 0x789   :  { %8027 = vmatprep.subr.bf16.mxu1 %v8934_v34 }
 0x78b   :  { %8006 = vmatpush3.bf16.msra.mxu0 %v8935_v46 }
 0x78c   :  { %8028 = vmatpush3.bf16.msra.mxu1 %v8936_v51 }
 0x78e   :  { %7064 = vmatmul.mubr.bf16.vlgmr.msra.gmra.mxu0 %v5756_v63 }
 0x78f   :  { %7104 = vmatmul.mubr.bf16.vlgmr.msra.gmra.mxu1 %v5758_v17 }
 0x7ee   :  { %v7875_v19 = vpop.f32.mrf.mxu0 }
 0x7ef   :  { %v7897_v37 = vpop.f32.mrf.mxu1 }
 0x7f0   :  { %v7876_v18 = vpop.f32.mrf.mxu0 }
 0x7f1   :  { %v7877_v48 = vadd.f32 %v7876_v18, %v7875_v19  ;;  %v7898_v20 = vpop.f32.mrf.mxu1 }
 0x7f2   :  { %v7878_v21 = vpop.f32.mrf.mxu0  ;;  %v7899_v23 = vadd.f32 %v7898_v20, %v7897_v37 }
 0x7f3   :  { %v6826_v44 = vadd.f32 %v7877_v48, %v7696_v58  ;;  %v7900_v29 = vpop.f32.mrf.mxu1 }
 0x7f4   :  { %v7879_v26 = vpop.f32.mrf.mxu0 }
 0x7f5   :  { %v6866_v4 = vadd.f32 %v7899_v23, %v6826_v44  ;;  %v7901_v11 = vpop.f32.mrf.mxu1 }
 0x80e   :  { %v7919_v42 = vpop.f32.mrf.mxu0 }
 0x80f   :  { %v7941_v7 = vpop.f32.mrf.mxu1 }
 0x810   :  { %v7920_v12 = vpop.f32.mrf.mxu0 }
 0x811   :  { %v7942_v40 = vpop.f32.mrf.mxu1  ;;  %v7921_v22 = vadd.f32 %v7920_v12, %v7919_v42 }
 0x812   :  { %v7922_v57 = vpop.f32.mrf.mxu0  ;;  %v7943_v9 = vadd.f32 %v7942_v40, %v7941_v7 }
 0x813   :  { %v7944_v1 = vpop.f32.mrf.mxu1  ;;  %v6906_v24 = vadd.f32 %v7921_v22, %v6866_v4 }
 0x814   :  { %v7923_v8 = vpop.f32.mrf.mxu0 }
 0x815   :  { %v7945_v36 = vpop.f32.mrf.mxu1  ;;  %v6946_v59 = vadd.f32 %v7943_v9, %v6906_v24 }
 0x82e   :  { %v7963_v38 = vpop.f32.mrf.mxu0 }
 0x82f   :  { %v7985_v45 = vpop.f32.mrf.mxu1 }
 0x830   :  { %v7964_v14 = vpop.f32.mrf.mxu0 }
 0x831   :  { %v7986_v35 = vpop.f32.mrf.mxu1  ;;  %v7965_v33 = vadd.f32 %v7964_v14, %v7963_v38 }
 0x832   :  { %v7966_v61 = vpop.f32.mrf.mxu0  ;;  %v7987_v27 = vadd.f32 %v7986_v35, %v7985_v45 }
 0x833   :  { %v7988_v3 = vpop.f32.mrf.mxu1  ;;  %v6986_v10 = vadd.f32 %v7965_v33, %v6946_v59 }
 0x834   :  { %v7967_v5 = vpop.f32.mrf.mxu0 }
 0x835   :  { %v7989_v52 = vpop.f32.mrf.mxu1  ;;  %v7026_v47 = vadd.f32 %v7987_v27, %v6986_v10 }
 0x84e   :  { %v8007_v56 = vpop.f32.mrf.mxu0 }
 0x84f   :  { %v8029_v62 = vpop.f32.mrf.mxu1 }
 0x850   :  { %v8008_v41 = vpop.f32.mrf.mxu0 }
 0x851   :  { %v8009_v16 = vadd.f32 %v8008_v41, %v8007_v56  ;;  %v8030_v2 = vpop.f32.mrf.mxu1 }
 0x852   :  { %v8010_v50 = vpop.f32.mrf.mxu0  ;;  %v8031_v39 = vadd.f32 %v8030_v2, %v8029_v62 }
 0x853   :  { %v7066_v25 = vadd.f32 %v8009_v16, %v7026_v47  ;;  %v8032_v60 = vpop.f32.mrf.mxu1 }
 0x854   :  { %v8011_v54 = vpop.f32.mrf.mxu0 }
 0x855   :  { %v7106_v6 = vadd.f32 %v8031_v39, %v7066_v25  ;;  %v8033_v53 = vpop.f32.mrf.mxu1 }
 0x857   :  { %7111 = vst [vmem:[#allocation17] sm:$0x3] %v7106_v6 }
 0x858   :  { %9089 = shalt.err (!%p9086_p11)
}
 0x859   :  { %7121 = dma.vmem_to_hbm [thread:$0]  %s7119_s3, 32, %s10783_s9, [#allocation10]  }
 0x85a   :  { %9108 = dma.done.wait [#allocation10], 32  }
 0x85b   :  { %9109 = vsyncadd [#allocation10], 4294967264 }
 0x85c   :  { %7125 = vsyncpa [#allocation9], 1 }
 0x85d   :  { %7126 = vsyncpa [#allocation12], 1 }
 0x85e   :  { %7127 = vsyncpa [#allocation15], 1 }
 0x85f   :  { %7128 = vsyncpa [#allocation10], 1 }
 0x860   :  { %7129 = vsyncmov [#allocation7] }
 0x863   :  { %s7130_s16 = vpop.sfrf %7129 }
 0x864   :  { %p7825_p12 = scmp.ne.s32.totalorder %s7130_s16, 0 }
 0x866   :  { %7134 = shalt.err (%p7825_p12)  }
 0x867   :  { %7136 = vsyncmov [#allocation7 + $0x1] }
 0x86a   :  { %s7137_s17 = vpop.sfrf %7136 }
 0x86b   :  { %p7826_p13 = scmp.ne.s32.totalorder %s7137_s17, 0 }
 0x86d   :  { %7141 = shalt.err (%p7826_p13)  }

</bundles_post_ra>
